<compile_context>
chip_gen: v7x
topology: tpu7x:2x2x1
jax: 0.10.0
libtpu: 0.0.40
codegen_flags: <defaults>
</compile_context>

<pallas_src>
import functools

import jax
import jax.numpy as jnp
from jax.experimental import pallas as pl
from jax.experimental.pallas import tpu as pltpu


_PADL = 8                                   # left halo width -> aligned interior store
_TAPS = tuple((dy, dx) for dy in range(3) for dx in range(3))


def _eram_kernel(Bt, H, W, C,
                 x_ref, weff_ref, w3_ref, b3_ref,
                 w1_ref, b1_ref, w2_ref, b2_ref,
                 o_ref, pad_ref):
    """ERAM forward for a block of Bt images, entirely in VMEM."""
    HW = H * W
    M = Bt * HW
    Wp = pad_ref.shape[2]

    xb = x_ref[...]                                    # (Bt, H, W, C)  f32
    xf = xb.reshape(Bt, HW, C)

    # ---------- channel branch: global mean + unbiased variance -------------
    mean = jnp.sum(xf, axis=1) * (1.0 / HW)            # (Bt, C)
    cen = xf - mean[:, None, :]
    var = jnp.sum(cen * cen, axis=1) * (1.0 / (HW - 1))
    si = mean + var                                    # AvgPool2d(H) + var

    # conv1/conv2 act on a 1x1 pooled map, so only their 3x3 centre taps
    # contribute: a tiny per-channel MLP (broadcast + lane reduce, no M=1 dots).
    h = jnp.sum(si[:, None, :] * w1_ref[...][None, :, :], axis=-1) + b1_ref[...]
    h = jnp.maximum(h, 0.0)                            # (Bt, C//2)
    mi_ca = jnp.sum(h[:, None, :] * w2_ref[...][None, :, :], axis=-1) + b2_ref[...]

    # ---------- spatial branch -----------------------------------------------
    # (re)zero only the halo each step: rows 0 / H+1 and one column either side.
    zrow = jnp.zeros((Bt, 1, Wp, C), jnp.float32)
    zcol = jnp.zeros((Bt, H, 1, C), jnp.float32)
    pad_ref[:, 0:1, :, :] = zrow
    pad_ref[:, H + 1:H + 2, :, :] = zrow
    pad_ref[:, 1:H + 1, _PADL - 1:_PADL, :] = zcol
    pad_ref[:, 1:H + 1, _PADL + W:_PADL + W + 1, :] = zcol

    def conv3x3(w_cat_ref, bias):
        # One 3x3 "same" conv of the image currently held in pad_ref's interior:
        # K-concatenated im2col slab -> a single (M, 9C) @ (9C, C) MXU matmul.
        pieces = []
        for dy, dx in _TAPS:
            c0 = _PADL - 1 + dx
            pieces.append(pad_ref[:, dy:dy + H, c0:c0 + W, :].reshape(M, C))
        slab = jnp.concatenate(pieces, axis=-1).astype(jnp.bfloat16)   # (M, 9C)
        out = jnp.dot(slab, w_cat_ref[...],
                      preferred_element_type=jnp.float32)              # (M, C) f32
        return out if bias is None else out + bias

    # stage A: depthwise 3x3 + pointwise 1x1 fused into per-tap dense weights.
    pad_ref[:, 1:H + 1, _PADL:_PADL + W, :] = xb       # sublane-aligned interior store
    y1 = jnp.maximum(conv3x3(weff_ref, None), 0.0)     # relu(dconv(x)),  (M, C)

    # stage B: conv3 on relu(dconv(x)); reuse the same pad scratch (halo still 0).
    pad_ref[:, 1:H + 1, _PADL:_PADL + W, :] = y1.reshape(Bt, H, W, C)
    mi_sa = conv3x3(w3_ref, b3_ref[...])               # (M, C)

    # fused sigmoid gate * x
    gate = jax.nn.sigmoid(mi_sa.reshape(Bt, HW, C) + mi_ca[:, None, :])
    o_ref[...] = (gate * xf).reshape(Bt, H, W, C)


def _pick_block_b(B):
    """Images per grid step: batch several but keep >= 2 grid steps so both
    v7x TensorCores (megacore) get work."""
    for bt in (8, 4, 2):
        if B % bt == 0 and B // bt >= 2:
            return bt
    return 1


def eram_forward(params, x_nchw, block_b=None):
    """ERAM forward with an NCHW interface like the PyTorch module."""
    x = jnp.transpose(x_nchw, (0, 2, 3, 1)).astype(jnp.float32)      # NHWC
    B, H, W, C = x.shape
    # TODO(synk): assumes dimension == H == W (AvgPool2d output is 1x1), which is
    # how the module is used; a larger pooled map would need the full conv1/conv2
    # 3x3 path in the channel branch.
    Bt = block_b if block_b is not None else _pick_block_b(B)
    assert B % Bt == 0
    Wp = ((_PADL + W + 1 + 7) // 8) * 8      # 1 right-halo column, sublane-rounded

    # trace-time weight prep:
    #  * depthwise+pointwise fusion:  W_eff[t] = diag(dw[t]) @ pw
    #  * K-concatenation of the 9 taps for both conv stages -> (9C, C)
    #  * MXU operands in bf16 (accumulation stays f32 in-kernel)
    w_eff = params["dw_w"][:, :, None] * params["pw_w"][None, :, :]
    w_eff = w_eff.reshape(9 * C, C).astype(jnp.bfloat16)
    w3c = params["w3"].reshape(9 * C, C).astype(jnp.bfloat16)

    def full2(a):
        return pl.BlockSpec(a.shape, lambda i: (0, 0))

    y = pl.pallas_call(
        functools.partial(_eram_kernel, Bt, H, W, C),
        out_shape=jax.ShapeDtypeStruct((B, H, W, C), jnp.float32),
        grid=(B // Bt,),
        in_specs=[
            pl.BlockSpec((Bt, H, W, C), lambda i: (i, 0, 0, 0)),     # x (per block)
            full2(w_eff),                                            # fused dw+pw
            full2(w3c),                                              # conv3 (K-concat)
            full2(params["b3"]),
            full2(params["w1"]),
            full2(params["b1"]),
            full2(params["w2"]),
            full2(params["b2"]),
        ],
        out_specs=pl.BlockSpec((Bt, H, W, C), lambda i: (i, 0, 0, 0)),
        scratch_shapes=[pltpu.VMEM((Bt, H + 2, Wp, C), jnp.float32)],
        compiler_params=pltpu.CompilerParams(
            dimension_semantics=("parallel",)),
    )(x, w_eff, w3c, params["b3"], params["w1"], params["b1"],
      params["w2"], params["b2"])
    return jnp.transpose(y, (0, 3, 1, 2))


# -----------------------------------------------------------------------------
# plain-JAX reference (mirrors the PyTorch forward) for a numerical check
# -----------------------------------------------------------------------------
def eram_reference(params, x_nchw):
    x = jnp.transpose(x_nchw, (0, 2, 3, 1)).astype(jnp.float32)
    B, H, W, C = x.shape
    xf = x.reshape(B, H * W, C)
    mean = jnp.mean(xf, axis=1)
    var = jnp.var(xf, axis=1, ddof=1)                      # unbiased, like torch
    si = mean + var                                        # (B, C)
    h = jax.nn.relu(jnp.einsum("bc,jc->bj", si, params["w1"]) + params["b1"])
    mi_ca = jnp.einsum("bj,kj->bk", h, params["w2"]) + params["b2"]

    xpad = jnp.pad(x, ((0, 0), (1, 1), (1, 1), (0, 0)))
    dw = jnp.zeros_like(x)
    for t, (dy, dx) in enumerate(_TAPS):
        dw = dw + xpad[:, dy:dy + H, dx:dx + W, :] * params["dw_w"][t]
    y1 = jax.nn.relu(jnp.einsum("bhwc,cd->bhwd", dw, params["pw_w"]))
    ypad = jnp.pad(y1, ((0, 0), (1, 1), (1, 1), (0, 0)))
    mi_sa = jnp.zeros_like(x)
    for t, (dy, dx) in enumerate(_TAPS):
        mi_sa = mi_sa + jnp.einsum("bhwc,cd->bhwd",
                                   ypad[:, dy:dy + H, dx:dx + W, :],
                                   params["w3"][t])
    mi_sa = mi_sa + params["b3"].reshape(1, 1, 1, C)
    out = jax.nn.sigmoid(mi_sa + mi_ca[:, None, None, :]) * x
    return jnp.transpose(out, (0, 3, 1, 2))


# -----------------------------------------------------------------------------
# deterministic synthetic parameters (shapes per module definition)
# -----------------------------------------------------------------------------
def init_params(key, C):
    ks = jax.random.split(key, 8)

    def w(k, shape, s=0.1):
        return jax.random.normal(k, shape, jnp.float32) * s

    # TODO(synk): depthwise_separable_conv is undefined in the reference model;
    # assumed = depthwise 3x3 (groups=C) + pointwise 1x1, both bias=False.
    return dict(
        dw_w=w(ks[0], (9, C)),             # depthwise taps, (dy,dx) row-major
        pw_w=w(ks[1], (C, C)),             # pointwise, (Cin, Cout)
        w3=w(ks[2], (9, C, C), 0.05),      # conv3 taps, (tap, Cin, Cout)
        b3=w(ks[3], (1, C), 0.05),
        w1=w(ks[4], (C // 2, C)),          # conv1 centre tap, (Cout, Cin)
        b1=w(ks[5], (1, C // 2), 0.05),
        w2=w(ks[6], (C, C // 2)),          # conv2 centre tap, (Cout, Cin)
        b2=w(ks[7], (1, C), 0.05),
    )


# -----------------------------------------------------------------------------
if __name__ == "__main__":
    key = jax.random.PRNGKey(0)
    kp, kx = jax.random.split(key)
    # channel_begin = 32, dimension = 16 (== H == W so AvgPool2d is the global mean)
    B, C, H, W = 2, 32, 16, 16
    params = init_params(kp, C)
    x = jax.random.uniform(kx, (B, C, H, W), dtype=jnp.float32)    # NCHW like torch

    fwd = jax.jit(eram_forward)
    y = jax.block_until_ready(fwd(params, x))

    assert y.shape == (B, C, H, W), y.shape
    assert bool(jnp.all(jnp.isfinite(y)))
    ref = eram_reference(params, x)
    err = float(jnp.max(jnp.abs(y - ref)))
    assert err < 2e-2, f"max abs err {err}"   # bf16 MXU operands, f32 accumulation
    print("KERNEL_OK")
</pallas_src>

<mosaic_0001>
module attributes {stable_mosaic.version = 11 : i64} {
  func.func @_eram_kernel(%arg0: i32, %arg1: memref<1x16x16x32xf32, #tpu.memory_space<vmem>>, %arg2: memref<288x32xbf16, #tpu.memory_space<vmem>>, %arg3: memref<288x32xbf16, #tpu.memory_space<vmem>>, %arg4: memref<1x32xf32, #tpu.memory_space<vmem>>, %arg5: memref<16x32xf32, #tpu.memory_space<vmem>>, %arg6: memref<1x16xf32, #tpu.memory_space<vmem>>, %arg7: memref<32x16xf32, #tpu.memory_space<vmem>>, %arg8: memref<1x32xf32, #tpu.memory_space<vmem>>, %arg9: memref<1x16x16x32xf32, #tpu.memory_space<vmem>>, %arg10: memref<1x18x32x32xf32, #tpu.memory_space<vmem>>) attributes {dimension_semantics = [#tpu.dimension_semantics<parallel>], iteration_bounds = array<i64: 2>, scalar_prefetch = 0 : i64, scratch_operands = 1 : i64, tpu.core_type = #tpu.core_type<tc>, window_params = [{transform_indices = @transform_0, window_bounds = array<i64: 1, 16, 16, 32>}, {pipeline_mode = #tpu.pipeline_mode<synchronous>, transform_indices = @transform_1, window_bounds = array<i64: 288, 32>}, {pipeline_mode = #tpu.pipeline_mode<synchronous>, transform_indices = @transform_2, window_bounds = array<i64: 288, 32>}, {pipeline_mode = #tpu.pipeline_mode<synchronous>, transform_indices = @transform_3, window_bounds = array<i64: 1, 32>}, {pipeline_mode = #tpu.pipeline_mode<synchronous>, transform_indices = @transform_4, window_bounds = array<i64: 16, 32>}, {pipeline_mode = #tpu.pipeline_mode<synchronous>, transform_indices = @transform_5, window_bounds = array<i64: 1, 16>}, {pipeline_mode = #tpu.pipeline_mode<synchronous>, transform_indices = @transform_6, window_bounds = array<i64: 32, 16>}, {pipeline_mode = #tpu.pipeline_mode<synchronous>, transform_indices = @transform_7, window_bounds = array<i64: 1, 32>}, {transform_indices = @transform_8, window_bounds = array<i64: 1, 16, 16, 32>}]} {
    %c0 = arith.constant 0 : index
    %c0_0 = arith.constant 0 : index
    %c0_1 = arith.constant 0 : index
    %c0_2 = arith.constant 0 : index
    %0 = vector.load %arg1[%c0, %c0_0, %c0_1, %c0_2] : memref<1x16x16x32xf32, #tpu.memory_space<vmem>>, vector<1x16x16x32xf32>
    %1 = vector.shape_cast %0 : vector<1x16x16x32xf32> to vector<1x256x32xf32>
    %cst = arith.constant dense<0.000000e+00> : vector<1x32xf32>
    %2 = vector.multi_reduction <add>, %1, %cst [1] : vector<1x256x32xf32> to vector<1x32xf32>
    %cst_3 = arith.constant 3.906250e-03 : f32
    %3 = vector.broadcast %cst_3 : f32 to vector<1x32xf32>
    %4 = arith.mulf %2, %3 : vector<1x32xf32>
    %5 = vector.shape_cast %4 : vector<1x32xf32> to vector<1x1x32xf32>
    %6 = vector.broadcast %5 : vector<1x1x32xf32> to vector<1x256x32xf32>
    %7 = arith.subf %1, %6 : vector<1x256x32xf32>
    %8 = arith.mulf %7, %7 : vector<1x256x32xf32>
    %cst_4 = arith.constant dense<0.000000e+00> : vector<1x32xf32>
    %9 = vector.multi_reduction <add>, %8, %cst_4 [1] : vector<1x256x32xf32> to vector<1x32xf32>
    %cst_5 = arith.constant 0.00392156886 : f32
    %10 = vector.broadcast %cst_5 : f32 to vector<1x32xf32>
    %11 = arith.mulf %9, %10 : vector<1x32xf32>
    %12 = arith.addf %4, %11 : vector<1x32xf32>
    %13 = vector.shape_cast %12 : vector<1x32xf32> to vector<1x1x32xf32>
    %c0_6 = arith.constant 0 : index
    %c0_7 = arith.constant 0 : index
    %14 = vector.load %arg5[%c0_6, %c0_7] : memref<16x32xf32, #tpu.memory_space<vmem>>, vector<16x32xf32>
    %15 = vector.shape_cast %14 : vector<16x32xf32> to vector<1x16x32xf32>
    %16 = vector.broadcast %13 : vector<1x1x32xf32> to vector<1x16x32xf32>
    %17 = arith.mulf %16, %15 : vector<1x16x32xf32>
    %cst_8 = arith.constant dense<0.000000e+00> : vector<1x16xf32>
    %18 = vector.multi_reduction <add>, %17, %cst_8 [2] : vector<1x16x32xf32> to vector<1x16xf32>
    %c0_9 = arith.constant 0 : index
    %c0_10 = arith.constant 0 : index
    %19 = vector.load %arg6[%c0_9, %c0_10] : memref<1x16xf32, #tpu.memory_space<vmem>>, vector<1x16xf32>
    %20 = arith.addf %18, %19 : vector<1x16xf32>
    %cst_11 = arith.constant 0.000000e+00 : f32
    %21 = vector.broadcast %cst_11 : f32 to vector<1x16xf32>
    %22 = arith.maximumf %20, %21 : vector<1x16xf32>
    %23 = vector.shape_cast %22 : vector<1x16xf32> to vector<1x1x16xf32>
    %c0_12 = arith.constant 0 : index
    %c0_13 = arith.constant 0 : index
    %24 = vector.load %arg7[%c0_12, %c0_13] : memref<32x16xf32, #tpu.memory_space<vmem>>, vector<32x16xf32>
    %25 = vector.shape_cast %24 : vector<32x16xf32> to vector<1x32x16xf32>
    %26 = vector.broadcast %23 : vector<1x1x16xf32> to vector<1x32x16xf32>
    %27 = arith.mulf %26, %25 : vector<1x32x16xf32>
    %cst_14 = arith.constant dense<0.000000e+00> : vector<1x32xf32>
    %28 = vector.multi_reduction <add>, %27, %cst_14 [2] : vector<1x32x16xf32> to vector<1x32xf32>
    %c0_15 = arith.constant 0 : index
    %c0_16 = arith.constant 0 : index
    %29 = vector.load %arg8[%c0_15, %c0_16] : memref<1x32xf32, #tpu.memory_space<vmem>>, vector<1x32xf32>
    %30 = arith.addf %28, %29 : vector<1x32xf32>
    %cst_17 = arith.constant 0.000000e+00 : f32
    %31 = vector.broadcast %cst_17 : f32 to vector<1x1x32x32xf32>
    %cst_18 = arith.constant 0.000000e+00 : f32
    %32 = vector.broadcast %cst_18 : f32 to vector<1x16x1x32xf32>
    %c0_19 = arith.constant 0 : index
    %c0_20 = arith.constant 0 : index
    %c0_21 = arith.constant 0 : index
    %c0_22 = arith.constant 0 : index
    %33 = vector.load %arg10[%c0_19, %c0_20, %c0_21, %c0_22] : memref<1x18x32x32xf32, #tpu.memory_space<vmem>>, vector<1x1x32x32xf32>
    tpu.vector_store %arg10[%c0_19, %c0_20, %c0_21, %c0_22], %31 {strides = array<i32>} : memref<1x18x32x32xf32, #tpu.memory_space<vmem>>, vector<1x1x32x32xf32>,
    %c0_23 = arith.constant 0 : index
    %c17 = arith.constant 17 : index
    %c0_24 = arith.constant 0 : index
    %c0_25 = arith.constant 0 : index
    %34 = vector.load %arg10[%c0_23, %c17, %c0_24, %c0_25] : memref<1x18x32x32xf32, #tpu.memory_space<vmem>>, vector<1x1x32x32xf32>
    tpu.vector_store %arg10[%c0_23, %c17, %c0_24, %c0_25], %31 {strides = array<i32>} : memref<1x18x32x32xf32, #tpu.memory_space<vmem>>, vector<1x1x32x32xf32>,
    %c0_26 = arith.constant 0 : index
    %c1 = arith.constant 1 : index
    %c7 = arith.constant 7 : index
    %c0_27 = arith.constant 0 : index
    %35 = vector.load %arg10[%c0_26, %c1, %c7, %c0_27] : memref<1x18x32x32xf32, #tpu.memory_space<vmem>>, vector<1x16x1x32xf32>
    tpu.vector_store %arg10[%c0_26, %c1, %c7, %c0_27], %32 {strides = array<i32>} : memref<1x18x32x32xf32, #tpu.memory_space<vmem>>, vector<1x16x1x32xf32>,
    %c0_28 = arith.constant 0 : index
    %c1_29 = arith.constant 1 : index
    %c24 = arith.constant 24 : index
    %c0_30 = arith.constant 0 : index
    %36 = vector.load %arg10[%c0_28, %c1_29, %c24, %c0_30] : memref<1x18x32x32xf32, #tpu.memory_space<vmem>>, vector<1x16x1x32xf32>
    tpu.vector_store %arg10[%c0_28, %c1_29, %c24, %c0_30], %32 {strides = array<i32>} : memref<1x18x32x32xf32, #tpu.memory_space<vmem>>, vector<1x16x1x32xf32>,
    %c0_31 = arith.constant 0 : index
    %c1_32 = arith.constant 1 : index
    %c8 = arith.constant 8 : index
    %c0_33 = arith.constant 0 : index
    %37 = vector.load %arg10[%c0_31, %c1_32, %c8, %c0_33] : memref<1x18x32x32xf32, #tpu.memory_space<vmem>>, vector<1x16x16x32xf32>
    tpu.vector_store %arg10[%c0_31, %c1_32, %c8, %c0_33], %0 {strides = array<i32>} : memref<1x18x32x32xf32, #tpu.memory_space<vmem>>, vector<1x16x16x32xf32>,
    %c0_34 = arith.constant 0 : index
    %c0_35 = arith.constant 0 : index
    %c7_36 = arith.constant 7 : index
    %c0_37 = arith.constant 0 : index
    %38 = vector.load %arg10[%c0_34, %c0_35, %c7_36, %c0_37] : memref<1x18x32x32xf32, #tpu.memory_space<vmem>>, vector<1x16x16x32xf32>
    %39 = vector.shape_cast %38 : vector<1x16x16x32xf32> to vector<256x32xf32>
    %c0_38 = arith.constant 0 : index
    %c0_39 = arith.constant 0 : index
    %c8_40 = arith.constant 8 : index
    %c0_41 = arith.constant 0 : index
    %40 = vector.load %arg10[%c0_38, %c0_39, %c8_40, %c0_41] : memref<1x18x32x32xf32, #tpu.memory_space<vmem>>, vector<1x16x16x32xf32>
    %41 = vector.shape_cast %40 : vector<1x16x16x32xf32> to vector<256x32xf32>
    %c0_42 = arith.constant 0 : index
    %c0_43 = arith.constant 0 : index
    %c9 = arith.constant 9 : index
    %c0_44 = arith.constant 0 : index
    %42 = vector.load %arg10[%c0_42, %c0_43, %c9, %c0_44] : memref<1x18x32x32xf32, #tpu.memory_space<vmem>>, vector<1x16x16x32xf32>
    %43 = vector.shape_cast %42 : vector<1x16x16x32xf32> to vector<256x32xf32>
    %c0_45 = arith.constant 0 : index
    %c1_46 = arith.constant 1 : index
    %c7_47 = arith.constant 7 : index
    %c0_48 = arith.constant 0 : index
    %44 = vector.load %arg10[%c0_45, %c1_46, %c7_47, %c0_48] : memref<1x18x32x32xf32, #tpu.memory_space<vmem>>, vector<1x16x16x32xf32>
    %45 = vector.shape_cast %44 : vector<1x16x16x32xf32> to vector<256x32xf32>
    %c0_49 = arith.constant 0 : index
    %c1_50 = arith.constant 1 : index
    %c8_51 = arith.constant 8 : index
    %c0_52 = arith.constant 0 : index
    %46 = vector.load %arg10[%c0_49, %c1_50, %c8_51, %c0_52] : memref<1x18x32x32xf32, #tpu.memory_space<vmem>>, vector<1x16x16x32xf32>
    %47 = vector.shape_cast %46 : vector<1x16x16x32xf32> to vector<256x32xf32>
    %c0_53 = arith.constant 0 : index
    %c1_54 = arith.constant 1 : index
    %c9_55 = arith.constant 9 : index
    %c0_56 = arith.constant 0 : index
    %48 = vector.load %arg10[%c0_53, %c1_54, %c9_55, %c0_56] : memref<1x18x32x32xf32, #tpu.memory_space<vmem>>, vector<1x16x16x32xf32>
    %49 = vector.shape_cast %48 : vector<1x16x16x32xf32> to vector<256x32xf32>
    %c0_57 = arith.constant 0 : index
    %c2 = arith.constant 2 : index
    %c7_58 = arith.constant 7 : index
    %c0_59 = arith.constant 0 : index
    %50 = vector.load %arg10[%c0_57, %c2, %c7_58, %c0_59] : memref<1x18x32x32xf32, #tpu.memory_space<vmem>>, vector<1x16x16x32xf32>
    %51 = vector.shape_cast %50 : vector<1x16x16x32xf32> to vector<256x32xf32>
    %c0_60 = arith.constant 0 : index
    %c2_61 = arith.constant 2 : index
    %c8_62 = arith.constant 8 : index
    %c0_63 = arith.constant 0 : index
    %52 = vector.load %arg10[%c0_60, %c2_61, %c8_62, %c0_63] : memref<1x18x32x32xf32, #tpu.memory_space<vmem>>, vector<1x16x16x32xf32>
    %53 = vector.shape_cast %52 : vector<1x16x16x32xf32> to vector<256x32xf32>
    %c0_64 = arith.constant 0 : index
    %c2_65 = arith.constant 2 : index
    %c9_66 = arith.constant 9 : index
    %c0_67 = arith.constant 0 : index
    %54 = vector.load %arg10[%c0_64, %c2_65, %c9_66, %c0_67] : memref<1x18x32x32xf32, #tpu.memory_space<vmem>>, vector<1x16x16x32xf32>
    %55 = vector.shape_cast %54 : vector<1x16x16x32xf32> to vector<256x32xf32>
    %56 = tpu.concatenate %39, %41, %43, %45, %47, %49, %51, %53, %55 in 1 : vector<256x32xf32>, vector<256x32xf32>, vector<256x32xf32>, vector<256x32xf32>, vector<256x32xf32>, vector<256x32xf32>, vector<256x32xf32>, vector<256x32xf32>, vector<256x32xf32> -> vector<256x288xf32>
    %57 = arith.truncf %56 : vector<256x288xf32> to vector<256x288xbf16>
    %c0_68 = arith.constant 0 : index
    %c0_69 = arith.constant 0 : index
    %58 = vector.load %arg2[%c0_68, %c0_69] : memref<288x32xbf16, #tpu.memory_space<vmem>>, vector<288x32xbf16>
    %cst_70 = arith.constant dense<0.000000e+00> : vector<256x32xf32>
    %59 = tpu.matmul %57, %58, %cst_70 {dimension_numbers = #tpu.dot_dimension_numbers<[1], [0], [0], [1], [0, 0, 1, 1], [], []>} : vector<256x288xbf16>, vector<288x32xbf16>, vector<256x32xf32> -> vector<256x32xf32>
    %cst_71 = arith.constant 0.000000e+00 : f32
    %60 = vector.broadcast %cst_71 : f32 to vector<256x32xf32>
    %61 = arith.maximumf %59, %60 : vector<256x32xf32>
    %62 = vector.shape_cast %61 : vector<256x32xf32> to vector<1x16x16x32xf32>
    %c0_72 = arith.constant 0 : index
    %c1_73 = arith.constant 1 : index
    %c8_74 = arith.constant 8 : index
    %c0_75 = arith.constant 0 : index
    %63 = vector.load %arg10[%c0_72, %c1_73, %c8_74, %c0_75] : memref<1x18x32x32xf32, #tpu.memory_space<vmem>>, vector<1x16x16x32xf32>
    tpu.vector_store %arg10[%c0_72, %c1_73, %c8_74, %c0_75], %62 {strides = array<i32>} : memref<1x18x32x32xf32, #tpu.memory_space<vmem>>, vector<1x16x16x32xf32>,
    %c0_76 = arith.constant 0 : index
    %c0_77 = arith.constant 0 : index
    %64 = vector.load %arg4[%c0_76, %c0_77] : memref<1x32xf32, #tpu.memory_space<vmem>>, vector<1x32xf32>
    %c0_78 = arith.constant 0 : index
    %c0_79 = arith.constant 0 : index
    %c7_80 = arith.constant 7 : index
    %c0_81 = arith.constant 0 : index
    %65 = vector.load %arg10[%c0_78, %c0_79, %c7_80, %c0_81] : memref<1x18x32x32xf32, #tpu.memory_space<vmem>>, vector<1x16x16x32xf32>
    %66 = vector.shape_cast %65 : vector<1x16x16x32xf32> to vector<256x32xf32>
    %c0_82 = arith.constant 0 : index
    %c0_83 = arith.constant 0 : index
    %c8_84 = arith.constant 8 : index
    %c0_85 = arith.constant 0 : index
    %67 = vector.load %arg10[%c0_82, %c0_83, %c8_84, %c0_85] : memref<1x18x32x32xf32, #tpu.memory_space<vmem>>, vector<1x16x16x32xf32>
    %68 = vector.shape_cast %67 : vector<1x16x16x32xf32> to vector<256x32xf32>
    %c0_86 = arith.constant 0 : index
    %c0_87 = arith.constant 0 : index
    %c9_88 = arith.constant 9 : index
    %c0_89 = arith.constant 0 : index
    %69 = vector.load %arg10[%c0_86, %c0_87, %c9_88, %c0_89] : memref<1x18x32x32xf32, #tpu.memory_space<vmem>>, vector<1x16x16x32xf32>
    %70 = vector.shape_cast %69 : vector<1x16x16x32xf32> to vector<256x32xf32>
    %c0_90 = arith.constant 0 : index
    %c1_91 = arith.constant 1 : index
    %c7_92 = arith.constant 7 : index
    %c0_93 = arith.constant 0 : index
    %71 = vector.load %arg10[%c0_90, %c1_91, %c7_92, %c0_93] : memref<1x18x32x32xf32, #tpu.memory_space<vmem>>, vector<1x16x16x32xf32>
    %72 = vector.shape_cast %71 : vector<1x16x16x32xf32> to vector<256x32xf32>
    %c0_94 = arith.constant 0 : index
    %c1_95 = arith.constant 1 : index
    %c8_96 = arith.constant 8 : index
    %c0_97 = arith.constant 0 : index
    %73 = vector.load %arg10[%c0_94, %c1_95, %c8_96, %c0_97] : memref<1x18x32x32xf32, #tpu.memory_space<vmem>>, vector<1x16x16x32xf32>
    %74 = vector.shape_cast %73 : vector<1x16x16x32xf32> to vector<256x32xf32>
    %c0_98 = arith.constant 0 : index
    %c1_99 = arith.constant 1 : index
    %c9_100 = arith.constant 9 : index
    %c0_101 = arith.constant 0 : index
    %75 = vector.load %arg10[%c0_98, %c1_99, %c9_100, %c0_101] : memref<1x18x32x32xf32, #tpu.memory_space<vmem>>, vector<1x16x16x32xf32>
    %76 = vector.shape_cast %75 : vector<1x16x16x32xf32> to vector<256x32xf32>
    %c0_102 = arith.constant 0 : index
    %c2_103 = arith.constant 2 : index
    %c7_104 = arith.constant 7 : index
    %c0_105 = arith.constant 0 : index
    %77 = vector.load %arg10[%c0_102, %c2_103, %c7_104, %c0_105] : memref<1x18x32x32xf32, #tpu.memory_space<vmem>>, vector<1x16x16x32xf32>
    %78 = vector.shape_cast %77 : vector<1x16x16x32xf32> to vector<256x32xf32>
    %c0_106 = arith.constant 0 : index
    %c2_107 = arith.constant 2 : index
    %c8_108 = arith.constant 8 : index
    %c0_109 = arith.constant 0 : index
    %79 = vector.load %arg10[%c0_106, %c2_107, %c8_108, %c0_109] : memref<1x18x32x32xf32, #tpu.memory_space<vmem>>, vector<1x16x16x32xf32>
    %80 = vector.shape_cast %79 : vector<1x16x16x32xf32> to vector<256x32xf32>
    %c0_110 = arith.constant 0 : index
    %c2_111 = arith.constant 2 : index
    %c9_112 = arith.constant 9 : index
    %c0_113 = arith.constant 0 : index
    %81 = vector.load %arg10[%c0_110, %c2_111, %c9_112, %c0_113] : memref<1x18x32x32xf32, #tpu.memory_space<vmem>>, vector<1x16x16x32xf32>
    %82 = vector.shape_cast %81 : vector<1x16x16x32xf32> to vector<256x32xf32>
    %83 = tpu.concatenate %66, %68, %70, %72, %74, %76, %78, %80, %82 in 1 : vector<256x32xf32>, vector<256x32xf32>, vector<256x32xf32>, vector<256x32xf32>, vector<256x32xf32>, vector<256x32xf32>, vector<256x32xf32>, vector<256x32xf32>, vector<256x32xf32> -> vector<256x288xf32>
    %84 = arith.truncf %83 : vector<256x288xf32> to vector<256x288xbf16>
    %c0_114 = arith.constant 0 : index
    %c0_115 = arith.constant 0 : index
    %85 = vector.load %arg3[%c0_114, %c0_115] : memref<288x32xbf16, #tpu.memory_space<vmem>>, vector<288x32xbf16>
    %cst_116 = arith.constant dense<0.000000e+00> : vector<256x32xf32>
    %86 = tpu.matmul %84, %85, %cst_116 {dimension_numbers = #tpu.dot_dimension_numbers<[1], [0], [0], [1], [0, 0, 1, 1], [], []>} : vector<256x288xbf16>, vector<288x32xbf16>, vector<256x32xf32> -> vector<256x32xf32>
    %87 = vector.broadcast %64 : vector<1x32xf32> to vector<256x32xf32>
    %88 = arith.addf %86, %87 : vector<256x32xf32>
    %89 = vector.shape_cast %88 : vector<256x32xf32> to vector<1x256x32xf32>
    %90 = vector.shape_cast %30 : vector<1x32xf32> to vector<1x1x32xf32>
    %91 = vector.broadcast %90 : vector<1x1x32xf32> to vector<1x256x32xf32>
    %92 = arith.addf %89, %91 : vector<1x256x32xf32>
    %93 = arith.negf %92 : vector<1x256x32xf32>
    %94 = math.exp %93 : vector<1x256x32xf32>
    %cst_117 = arith.constant 1.000000e+00 : f32
    %95 = vector.broadcast %cst_117 : f32 to vector<1x256x32xf32>
    %96 = arith.addf %95, %94 : vector<1x256x32xf32>
    %97 = arith.divf %95, %96 : vector<1x256x32xf32>
    %98 = arith.mulf %97, %1 : vector<1x256x32xf32>
    %99 = vector.shape_cast %98 : vector<1x256x32xf32> to vector<1x16x16x32xf32>
    %c0_118 = arith.constant 0 : index
    %c0_119 = arith.constant 0 : index
    %c0_120 = arith.constant 0 : index
    %c0_121 = arith.constant 0 : index
    %100 = vector.load %arg9[%c0_118, %c0_119, %c0_120, %c0_121] : memref<1x16x16x32xf32, #tpu.memory_space<vmem>>, vector<1x16x16x32xf32>
    tpu.vector_store %arg9[%c0_118, %c0_119, %c0_120, %c0_121], %99 {strides = array<i32>} : memref<1x16x16x32xf32, #tpu.memory_space<vmem>>, vector<1x16x16x32xf32>,
    return
  }
  func.func @transform_0(%arg0: i32) -> (i32, i32, i32, i32) {
    %c0_i32 = arith.constant 0 : i32
    %c0_i32_0 = arith.constant 0 : i32
    %c0_i32_1 = arith.constant 0 : i32
    %c0_i32_2 = arith.constant 0 : i32
    return %arg0, %c0_i32, %c0_i32_0, %c0_i32_1 : i32, i32, i32, i32
  }
  func.func @transform_1(%arg0: i32) -> (i32, i32) {
    %c0_i32 = arith.constant 0 : i32
    %c0_i32_0 = arith.constant 0 : i32
    %c0_i32_1 = arith.constant 0 : i32
    return %c0_i32, %c0_i32_0 : i32, i32
  }
  func.func @transform_2(%arg0: i32) -> (i32, i32) {
    %c0_i32 = arith.constant 0 : i32
    %c0_i32_0 = arith.constant 0 : i32
    %c0_i32_1 = arith.constant 0 : i32
    return %c0_i32, %c0_i32_0 : i32, i32
  }
  func.func @transform_3(%arg0: i32) -> (i32, i32) {
    %c0_i32 = arith.constant 0 : i32
    %c0_i32_0 = arith.constant 0 : i32
    %c0_i32_1 = arith.constant 0 : i32
    return %c0_i32, %c0_i32_0 : i32, i32
  }
  func.func @transform_4(%arg0: i32) -> (i32, i32) {
    %c0_i32 = arith.constant 0 : i32
    %c0_i32_0 = arith.constant 0 : i32
    %c0_i32_1 = arith.constant 0 : i32
    return %c0_i32, %c0_i32_0 : i32, i32
  }
  func.func @transform_5(%arg0: i32) -> (i32, i32) {
    %c0_i32 = arith.constant 0 : i32
    %c0_i32_0 = arith.constant 0 : i32
    %c0_i32_1 = arith.constant 0 : i32
    return %c0_i32, %c0_i32_0 : i32, i32
  }
  func.func @transform_6(%arg0: i32) -> (i32, i32) {
    %c0_i32 = arith.constant 0 : i32
    %c0_i32_0 = arith.constant 0 : i32
    %c0_i32_1 = arith.constant 0 : i32
    return %c0_i32, %c0_i32_0 : i32, i32
  }
  func.func @transform_7(%arg0: i32) -> (i32, i32) {
    %c0_i32 = arith.constant 0 : i32
    %c0_i32_0 = arith.constant 0 : i32
    %c0_i32_1 = arith.constant 0 : i32
    return %c0_i32, %c0_i32_0 : i32, i32
  }
  func.func @transform_8(%arg0: i32) -> (i32, i32, i32, i32) {
    %c0_i32 = arith.constant 0 : i32
    %c0_i32_0 = arith.constant 0 : i32
    %c0_i32_1 = arith.constant 0 : i32
    %c0_i32_2 = arith.constant 0 : i32
    return %arg0, %c0_i32, %c0_i32_0, %c0_i32_1 : i32, i32, i32, i32
  }
}

</mosaic_0001>

<bundles_post_ra>
// kernel: eram_forward.1
= control target key start
LH: loop header
LB: loop body
LE: loop exit
PB: predicated region body
PF: predicated region fallthrough
CT: control target
= control target key end

     0   :  { %13 = vsyncpa [#allocation4], 0  ;;  %s10468_s0 = inlined_call_operand.vmem [shape: f32[2,16,16,32], index: 0, kind: input, shape index: {}]   ;;  %s10469_s1 = inlined_call_operand.vmem [shape: bf16[288,32], index: 1, kind: input, shape index: {}]   ;;  %s10470_s2 = inlined_call_operand.vmem [shape: bf16[288,32], index: 2, kind: input, shape index: {}]   ;;  %s10471_s3 = inlined_call_operand.vmem [shape: f32[1,32], index: 3, kind: input, shape index: {}]   ;;  %s10472_s4 = inlined_call_operand.vmem [shape: f32[16,32], index: 4, kind: input, shape index: {}]   ;;  %s10473_s5 = inlined_call_operand.vmem [shape: f32[1,16], index: 5, kind: input, shape index: {}]   ;;  %s10474_s6 = inlined_call_operand.vmem [shape: f32[32,16], index: 6, kind: input, shape index: {}]   ;;  %s10475_s7 = inlined_call_operand.vmem [shape: f32[1,32], index: 7, kind: input, shape index: {}]   ;;  %s10476_s8 = inlined_call_operand.hbm [shape: f32[2,16,16,32], index: 8, kind: output, shape index: {}]  }
   0x1   :  { %15 = vsyncpa [#allocation4 + $0x1], 0  ;;  %s7627_s27 = smov 0   ;;  %s7629_s28 = smov 0  }
   0x2   :  { %s7631_s29 = smov 0   ;;  %s7633_s30 = smov 0  }
   0x3 LB: > { %s7648_s9 = sadd.s32 4294967295, %s7572_s30   ;;  %s5868_s10 = sadd.s32 4294967294, %s7572_s30   ;;  %s7572_s30 = sphi %s7633_s30, %s10681_s30   ;;  %s7568_s29 = sphi %s7631_s29, %s10680_s29   ;;  %s7564_s28 = sphi %s7629_s28, %s10679_s28   ;;  %s7560_s27 = sphi %s7627_s27, %s10678_s27  }
   0x4   : > { %s7652_s11 = sadd.s32 1, %s7572_s30   ;;  %s201_s12 = sadd.s32 1, %s7568_s29 }
   0x5   : > { %s198_s13 = ssub.s32 %s7572_s30, %s7652_s11  ;;  %p211_p0 = scmp.ne.s32.totalorder %s7568_s29, %s7564_s28 }
   0x6   : > { %p199_p1 = scmp.eq.s32.totalorder %s198_s13, 0  ;;  %p212_p2 = scmp.eq.s32.totalorder %s7648_s9, 1 }
   0x7   : > { %p217_p3 = scmp.ne.s32.totalorder %s7564_s28, %s7560_s27  ;;  %p218_p4 = scmp.eq.s32.totalorder %s5868_s10, 1 }
   0x8   : > { %s7663_s14 = scalar_select %p199_p1, %s7568_s29, %s201_s12  }
   0x9   : > { %p7665_p5 = por %p212_p2, %p211_p0  ;;  %p7669_p6 = por %p218_p4, %p217_p3 }
   0xa   : > { %p5871_p7 = scmp.ge.s32.totalorder %s7572_s30, 1  ;;  %p265_p8 = scmp.lt.s32.totalorder %s7572_s30, 3 }
   0xc   : > { %p266_p9 = pnand %p5871_p7, %p265_p8 }
   0xe   : > { %269 = sbr.rel (%p266_p9) target bundleno = 1478 (0x5c6), region = 52 }
  0x15   : > { %v10477_v0 = vlaneseq  ;;  %v5875_v1 = vld [vmem:[%s10473_s5] ss:$0 sm:$0xff]  ;;  %vm337_vm0 = vcmask 261120   ;;  %v10478_v2 = vmov 0.0   ;;  %p299_p10 = scmp.lt.s32.totalorder %s7648_s9, 1  ;;  %vm1699_vm1 = vcmask 253952  }
  0x16   : > { %560 = vbcast.lane.b32.xlu1 %v5875_v1, 256  ;;  %1690 = vst.msk [vmem:[#allocation2 + $0x8] sm:$0xff] %vm337_vm0, %v10478_v2  ;;  %1691 = vst.msk [vmem:[#allocation2 + $0x10] sm:$0xff] %vm337_vm0, %v10478_v2  ;;  %v7701_v4 = vld [vmem:[%s10474_s6] sm:$0xff]  ;;  %s7577_s17 = smov 64   ;;  %s7578_s23 = smov 96  }
  0x17   : > { %1689 = vst.msk [vmem:[#allocation2] sm:$0xff] %vm337_vm0, %v10478_v2  ;;  %1692 = vst.msk [vmem:[#allocation2 + $0x18] sm:$0xff] %vm337_vm0, %v10478_v2  ;;  %v7696_v3 = vshrl.u32 %v10477_v0, 7  ;;  %s300_s21 = scalar_select %p299_p10, %s7648_s9, 1  ;;  %vm1327_vm2 = vcmask 130112   ;;  %vm1608_vm3 = vcmask 1041409  }
  0x18   : > { %1694 = vst.msk [vmem:[#allocation2 + $0x220] sm:$0xff] %vm337_vm0, %v10478_v2  ;;  %1695 = vst.msk [vmem:[#allocation2 + $0x228] sm:$0xff] %vm337_vm0, %v10478_v2  ;;  %vm1610_vm4 = vcmask 1042434   ;;  %vm1612_vm5 = vcmask 1043459   ;;  %vm1614_vm6 = vcmask 1044484   ;;  %vm1616_vm7 = vcmask 1045509  }
  0x19   : > { %1696 = vst.msk [vmem:[#allocation2 + $0x230] sm:$0xff] %vm337_vm0, %v10478_v2  ;;  %1697 = vst.msk [vmem:[#allocation2 + $0x238] sm:$0xff] %vm337_vm0, %v10478_v2  ;;  %v7705_v5 = vsub.s32 0, %v7696_v3  ;;  %v7708_v6 = vsub.s32 3, %v7696_v3  ;;  %s5983_s22 = sshll.u32 %s300_s21, 8  ;;  %v7731_v12 = vsub.s32 4, %v7696_v3 }
  0x1a   : > { %10545 = vst [vmem:[#allocation6_spill] sm:$0xff] %v7696_v3  ;;  %564 = vbcast.lane.b32.xlu1 %v5875_v1, 264  ;;  %s7715_s25 = scalar_lea.vmem %s10468_s0, %s5983_s22  ;;  %v7734_v13 = vsub.s32 1, %v7696_v3  ;;  %v7794_v26 = vsub.s32 5, %v7696_v3  ;;  %v7827_v33 = vsub.s32 2, %v7696_v3  ;;  %v7869_v44 = vsub.s32 6, %v7696_v3 }
  0x1b   : > { %v583_v7 = vrot.slane %v7701_v4, %v7705_v5  ;;  %v7718_v8 = vld [vmem:[%s7715_s25] sm:$0xff]  ;;  %v7721_v9 = vld [vmem:[%s7715_s25 + $0x8] sm:$0xff]  ;;  %v7724_v10 = vld [vmem:[%s7715_s25 + $0x10] sm:$0xff]  ;;  %v7728_v11 = vrot.slane %v7701_v4, %v7708_v6  ;;  %v7791_v25 = vrot.slane %v7701_v4, %v7731_v12  ;;  %v7921_v58 = vsub.s32 7, %v7696_v3  ;;  %s7575_s21 = smov 32   ;;  %s5984_s20 = sshll.u32 %s7648_s9, 12 }
  0x1c   : > { %10546 = vst [vmem:[#allocation7_spill] sm:$0xff] %v7718_v8  ;;  %10547 = vst [vmem:[#allocation8_spill] sm:$0xff] %v7721_v9  ;;  %v7737_v14 = vld [vmem:[%s7715_s25 + $0x18] sm:$0xff]  ;;  %v7746_v15 = vld [vmem:[%s7715_s25 + $0x20] sm:$0xff]  ;;  %v594_v18 = vrot.slane %v7701_v4, %v7734_v13  ;;  %v338_v40 = vsel %vm337_vm0, %v7718_v8, 0.0  ;;  %v339_v41 = vsel %vm337_vm0, %v7721_v9, 0.0  ;;  %v638_v43 = vrot.slane %v7701_v4, %v7794_v26  ;;  %s10414_s26 = scalar_lea.hbm %s10476_s8, %s5984_s20 }
  0x1d   : > { %10548 = vst [vmem:[#allocation9_spill] sm:$0xff] %v7724_v10  ;;  %585 = vbcast.lane.b32.xlu0 %v583_v7, 256  ;;  %10549 = vst [vmem:[#allocation10_spill] sm:$0xff] %v7737_v14  ;;  %v7749_v16 = vld [vmem:[%s7715_s25 + $0x28] sm:$0xff]  ;;  %v7752_v17 = vld [vmem:[%s7715_s25 + $0x30] sm:$0xff]  ;;  %v341_v42 = vsel %vm337_vm0, %v7724_v10, 0.0  ;;  %v340_v48 = vadd.f32 %v339_v41, %v338_v40  ;;  %v605_v49 = vrot.slane %v7701_v4, %v7827_v33 }
  0x1e   : > { %1732 = vst.msk [vmem:[#allocation2 + $0x28] sm:$0xff] %vm337_vm0, %v7718_v8  ;;  %1733 = vst.msk [vmem:[#allocation2 + $0x30] sm:$0xff] %vm337_vm0, %v7721_v9  ;;  %589 = vbcast.lane.b32.xlu1 %v583_v7, 264  ;;  %v7759_v19 = vld [vmem:[%s7715_s25 + $0x38] sm:$0xff]  ;;  %v7762_v20 = vld [vmem:[%s7715_s25 + $0x40] sm:$0xff]  ;;  %v343_v53 = vsel %vm337_vm0, %v7737_v14, 0.0  ;;  %v649_v57 = vrot.slane %v7701_v4, %v7869_v44  ;;  %v660_v63 = vrot.slane %v7701_v4, %v7921_v58 }
  0x1f   : > { %1734 = vst.msk [vmem:[#allocation2 + $0x48] sm:$0xff] %vm337_vm0, %v7724_v10  ;;  %10550 = vst [vmem:[#allocation11_spill] sm:$0xff] %v7746_v15  ;;  %v7765_v21 = vld [vmem:[%s7715_s25 + $0x48] sm:$0xff]  ;;  %v7774_v22 = vld [vmem:[%s7715_s25 + $0x50] sm:$0xff]  ;;  %v342_v55 = vadd.f32 %v341_v42, %v340_v48  ;;  %v345_v56 = vsel %vm337_vm0, %v7746_v15, 0.0  ;;  %v347_v60 = vsel %vm337_vm0, %v7749_v16, 0.0 }
  0x20   : > { %10551 = vst [vmem:[#allocation12_spill] sm:$0xff] %v7749_v16  ;;  %10552 = vst [vmem:[#allocation13_spill] sm:$0xff] %v7752_v17  ;;  %v7777_v23 = vld [vmem:[%s7715_s25 + $0x58] sm:$0xff]  ;;  %v7780_v24 = vld [vmem:[%s7715_s25 + $0x60] sm:$0xff]  ;;  %v349_v62 = vsel %vm337_vm0, %v7752_v17, 0.0  ;;  %v353_v40 = vsel %vm337_vm0, %v7762_v20, 0.0 }
  0x21   : > { %1735 = vst.msk [vmem:[#allocation2 + $0x50] sm:$0xff] %vm337_vm0, %v7737_v14  ;;  %10553 = vst [vmem:[#allocation14_spill] sm:$0xff] %v7759_v19  ;;  %622 = vbcast.lane.b32.xlu0 %v7728_v11, 264  ;;  %v7797_v27 = vld [vmem:[%s7715_s25 + $0x68] sm:$0xff]  ;;  %v7800_v28 = vld [vmem:[%s7715_s25 + $0x70] sm:$0xff]  ;;  %v344_v59 = vadd.f32 %v343_v53, %v342_v55  ;;  %v355_v4 = vsel %vm337_vm0, %v7765_v21, 0.0 }
  0x22   : > { %10554 = vst [vmem:[#allocation15_spill] sm:$0xff] %v7762_v20  ;;  %10555 = vst [vmem:[#allocation16_spill] sm:$0xff] %v7765_v21  ;;  %v7803_v29 = vld [vmem:[%s7715_s25 + $0x78] sm:$0xff]  ;;  %596 = vbcast.lane.b32.xlu1 %v594_v18, 256  ;;  %v7812_v30 = vld [vmem:[%s7715_s25 + $0x80] sm:$0xff]  ;;  %v357_v53 = vsel %vm337_vm0, %v7774_v22, 0.0 }
  0x23   : > { %1736 = vst.msk [vmem:[#allocation2 + $0x68] sm:$0xff] %vm337_vm0, %v7746_v15  ;;  %1737 = vst.msk [vmem:[#allocation2 + $0x70] sm:$0xff] %vm337_vm0, %v7749_v16  ;;  %v7815_v31 = vld [vmem:[%s7715_s25 + $0x88] sm:$0xff]  ;;  %v7818_v32 = vld [vmem:[%s7715_s25 + $0x90] sm:$0xff]  ;;  %v346_v61 = vadd.f32 %v345_v56, %v344_v59  ;;  %v359_v59 = vsel %vm337_vm0, %v7777_v23, 0.0  ;;  %vm1618_vm8 = vcmask 1046534  }
  0x24   : > { %1738 = vst.msk [vmem:[#allocation2 + $0x88] sm:$0xff] %vm337_vm0, %v7752_v17  ;;  %10556 = vst [vmem:[#allocation17_spill] sm:$0xff] %v7774_v22  ;;  %v7830_v34 = vld [vmem:[%s7715_s25 + $0x98] sm:$0xff]  ;;  %v7833_v35 = vld [vmem:[%s7715_s25 + $0xa0] sm:$0xff]  ;;  %vm1620_vm9 = vcmask 1047559   ;;  %vm1647_vm10 = vcmask 130048  }
  0x25   : > { %10557 = vst [vmem:[#allocation18_spill] sm:$0xff] %v7777_v23  ;;  %10558 = vst [vmem:[#allocation19_spill] sm:$0xff] %v7780_v24  ;;  %v7836_v36 = vld [vmem:[%s7715_s25 + $0xa8] sm:$0xff]  ;;  %v7845_v37 = vld [vmem:[%s7715_s25 + $0xb0] sm:$0xff]  ;;  %633 = vbcast.lane.b32.xlu0 %v7791_v25, 264  ;;  %v348_v7 = vadd.f32 %v347_v60, %v346_v61  ;;  %v361_v60 = vsel %vm337_vm0, %v7780_v24, 0.0 }
  0x26   : > { %1739 = vst.msk [vmem:[#allocation2 + $0x90] sm:$0xff] %vm337_vm0, %v7759_v19  ;;  %1740 = vst.msk [vmem:[#allocation2 + $0xa8] sm:$0xff] %vm337_vm0, %v7762_v20  ;;  %v7848_v38 = vld [vmem:[%s7715_s25 + $0xb8] sm:$0xff]  ;;  %v7851_v39 = vld [vmem:[%s7715_s25 + $0xc0] sm:$0xff]  ;;  %600 = vbcast.lane.b32.xlu1 %v594_v18, 264  ;;  %v351_v18 = vsel %vm337_vm0, %v7759_v19, 0.0 }
  0x27   : > { %1741 = vst.msk [vmem:[#allocation2 + $0xb0] sm:$0xff] %vm337_vm0, %v7765_v21  ;;  %10559 = vst [vmem:[#allocation20_spill] sm:$0xff] %v7797_v27  ;;  %v7872_v45 = vld [vmem:[%s7715_s25 + $0xc8] sm:$0xff]  ;;  %v7875_v46 = vld [vmem:[%s7715_s25 + $0xd0] sm:$0xff]  ;;  %v350_v41 = vadd.f32 %v349_v62, %v348_v7  ;;  %v363_v7 = vsel %vm337_vm0, %v7797_v27, 0.0  ;;  %vm2853_vm11 = vcmask 523264  }
  0x28   : > { %10560 = vst [vmem:[#allocation21_spill] sm:$0xff] %v7800_v28  ;;  %10561 = vst [vmem:[#allocation22_spill] sm:$0xff] %v7803_v29  ;;  %v7878_v47 = vld [vmem:[%s7715_s25 + $0xd8] sm:$0xff]  ;;  %v7889_v50 = vld [vmem:[%s7715_s25 + $0xe0] sm:$0xff]  ;;  %vm2886_vm12 = vcmask 785408   ;;  %vm5488_vm13 = vcmask 195712  }
  0x29   : > { %1742 = vst.msk [vmem:[#allocation2 + $0xc8] sm:$0xff] %vm337_vm0, %v7774_v22  ;;  %1743 = vst.msk [vmem:[#allocation2 + $0xd0] sm:$0xff] %vm337_vm0, %v7777_v23  ;;  %v7892_v51 = vld [vmem:[%s7715_s25 + $0xe8] sm:$0xff]  ;;  %v7895_v52 = vld [vmem:[%s7715_s25 + $0xf0] sm:$0xff]  ;;  %644 = vbcast.lane.b32.xlu0 %v638_v43, 264  ;;  %v352_v48 = vadd.f32 %v351_v18, %v350_v41  ;;  %v365_v18 = vsel %vm337_vm0, %v7800_v28, 0.0 }
  0x2a   : > { %1744 = vst.msk [vmem:[#allocation2 + $0xe8] sm:$0xff] %vm337_vm0, %v7780_v24  ;;  %10562 = vst [vmem:[#allocation23_spill] sm:$0xff] %v7812_v30  ;;  %v7906_v54 = vld [vmem:[%s7715_s25 + $0xf8] sm:$0xff]  ;;  %607 = vbcast.lane.b32.xlu1 %v605_v49, 256  ;;  %v573_v1 = vld [vmem:[%s10474_s6 + $0x8] sm:$0xff]  ;;  %vm5495_vm14 = vcmask 261312  }
  0x2b   : > { %10563 = vst [vmem:[#allocation24_spill] sm:$0xff] %v7815_v31  ;;  %10564 = vst [vmem:[#allocation25_spill] sm:$0xff] %v7818_v32  ;;  %v671_v42 = vrot.slane %v573_v1, %v7705_v5  ;;  %v354_v55 = vadd.f32 %v353_v40, %v352_v48  ;;  %v704_v41 = vrot.slane %v573_v1, %v7708_v6  ;;  %v367_v48 = vsel %vm337_vm0, %v7803_v29, 0.0  ;;  %s7579_s12 = smov [#allocation3]  }
  0x2c   : > { %1745 = vst.msk [vmem:[#allocation2 + $0xf0] sm:$0xff] %vm337_vm0, %v7797_v27  ;;  %1746 = vst.msk [vmem:[#allocation2 + $0x108] sm:$0xff] %vm337_vm0, %v7800_v28  ;;  %s7514_s13 = sshll.u32 %s7579_s12, 4  ;;  %s7515_s13 = int_to_ptr.vmem [resolvable:$false] %s7514_s13 }
  0x2d   : > { %1747 = vst.msk [vmem:[#allocation2 + $0x110] sm:$0xff] %vm337_vm0, %v7803_v29  ;;  %10565 = vst [vmem:[#allocation26_spill] sm:$0xff] %v7830_v34  ;;  %655 = vbcast.lane.b32.xlu0 %v649_v57, 264  ;;  %v356_v56 = vadd.f32 %v355_v4, %v354_v55  ;;  %v369_v4 = vsel %vm337_vm0, %v7812_v30, 0.0  ;;  %v715_v55 = vrot.slane %v573_v1, %v7731_v12 }
  0x2e   : > { %10566 = vst [vmem:[#allocation27_spill] sm:$0xff] %v7833_v35  ;;  %10567 = vst [vmem:[#allocation28_spill] sm:$0xff] %v7836_v36  ;;  %611 = vbcast.lane.b32.xlu1 %v605_v49, 264  ;;  %v682_v49 = vrot.slane %v573_v1, %v7734_v13 }
  0x2f   : > { %1748 = vst.msk [vmem:[#allocation2 + $0x128] sm:$0xff] %vm337_vm0, %v7812_v30  ;;  %1749 = vst.msk [vmem:[#allocation2 + $0x130] sm:$0xff] %vm337_vm0, %v7815_v31  ;;  %v358_v61 = vadd.f32 %v357_v53, %v356_v56  ;;  %v371_v56 = vsel %vm337_vm0, %v7815_v31, 0.0 }
  0x30   : > { %1750 = vst.msk [vmem:[#allocation2 + $0x148] sm:$0xff] %vm337_vm0, %v7818_v32  ;;  %10568 = vst [vmem:[#allocation29_spill] sm:$0xff] %v7845_v37 }
  0x31   : > { %10569 = vst [vmem:[#allocation30_spill] sm:$0xff] %v7848_v38  ;;  %10570 = vst [vmem:[#allocation31_spill] sm:$0xff] %v7851_v39  ;;  %666 = vbcast.lane.b32.xlu0 %v660_v63, 264  ;;  %v360_v62 = vadd.f32 %v359_v59, %v358_v61  ;;  %v373_v59 = vsel %vm337_vm0, %v7818_v32, 0.0  ;;  %v726_v61 = vrot.slane %v573_v1, %v7794_v26 }
  0x32   : > { %1751 = vst.msk [vmem:[#allocation2 + $0x150] sm:$0xff] %vm337_vm0, %v7830_v34  ;;  %1752 = vst.msk [vmem:[#allocation2 + $0x168] sm:$0xff] %vm337_vm0, %v7833_v35  ;;  %618 = vbcast.lane.b32.xlu1 %v7728_v11, 256  ;;  %v693_v11 = vrot.slane %v573_v1, %v7827_v33 }
  0x33   : > { %1753 = vst.msk [vmem:[#allocation2 + $0x170] sm:$0xff] %vm337_vm0, %v7836_v36  ;;  %10571 = vst [vmem:[#allocation32_spill] sm:$0xff] %v7872_v45  ;;  %v362_v40 = vadd.f32 %v361_v60, %v360_v62  ;;  %v375_v62 = vsel %vm337_vm0, %v7830_v34, 0.0 }
  0x34   : > { %10572 = vst [vmem:[#allocation33_spill] sm:$0xff] %v7875_v46  ;;  %10573 = vst [vmem:[#allocation34_spill] sm:$0xff] %v7878_v47  ;;  %v1813_v0 = vld [vmem:[#allocation2 + $0x110] sm:$0xff] }
  0x35   : > { %1755 = vst.msk [vmem:[#allocation2 + $0x190] sm:$0xff] %vm337_vm0, %v7848_v38  ;;  %1756 = vst.msk [vmem:[#allocation2 + $0x1a8] sm:$0xff] %vm337_vm0, %v7851_v39  ;;  %677 = vbcast.lane.b32.xlu0 %v671_v42, 264 }
  0x36   : > { %1754 = vst.msk [vmem:[#allocation2 + $0x188] sm:$0xff] %vm337_vm0, %v7845_v37  ;;  %10574 = vst [vmem:[#allocation35_spill] sm:$0xff] %v7889_v50  ;;  %629 = vbcast.lane.b32.xlu1 %v7791_v25, 256  ;;  %v364_v25 = vadd.f32 %v363_v7, %v362_v40  ;;  %v737_v40 = vrot.slane %v573_v1, %v7869_v44 }
  0x37   : > { %10575 = vst [vmem:[#allocation36_spill] sm:$0xff] %v7892_v51  ;;  %10576 = vst [vmem:[#allocation37_spill] sm:$0xff] %v7895_v52 }
  0x38   : > { %1757 = vst.msk [vmem:[#allocation2 + $0x1b0] sm:$0xff] %vm337_vm0, %v7872_v45  ;;  %1758 = vst.msk [vmem:[#allocation2 + $0x1c8] sm:$0xff] %vm337_vm0, %v7875_v46  ;;  %v366_v53 = vadd.f32 %v365_v18, %v364_v25  ;;  %v377_v18 = vsel %vm337_vm0, %v7833_v35, 0.0  ;;  %v379_v25 = vsel %vm337_vm0, %v7836_v36, 0.0 }
  0x39   : > { %1759 = vst.msk [vmem:[#allocation2 + $0x1d0] sm:$0xff] %vm337_vm0, %v7878_v47  ;;  %10577 = vst [vmem:[#allocation38_spill] sm:$0xff] %v7906_v54  ;;  %688 = vbcast.lane.b32.xlu0 %v682_v49, 264 }
  0x3a   : > { %1760 = vst.msk [vmem:[#allocation2 + $0x1e8] sm:$0xff] %vm337_vm0, %v7889_v50  ;;  %1761 = vst.msk [vmem:[#allocation2 + $0x1f0] sm:$0xff] %vm337_vm0, %v7892_v51  ;;  %640 = vbcast.lane.b32.xlu1 %v638_v43, 256  ;;  %v368_v43 = vadd.f32 %v367_v48, %v366_v53 }
  0x3b   : > { %1762 = vst.msk [vmem:[#allocation2 + $0x208] sm:$0xff] %vm337_vm0, %v7895_v52  ;;  %1763 = vst.msk [vmem:[#allocation2 + $0x210] sm:$0xff] %vm337_vm0, %v7906_v54 }
  0x3c   : > { %v370_v60 = vadd.f32 %v369_v4, %v368_v43  ;;  %v381_v4 = vsel %vm337_vm0, %v7845_v37, 0.0  ;;  %v574_v43 = vld [vmem:[%s10474_s6 + $0x10] sm:$0xff] }
  0x3d   : > { %699 = vbcast.lane.b32.xlu0 %v693_v11, 264 }
  0x3e   : > { %651 = vbcast.lane.b32.xlu1 %v649_v57, 256  ;;  %v372_v57 = vadd.f32 %v371_v56, %v370_v60  ;;  %v383_v56 = vsel %vm337_vm0, %v7848_v38, 0.0  ;;  %v759_v60 = vrot.slane %v574_v43, %v7705_v5 }
  0x40   : > { %v374_v7 = vadd.f32 %v373_v59, %v372_v57  ;;  %v385_v59 = vsel %vm337_vm0, %v7851_v39, 0.0 }
  0x41   : > { %710 = vbcast.lane.b32.xlu0 %v704_v41, 264 }
  0x42   : > { %662 = vbcast.lane.b32.xlu1 %v660_v63, 256  ;;  %v376_v63 = vadd.f32 %v375_v62, %v374_v7  ;;  %v389_v7 = vsel %vm337_vm0, %v7875_v46, 0.0 }
  0x44   : > { %v378_v48 = vadd.f32 %v377_v18, %v376_v63  ;;  %v391_v63 = vsel %vm337_vm0, %v7878_v47, 0.0 }
  0x45   : > { %721 = vbcast.lane.b32.xlu0 %v715_v55, 264 }
  0x46   : > { %673 = vbcast.lane.b32.xlu1 %v671_v42, 256  ;;  %v748_v42 = vrot.slane %v573_v1, %v7921_v58  ;;  %v380_v53 = vadd.f32 %v379_v25, %v378_v48  ;;  %v387_v1 = vsel %vm337_vm0, %v7872_v45, 0.0  ;;  %v393_v48 = vsel %vm337_vm0, %v7889_v50, 0.0 }
  0x49   : > { %732 = vbcast.lane.b32.xlu0 %v726_v61, 264 }
  0x4a   : > { %684 = vbcast.lane.b32.xlu1 %v682_v49, 256  ;;  %v382_v49 = vadd.f32 %v381_v4, %v380_v53  ;;  %v395_v53 = vsel %vm337_vm0, %v7892_v51, 0.0 }
  0x4c   : > { %v384_v57 = vadd.f32 %v383_v56, %v382_v49  ;;  %v397_v49 = vsel %vm337_vm0, %v7895_v52, 0.0 }
  0x4d   : > { %743 = vbcast.lane.b32.xlu0 %v737_v40, 264 }
  0x4e   : > { %695 = vbcast.lane.b32.xlu1 %v693_v11, 256  ;;  %v386_v62 = vadd.f32 %v385_v59, %v384_v57  ;;  %v770_v11 = vrot.slane %v574_v43, %v7734_v13  ;;  %v399_v57 = vsel %vm337_vm0, %v7906_v54, 0.0 }
  0x50   : > { %v388_v18 = vadd.f32 %v387_v1, %v386_v62  ;;  %v803_v62 = vrot.slane %v574_v43, %v7731_v12 }
  0x51   : > { %754 = vbcast.lane.b32.xlu0 %v748_v42, 264 }
  0x52   : > { %706 = vbcast.lane.b32.xlu1 %v704_v41, 256  ;;  %v390_v25 = vadd.f32 %v389_v7, %v388_v18  ;;  %v781_v41 = vrot.slane %v574_v43, %v7827_v33  ;;  %v814_v18 = vrot.slane %v574_v43, %v7794_v26 }
  0x54   : > { %v392_v4 = vadd.f32 %v391_v63, %v390_v25 }
  0x55   : > { %765 = vbcast.lane.b32.xlu0 %v759_v60, 264 }
  0x56   : > { %717 = vbcast.lane.b32.xlu1 %v715_v55, 256  ;;  %v394_v56 = vadd.f32 %v393_v48, %v392_v4  ;;  %v792_v55 = vrot.slane %v574_v43, %v7708_v6  ;;  %v825_v48 = vrot.slane %v574_v43, %v7869_v44  ;;  %v836_v4 = vrot.slane %v574_v43, %v7921_v58 }
  0x58   : > { %v396_v59 = vadd.f32 %v395_v53, %v394_v56 }
  0x59   : > { %776 = vbcast.lane.b32.xlu0 %v770_v11, 264 }
  0x5a   : > { %728 = vbcast.lane.b32.xlu1 %v726_v61, 256  ;;  %v398_v1 = vadd.f32 %v397_v49, %v396_v59 }
  0x5c   : > { %v400_v61 = vadd.f32 %v399_v57, %v398_v1 }
  0x5d   : > { %787 = vbcast.lane.b32.xlu0 %v781_v41, 264 }
  0x5e   : > { %739 = vbcast.lane.b32.xlu1 %v737_v40, 256  ;;  %v401_v7 = vrot.slane %v400_v61, 4 }
  0x60   : > { %v402_v63 = vadd.f32 %v401_v7, %v400_v61 }
  0x61   : > { %798 = vbcast.lane.b32.xlu0 %v792_v55, 264 }
  0x62   : > { %750 = vbcast.lane.b32.xlu1 %v748_v42, 256  ;;  %v403_v25 = vrot.slane %v402_v63, 2  ;;  %v575_v42 = vld [vmem:[%s10474_s6 + $0x18] sm:$0xff] }
  0x63   : > { %v847_v56 = vrot.slane %v575_v42, %v7705_v5  ;;  %v869_v43 = vrot.slane %v575_v42, %v7827_v33 }
  0x64   : > { %v404_v40 = vadd.f32 %v403_v25, %v402_v63 }
  0x65   : > { %809 = vbcast.lane.b32.xlu0 %v803_v62, 264 }
  0x66   : > { %761 = vbcast.lane.b32.xlu1 %v759_v60, 256  ;;  %v405_v53 = vrot.slane %v404_v40, 1  ;;  %v858_v60 = vrot.slane %v575_v42, %v7734_v13  ;;  %v8020_v13 = vrot.slane %v575_v42, %v7708_v6 }
  0x68   : > { %v406_v49 = vadd.f32 %v405_v53, %v404_v40 }
  0x69   : > { %820 = vbcast.lane.b32.xlu0 %v814_v18, 264 }
  0x6a   : > { %772 = vbcast.lane.b32.xlu1 %v770_v11, 256  ;;  %v8008_v59 = vmul.f32 0.00390625, %v406_v49 }
  0x6c   : > { %v408_v11 = vsub.f32 %v7718_v8, %v8008_v59  ;;  %v410_v5 = vsub.f32 %v7724_v10, %v8008_v59  ;;  %v412_v33 = vsub.f32 %v7746_v15, %v8008_v59  ;;  %v413_v61 = vsub.f32 %v7749_v16, %v8008_v59 }
  0x6d   : > { %831 = vbcast.lane.b32.xlu0 %v825_v48, 264  ;;  %v414_v63 = vsub.f32 %v7752_v17, %v8008_v59  ;;  %v415_v49 = vsub.f32 %v7759_v19, %v8008_v59  ;;  %v10585_v17 = vmov 0.0  }
  0x6e   : > { %783 = vbcast.lane.b32.xlu1 %v781_v41, 256  ;;  %v409_v41 = vsub.f32 %v7721_v9, %v8008_v59  ;;  %v440_v57 = vmul.f32 %v408_v11, %v408_v11  ;;  %v444_v6 = vmul.f32 %v412_v33, %v412_v33  ;;  %v445_v11 = vmul.f32 %v413_v61, %v413_v61 }
  0x6f   : > { %v446_v33 = vmul.f32 %v414_v63, %v414_v63  ;;  %1700 = vst.msk [vmem:[#allocation2 + $0x27] sm:$0x1] %vm1699_vm1, %v10585_v17  ;;  %1701 = vst.msk [vmem:[#allocation2 + $0x47] sm:$0x1] %vm1699_vm1, %v10585_v17 }
  0x70   : > { %v441_v1 = vmul.f32 %v409_v41, %v409_v41  ;;  %v472_v25 = vsel %vm337_vm0, %v440_v57, 0.0  ;;  %v479_v57 = vsel %vm337_vm0, %v444_v6, 0.0  ;;  %v481_v61 = vsel %vm337_vm0, %v445_v11, 0.0  ;;  %1702 = vst.msk [vmem:[#allocation2 + $0x67] sm:$0x1] %vm1699_vm1, %v10585_v17 }
  0x71   : > { %842 = vbcast.lane.b32.xlu0 %v836_v4, 264  ;;  %v483_v63 = vsel %vm337_vm0, %v446_v33, 0.0  ;;  %v924_v11 = vrot.slane %v575_v42, %v7921_v58  ;;  %1703 = vst.msk [vmem:[#allocation2 + $0x87] sm:$0x1] %vm1699_vm1, %v10585_v17  ;;  %1704 = vst.msk [vmem:[#allocation2 + $0xa7] sm:$0x1] %vm1699_vm1, %v10585_v17 }
  0x72   : > { %794 = vbcast.lane.b32.xlu1 %v792_v55, 256  ;;  %v411_v55 = vsub.f32 %v7737_v14, %v8008_v59  ;;  %v473_v40 = vsel %vm337_vm0, %v441_v1, 0.0  ;;  %1705 = vst.msk [vmem:[#allocation2 + $0xc7] sm:$0x1] %vm1699_vm1, %v10585_v17  ;;  %1706 = vst.msk [vmem:[#allocation2 + $0xe7] sm:$0x1] %vm1699_vm1, %v10585_v17 }
  0x73   : > { %1707 = vst.msk [vmem:[#allocation2 + $0x107] sm:$0x1] %vm1699_vm1, %v10585_v17  ;;  %1708 = vst.msk [vmem:[#allocation2 + $0x127] sm:$0x1] %vm1699_vm1, %v10585_v17 }
  0x74   : > { %v443_v7 = vmul.f32 %v411_v55, %v411_v55  ;;  %v416_v55 = vsub.f32 %v7762_v20, %v8008_v59  ;;  %1709 = vst.msk [vmem:[#allocation2 + $0x147] sm:$0x1] %vm1699_vm1, %v10585_v17  ;;  %1710 = vst.msk [vmem:[#allocation2 + $0x167] sm:$0x1] %vm1699_vm1, %v10585_v17 }
  0x75   : > { %853 = vbcast.lane.b32.xlu0 %v847_v56, 264  ;;  %1711 = vst.msk [vmem:[#allocation2 + $0x187] sm:$0x1] %vm1699_vm1, %v10585_v17  ;;  %1712 = vst.msk [vmem:[#allocation2 + $0x1a7] sm:$0x1] %vm1699_vm1, %v10585_v17 }
  0x76   : > { %805 = vbcast.lane.b32.xlu1 %v803_v62, 256  ;;  %v442_v62 = vmul.f32 %v410_v5, %v410_v5  ;;  %v902_v5 = vrot.slane %v575_v42, %v7794_v26  ;;  %v418_v26 = vsub.f32 %v7774_v22, %v8008_v59  ;;  %1713 = vst.msk [vmem:[#allocation2 + $0x1c7] sm:$0x1] %vm1699_vm1, %v10585_v17  ;;  %1714 = vst.msk [vmem:[#allocation2 + $0x1e7] sm:$0x1] %vm1699_vm1, %v10585_v17 }
  0x77   : > { %1715 = vst.msk [vmem:[#allocation2 + $0x207] sm:$0x1] %vm1699_vm1, %v10585_v17  ;;  %1716 = vst.msk [vmem:[#allocation2 + $0x38] sm:$0x1] %vm1699_vm1, %v10585_v17 }
  0x78   : > { %v475_v53 = vsel %vm337_vm0, %v442_v62, 0.0  ;;  %v447_v62 = vmul.f32 %v415_v49, %v415_v49  ;;  %1717 = vst.msk [vmem:[#allocation2 + $0x58] sm:$0x1] %vm1699_vm1, %v10585_v17  ;;  %1718 = vst.msk [vmem:[#allocation2 + $0x78] sm:$0x1] %vm1699_vm1, %v10585_v17 }
  0x79   : > { %864 = vbcast.lane.b32.xlu0 %v858_v60, 264  ;;  %1719 = vst.msk [vmem:[#allocation2 + $0x98] sm:$0x1] %vm1699_vm1, %v10585_v17  ;;  %1720 = vst.msk [vmem:[#allocation2 + $0xb8] sm:$0x1] %vm1699_vm1, %v10585_v17 }
  0x7a   : > { %816 = vbcast.lane.b32.xlu1 %v814_v18, 256  ;;  %v8027_v18 = vrot.slane %v575_v42, %v7731_v12  ;;  %v477_v12 = vsel %vm337_vm0, %v443_v7, 0.0  ;;  %1721 = vst.msk [vmem:[#allocation2 + $0xd8] sm:$0x1] %vm1699_vm1, %v10585_v17  ;;  %1722 = vst.msk [vmem:[#allocation2 + $0xf8] sm:$0x1] %vm1699_vm1, %v10585_v17 }
  0x7b   : > { %1723 = vst.msk [vmem:[#allocation2 + $0x118] sm:$0x1] %vm1699_vm1, %v10585_v17  ;;  %1724 = vst.msk [vmem:[#allocation2 + $0x138] sm:$0x1] %vm1699_vm1, %v10585_v17 }
  0x7c   : > { %1725 = vst.msk [vmem:[#allocation2 + $0x158] sm:$0x1] %vm1699_vm1, %v10585_v17  ;;  %1726 = vst.msk [vmem:[#allocation2 + $0x178] sm:$0x1] %vm1699_vm1, %v10585_v17 }
  0x7d   : > { %875 = vbcast.lane.b32.xlu0 %v869_v43, 264  ;;  %1727 = vst.msk [vmem:[#allocation2 + $0x198] sm:$0x1] %vm1699_vm1, %v10585_v17  ;;  %1728 = vst.msk [vmem:[#allocation2 + $0x1b8] sm:$0x1] %vm1699_vm1, %v10585_v17 }
  0x7e   : > { %827 = vbcast.lane.b32.xlu1 %v825_v48, 256  ;;  %v474_v48 = vadd.f32 %v473_v40, %v472_v25  ;;  %v913_v25 = vrot.slane %v575_v42, %v7869_v44  ;;  %v448_v40 = vmul.f32 %v416_v55, %v416_v55  ;;  %v420_v44 = vsub.f32 %v7780_v24, %v8008_v59 }
  0x7f   : > { %1729 = vst.msk [vmem:[#allocation2 + $0x1d8] sm:$0x1] %vm1699_vm1, %v10585_v17  ;;  %1730 = vst.msk [vmem:[#allocation2 + $0x1f8] sm:$0x1] %vm1699_vm1, %v10585_v17 }
  0x80   : > { %v476_v41 = vadd.f32 %v475_v53, %v474_v48  ;;  %v485_v48 = vsel %vm337_vm0, %v447_v62, 0.0  ;;  %v452_v58 = vmul.f32 %v420_v44, %v420_v44  ;;  %v8066_v62 = vld [vmem:[%s10475_s7] ss:$0 sm:$0xff]  ;;  %1731 = vst.msk [vmem:[#allocation2 + $0x218] sm:$0x1] %vm1699_vm1, %v10585_v17 }
  0x81   : > { %886 = vbcast.lane.b32.xlu0 %v8020_v13, 264 }
  0x82   : > { %838 = vbcast.lane.b32.xlu1 %v836_v4, 256  ;;  %v478_v1 = vadd.f32 %v477_v12, %v476_v41  ;;  %v417_v4 = vsub.f32 %v7765_v21, %v8008_v59  ;;  %v450_v12 = vmul.f32 %v418_v26, %v418_v26  ;;  %v487_v41 = vsel %vm337_vm0, %v448_v40, 0.0 }
  0x83   : > { %v423_v26 = vsub.f32 %v7803_v29, %v8008_v59 }
  0x84   : > { %v480_v7 = vadd.f32 %v479_v57, %v478_v1  ;;  %v449_v6 = vmul.f32 %v417_v4, %v417_v4  ;;  %v422_v4 = vsub.f32 %v7800_v28, %v8008_v59  ;;  %v491_v42 = vsel %vm337_vm0, %v450_v12, 0.0 }
  0x85   : > { %897 = vbcast.lane.b32.xlu0 %v8027_v18, 264  ;;  %v455_v12 = vmul.f32 %v423_v26, %v423_v26 }
  0x86   : > { %849 = vbcast.lane.b32.xlu1 %v847_v56, 256  ;;  %v482_v53 = vadd.f32 %v481_v61, %v480_v7  ;;  %v419_v56 = vsub.f32 %v7777_v23, %v8008_v59  ;;  %v489_v57 = vsel %vm337_vm0, %v449_v6, 0.0  ;;  %v1797_v61 = vld [vmem:[#allocation2 + $0x10] sm:$0xff]  ;;  %v424_v6 = vsub.f32 %v7812_v30, %v8008_v59 }
  0x88   : > { %v484_v49 = vadd.f32 %v483_v63, %v482_v53  ;;  %v451_v33 = vmul.f32 %v419_v56, %v419_v56 }
  0x89   : > { %908 = vbcast.lane.b32.xlu0 %v902_v5, 264 }
  0x8a   : > { %860 = vbcast.lane.b32.xlu1 %v858_v60, 256  ;;  %v486_v55 = vadd.f32 %v485_v48, %v484_v49  ;;  %v421_v60 = vsub.f32 %v7797_v27, %v8008_v59  ;;  %v493_v63 = vsel %vm337_vm0, %v451_v33, 0.0  ;;  %v454_v48 = vmul.f32 %v422_v4, %v422_v4 }
  0x8b   : > { %v495_v49 = vsel %vm337_vm0, %v452_v58, 0.0  ;;  %v456_v33 = vmul.f32 %v424_v6, %v424_v6  ;;  %v501_v58 = vsel %vm337_vm0, %v455_v12, 0.0 }
  0x8c   : > { %v488_v1 = vadd.f32 %v487_v41, %v486_v55  ;;  %v453_v40 = vmul.f32 %v421_v60, %v421_v60  ;;  %v426_v60 = vsub.f32 %v7818_v32, %v8008_v59 }
  0x8d   : > { %919 = vbcast.lane.b32.xlu0 %v913_v25, 264 }
  0x8e   : > { %871 = vbcast.lane.b32.xlu1 %v869_v43, 256  ;;  %v1796_v43 = vld [vmem:[#allocation2 + $0x8] sm:$0xff]  ;;  %v490_v7 = vadd.f32 %v489_v57, %v488_v1  ;;  %v497_v41 = vsel %vm337_vm0, %v453_v40, 0.0  ;;  %v499_v57 = vsel %vm337_vm0, %v454_v48, 0.0  ;;  %v429_v40 = vsub.f32 %v7836_v36, %v8008_v59 }
  0x8f   : > { %v6367_v56 = vpack.i.bf16 %v1797_v61, %v1796_v43  ;;  %v428_v43 = vsub.f32 %v7833_v35, %v8008_v59  ;;  %v458_v61 = vmul.f32 %v426_v60, %v426_v60 }
  0x90   : > { %v492_v53 = vadd.f32 %v491_v42, %v490_v7  ;;  %v503_v7 = vsel %vm337_vm0, %v456_v33, 0.0 }
  0x91   : > { %930 = vbcast.lane.b32.xlu0 %v924_v11, 264  ;;  %v460_v6 = vmul.f32 %v428_v43, %v428_v43  ;;  %v507_v48 = vsel %vm337_vm0, %v458_v61, 0.0 }
  0x92   : > { %882 = vbcast.lane.b32.xlu1 %v8020_v13, 256  ;;  %v494_v44 = vadd.f32 %v493_v63, %v492_v53  ;;  %v425_v13 = vsub.f32 %v7815_v31, %v8008_v59 }
  0x93   : > { %v511_v33 = vsel %vm337_vm0, %v460_v6, 0.0  ;;  %v436_v6 = vsub.f32 %v7889_v50, %v8008_v59  ;;  %v1817_v50 = vld [vmem:[#allocation2 + $0x150] sm:$0xff] }
  0x94   : > { %v496_v55 = vadd.f32 %v495_v49, %v494_v44  ;;  %v457_v4 = vmul.f32 %v425_v13, %v425_v13  ;;  %v8096_v49 = vpop.permute.xlu0 %585  ;;  %v461_v13 = vmul.f32 %v429_v40, %v429_v40 }
  0x95   : > { %1671 = vbcast.lane.b32.xlu0 %v8066_v62, 264 }
  0x96   : > { %893 = vbcast.lane.b32.xlu1 %v8027_v18, 256  ;;  %v498_v1 = vadd.f32 %v497_v41, %v496_v55  ;;  %v427_v18 = vsub.f32 %v7830_v34, %v8008_v59  ;;  %v432_v55 = vsub.f32 %v7851_v39, %v8008_v59 }
  0x98   : > { %v500_v42 = vadd.f32 %v499_v57, %v498_v1  ;;  %v459_v63 = vmul.f32 %v427_v18, %v427_v18  ;;  %v433_v1 = vsub.f32 %v7872_v45, %v8008_v59  ;;  %v513_v18 = vsel %vm337_vm0, %v461_v13, 0.0 }
  0x99   : > { %6368 = vrot.lane.b32.xlu0 %v6367_v56, %s7575_s21  ;;  %v430_v56 = vsub.f32 %v7845_v37, %v8008_v59  ;;  %v464_v43 = vmul.f32 %v432_v55, %v432_v55 }
  0x9a   : > { %904 = vbcast.lane.b32.xlu1 %v902_v5, 256  ;;  %v502_v26 = vadd.f32 %v501_v58, %v500_v42  ;;  %v505_v5 = vsel %vm337_vm0, %v457_v4, 0.0  ;;  %v509_v12 = vsel %vm337_vm0, %v459_v63, 0.0  ;;  %v8108_v4 = vpop.permute.xlu0 %622  ;;  %v434_v42 = vsub.f32 %v7875_v46, %v8008_v59 }
  0x9b   : > { %v462_v60 = vmul.f32 %v430_v56, %v430_v56  ;;  %v465_v40 = vmul.f32 %v433_v1, %v433_v1 }
  0x9c   : > { %v504_v53 = vadd.f32 %v503_v7, %v502_v26  ;;  %v435_v26 = vsub.f32 %v7878_v47, %v8008_v59 }
  0x9d   : > { %v515_v61 = vsel %vm337_vm0, %v462_v60, 0.0  ;;  %v521_v60 = vsel %vm337_vm0, %v465_v40, 0.0  ;;  %v1807_v40 = vld [vmem:[#allocation2 + $0xb0] sm:$0xff] }
  0x9e   : > { %915 = vbcast.lane.b32.xlu1 %v913_v25, 256  ;;  %v506_v44 = vadd.f32 %v505_v5, %v504_v53  ;;  %v431_v25 = vsub.f32 %v7848_v38, %v8008_v59  ;;  %v1798_v5 = vld [vmem:[#allocation2 + $0x28] sm:$0xff]  ;;  %v1799_v53 = vld [vmem:[#allocation2 + $0x30] sm:$0xff]  ;;  %v467_v55 = vmul.f32 %v435_v26, %v435_v26 }
  0x9f   : > { %v1806_v26 = vld [vmem:[#allocation2 + $0xa8] sm:$0xff] }
  0xa0   : > { %v508_v41 = vadd.f32 %v507_v48, %v506_v44  ;;  %v466_v48 = vmul.f32 %v434_v42, %v434_v42  ;;  %v519_v44 = vsel %vm337_vm0, %v464_v43, 0.0  ;;  %v439_v43 = vsub.f32 %v7906_v54, %v8008_v59  ;;  %v1816_v54 = vld [vmem:[#allocation2 + $0x148] sm:$0xff] }
  0xa2   : > { %926 = vbcast.lane.b32.xlu1 %v924_v11, 256  ;;  %v510_v57 = vadd.f32 %v509_v12, %v508_v41  ;;  %v463_v11 = vmul.f32 %v431_v25, %v431_v25  ;;  %v8120_v25 = vpop.permute.xlu0 %633  ;;  %v6372_v12 = vpack.i.bf16 %v1799_v53, %v1798_v5  ;;  %v437_v41 = vsub.f32 %v7892_v51, %v8008_v59 }
  0xa4   : > { %v512_v58 = vadd.f32 %v511_v33, %v510_v57  ;;  %v517_v63 = vsel %vm337_vm0, %v463_v11, 0.0  ;;  %v1802_v33 = vld [vmem:[#allocation2 + $0x68] sm:$0xff]  ;;  %v1803_v57 = vld [vmem:[#allocation2 + $0x70] sm:$0xff]  ;;  %v438_v11 = vsub.f32 %v7895_v52, %v8008_v59 }
  0xa6   : > { %1667 = vbcast.lane.b32.xlu1 %v8066_v62, 256  ;;  %v514_v7 = vadd.f32 %v513_v18, %v512_v58  ;;  %v468_v18 = vmul.f32 %v436_v6, %v436_v6  ;;  %v523_v58 = vsel %vm337_vm0, %v466_v48, 0.0  ;;  %v470_v53 = vmul.f32 %v438_v11, %v438_v11 }
  0xa7   : > { %v8140_v48 = vpack.i.bf16 %v1807_v40, %v1806_v26 }
  0xa8   : > { %v516_v56 = vadd.f32 %v515_v61, %v514_v7  ;;  %v469_v61 = vmul.f32 %v437_v41, %v437_v41  ;;  %v525_v7 = vsel %vm337_vm0, %v467_v55, 0.0  ;;  %v1811_v41 = vld [vmem:[#allocation2 + $0xf0] sm:$0xff] }
  0xa9   : > { %10578 = vst [vmem:[#allocation39_spill] sm:$0xff] %v8140_v48 }
  0xaa   : > { %1675 = vbcast.lane.b32.xlu1 %v8066_v62, 272  ;;  %v518_v13 = vadd.f32 %v517_v63, %v516_v56  ;;  %v8135_v63 = vpop.permute.xlu0 %644  ;;  %v527_v56 = vsel %vm337_vm0, %v468_v18, 0.0 }
  0xac   : > { %v520_v1 = vadd.f32 %v519_v44, %v518_v13  ;;  %v471_v44 = vmul.f32 %v439_v43, %v439_v43  ;;  %v529_v13 = vsel %vm337_vm0, %v469_v61, 0.0 }
  0xae   : > { %1679 = vbcast.lane.b32.xlu1 %v8066_v62, 280  ;;  %v522_v42 = vadd.f32 %v521_v60, %v520_v1  ;;  %v8130_v62 = vpack.i.bf16 %v1803_v57, %v1802_v33  ;;  %v531_v60 = vsel %vm337_vm0, %v470_v53, 0.0  ;;  %v8144_v33 = vpop.permute.xlu0 %655  ;;  %v533_v11 = vsel %vm337_vm0, %v471_v44, 0.0  ;;  %v543_v44 = vld [vmem:[%s10472_s4] sm:$0xff] }
  0xb0   : > { %v524_v5 = vadd.f32 %v523_v58, %v522_v42 }
  0xb2   : > { %6373 = vrot.lane.b32.xlu1 %v6372_v12, %s7575_s21  ;;  %v526_v6 = vadd.f32 %v525_v7, %v524_v5  ;;  %v1810_v12 = vld [vmem:[#allocation2 + $0xe8] sm:$0xff]  ;;  %v8153_v42 = vpop.permute.xlu0 %666 }
  0xb3   : > { %v8148_v1 = vpack.i.bf16 %v1811_v41, %v1810_v12 }
  0xb4   : > { %v528_v55 = vadd.f32 %v527_v56, %v526_v6 }
  0xb5   : > { %10579 = vst [vmem:[#allocation40_spill] sm:$0xff] %v8148_v1 }
  0xb6   : > { %6383 = vrot.lane.b32.xlu1 %v8130_v62, %s7575_s21  ;;  %v530_v57 = vadd.f32 %v529_v13, %v528_v55  ;;  %v8155_v26 = vpop.permute.xlu0 %677  ;;  %v544_v13 = vld [vmem:[%s10472_s4 + $0x8] sm:$0xff] }
  0xb8   : > { %v532_v18 = vadd.f32 %v531_v60, %v530_v57 }
  0xba   : > { %6393 = vrot.lane.b32.xlu1 %v8140_v48, %s7575_s21  ;;  %v534_v58 = vadd.f32 %v533_v11, %v532_v18  ;;  %v8157_v56 = vpop.permute.xlu0 %688 }
  0xbc   : > { %v535_v43 = vrot.slane %v534_v58, 4 }
  0xbe   : > { %6403 = vrot.lane.b32.xlu1 %v8148_v1, %s7575_s21  ;;  %v536_v61 = vadd.f32 %v535_v43, %v534_v58  ;;  %v8166_v60 = vpop.permute.xlu0 %699  ;;  %v8174_v43 = vpop.permute.xlu1 %560 }
  0xc0   : > { %v537_v7 = vrot.slane %v536_v61, 2 }
  0xc2   : > { %v538_v40 = vadd.f32 %v537_v7, %v536_v61  ;;  %v8170_v18 = vpop.permute.xlu0 %710  ;;  %v1800_v7 = vld [vmem:[#allocation2 + $0x48] sm:$0xff] }
  0xc4   : > { %v539_v5 = vrot.slane %v538_v40, 1 }
  0xc6   : > { %v540_v53 = vadd.f32 %v539_v5, %v538_v40  ;;  %v8172_v58 = vpop.permute.xlu0 %721  ;;  %v1814_v40 = vld [vmem:[#allocation2 + $0x128] sm:$0xff]  ;;  %v1815_v5 = vld [vmem:[#allocation2 + $0x130] sm:$0xff] }
  0xc8   : > { %v541_v6 = vmul.f32 0.003921569, %v540_v53  ;;  %v8178_v53 = vpack.i.bf16 %v1815_v5, %v1814_v40 }
  0xca   : > { %v542_v12 = vadd.f32 %v541_v6, %v8008_v59  ;;  %v8176_v61 = vpop.permute.xlu0 %732  ;;  %v1801_v59 = vld [vmem:[#allocation2 + $0x50] sm:$0xff]  ;;  %10580 = vst [vmem:[#allocation41_spill] sm:$0xff] %v8178_v53  ;;  %v8180_v6 = vpop.permute.xlu1 %564  ;;  %6413 = vrot.lane.b32.xlu1 %v8178_v53, %s7575_s21 }
  0xcc   : > { %v545_v41 = vmul.f32 %v543_v44, %v542_v12  ;;  %v546_v55 = vmul.f32 %v544_v13, %v542_v12  ;;  %v8182_v44 = vpack.i.bf16 %v1801_v59, %v1800_v7  ;;  %v1804_v12 = vld [vmem:[#allocation2 + $0x88] sm:$0xff] }
  0xcd   : > { %v1812_v59 = vld [vmem:[#allocation2 + $0x108] sm:$0xff] }
  0xce   : > { %v547_v57 = vsel %vm337_vm0, %v545_v41, 0.0  ;;  %v550_v11 = vsel %vm337_vm0, %v546_v55, 0.0  ;;  %v8184_v13 = vpop.permute.xlu0 %743  ;;  %v1805_v41 = vld [vmem:[#allocation2 + $0x90] sm:$0xff]  ;;  %v8192_v40 = vpop.permute.xlu1 %589 }
  0xcf   : > { %548 = vadd.xlane.f32.xlu0 %v547_v57  ;;  %v8190_v55 = vpack.i.bf16 %v1805_v41, %v1804_v12  ;;  %v1808_v57 = vld [vmem:[#allocation2 + $0xc8] sm:$0xff]  ;;  %v8204_v12 = vpack.i.bf16 %v1813_v0, %v1812_v59  ;;  %v7576_v41 = vmov 0  }
  0xd0   : > { %6422 = vset.pattern.permute.xlu1 %v7576_v41  ;;  %6423 = vset.pattern.permute.xlu0 %v7576_v41 }
  0xd1   : > { %10581 = vst [vmem:[#allocation42_spill] sm:$0xff] %v8190_v55  ;;  %10583 = vst [vmem:[#allocation44_spill] sm:$0xff] %v8204_v12 }
  0xd2   : > { %v8194_v5 = vpop.permute.xlu0 %754  ;;  %v8200_v2 = vpop.permute.xlu1 %596 }
  0xd3   : > { %551 = vadd.xlane.f32.xlu0 %v550_v11  ;;  %v1809_v11 = vld [vmem:[#allocation2 + $0xd0] sm:$0xff] }
  0xd4   : > { %v8198_v7 = vpack.i.bf16 %v1809_v11, %v1808_v57  ;;  %v8210_v57 = vpack.i.bf16 %v1817_v50, %v1816_v54 }
  0xd6   : > { %10582 = vst [vmem:[#allocation43_spill] sm:$0xff] %v8198_v7  ;;  %v8206_v51 = vpop.permute.xlu0 %765  ;;  %10584 = vst [vmem:[#allocation45_spill] sm:$0xff] %v8210_v57  ;;  %v8212_v11 = vpop.permute.xlu1 %600 }
  0xda   : > { %v8214_v52 = vpop.permute.xlu0 %776  ;;  %v8218_v0 = vpop.permute.xlu1 %607 }
  0xde   : > { %v8220_v59 = vpop.permute.xlu0 %787  ;;  %v8222_v47 = vpop.permute.xlu1 %611 }
  0xe2   : > { %v8224_v46 = vpop.permute.xlu0 %798  ;;  %v8226_v41 = vpop.permute.xlu1 %618 }
  0xe6   : > { %v8228_v45 = vpop.permute.xlu0 %809  ;;  %v8230_v50 = vpop.permute.xlu1 %629 }
  0xe9   : > { %6378 = vrot.lane.b32.xlu0 %v8182_v44, %s7575_s21 }
  0xea   : > { %v8232_v54 = vpop.permute.xlu0 %820  ;;  %v8234_v39 = vpop.permute.xlu1 %640 }
  0xed   : > { %6388 = vrot.lane.b32.xlu0 %v8190_v55, %s7575_s21 }
  0xee   : > { %v8236_v38 = vpop.permute.xlu0 %831  ;;  %v8238_v37 = vpop.permute.xlu1 %651 }
  0xf1   : > { %6398 = vrot.lane.b32.xlu0 %v8198_v7, %s7575_s21 }
  0xf2   : > { %v8240_v36 = vpop.permute.xlu0 %842  ;;  %v8242_v35 = vpop.permute.xlu1 %662 }
  0xf5   : > { %6408 = vrot.lane.b32.xlu0 %v8204_v12, %s7575_s21 }
  0xf6   : > { %v8244_v34 = vpop.permute.xlu0 %853  ;;  %v8246_v32 = vpop.permute.xlu1 %673 }
  0xf9   : > { %6418 = vrot.lane.b32.xlu0 %v8210_v57, %s7575_s21 }
  0xfa   : > { %v8248_v31 = vpop.permute.xlu0 %864  ;;  %v8250_v30 = vpop.permute.xlu1 %684 }
  0xfe   : > { %v8252_v29 = vpop.permute.xlu0 %875  ;;  %v8254_v28 = vpop.permute.xlu1 %695 }
 0x102   : > { %v8256_v27 = vpop.permute.xlu0 %886  ;;  %v8258_v24 = vpop.permute.xlu1 %706 }
 0x106   : > { %v8260_v23 = vpop.permute.xlu0 %897  ;;  %v8262_v22 = vpop.permute.xlu1 %717 }
 0x10a   : > { %v8264_v21 = vpop.permute.xlu0 %908  ;;  %v8266_v20 = vpop.permute.xlu1 %728 }
 0x10e   : > { %v8268_v19 = vpop.permute.xlu0 %919  ;;  %v8334_v16 = vpop.permute.xlu1 %739 }
 0x112   : > { %v8336_v15 = vpop.permute.xlu0 %930  ;;  %v8338_v14 = vpop.permute.xlu1 %750 }
 0x116   : > { %v8340_v10 = vpop.permute.xlu0 %1671  ;;  %v8342_v9 = vpop.permute.xlu1 %761 }
 0x117   : > { %10586 = vst [vmem:[#allocation46_spill] sm:$0xff] %v8340_v10 }
 0x11a   : > { %v8344_v8 = vpop.permute.xlu0 %6368  ;;  %v8346_v57 = vpop.permute.xlu1 %772 }
 0x11b   : > { %10587 = vst [vmem:[#allocation47_spill] sm:$0xff] %v8344_v8 }
 0x11e   : > { %v8353_v1 = vpop.permute.xlu1 %783 }
 0x122   : > { %v8357_v48 = vpop.permute.xlu1 %794 }
 0x15c   : > { %v549_v3 = vpop.xlane.xlu0 %548 }
 0x15d   : > { %v568_v53 = vadd.f32 %v8174_v43, %v549_v3  ;;  %v8366_v43 = vpop.permute.xlu1 %805 }
 0x15f   : > { %v8349_v12 = vmax.f32 %v568_v53, 0.0 }
 0x160   : > { %v552_v7 = vpop.xlane.xlu0 %551 }
 0x161   : > { %v996_v17 = vmul.f32 %v8096_v49, %v8349_v12  ;;  %v998_v10 = vmul.f32 %v8200_v2, %v8349_v12  ;;  %v569_v8 = vadd.f32 %v8180_v6, %v552_v7  ;;  %v1000_v2 = vmul.f32 %v8218_v0, %v8349_v12 }
 0x162   : > { %v1002_v53 = vmul.f32 %v8226_v41, %v8349_v12  ;;  %v1008_v41 = vmul.f32 %v8238_v37, %v8349_v12 }
 0x163   : > { %1125 = vperm.xlu1 %6422, %v996_v17   ;;  %v8360_v55 = vmax.f32 %v569_v8, 0.0  ;;  %v8372_v8 = vpop.permute.xlu1 %816 }
 0x165   : > { %v997_v3 = vmul.f32 %v8192_v40, %v8360_v55  ;;  %v999_v49 = vmul.f32 %v8212_v11, %v8360_v55  ;;  %v1003_v6 = vmul.f32 %v8108_v4, %v8360_v55  ;;  %v1004_v40 = vmul.f32 %v8230_v50, %v8349_v12 }
 0x166   : > { %v1005_v7 = vmul.f32 %v8120_v25, %v8360_v55  ;;  %v1007_v0 = vmul.f32 %v8135_v63, %v8360_v55  ;;  %v1009_v25 = vmul.f32 %v8144_v33, %v8360_v55  ;;  %v1010_v50 = vmul.f32 %v8242_v35, %v8349_v12 }
 0x167   : > { %1131 = vperm.xlu1 %6422, %v998_v10   ;;  %1128 = vperm.xlu0 %6423, %v997_v3   ;;  %v1001_v10 = vmul.f32 %v8222_v47, %v8360_v55  ;;  %v8382_v11 = vpop.permute.xlu1 %827  ;;  %v1006_v47 = vmul.f32 %v8234_v39, %v8349_v12  ;;  %v1011_v39 = vmul.f32 %v8153_v42, %v8360_v55 }
 0x168   : > { %v1012_v63 = vmul.f32 %v8246_v32, %v8349_v12  ;;  %v1013_v37 = vmul.f32 %v8155_v26, %v8360_v55  ;;  %v1014_v35 = vmul.f32 %v8250_v30, %v8349_v12  ;;  %v1015_v42 = vmul.f32 %v8157_v56, %v8360_v55 }
 0x169   : > { %v1016_v3 = vmul.f32 %v8254_v28, %v8349_v12  ;;  %v1017_v32 = vmul.f32 %v8166_v60, %v8360_v55  ;;  %v1018_v26 = vmul.f32 %v8258_v24, %v8349_v12  ;;  %v1019_v30 = vmul.f32 %v8170_v18, %v8360_v55 }
 0x16a   : > { %v1020_v28 = vmul.f32 %v8262_v22, %v8349_v12  ;;  %v1021_v60 = vmul.f32 %v8172_v58, %v8360_v55  ;;  %v1023_v24 = vmul.f32 %v8176_v61, %v8360_v55  ;;  %v1024_v18 = vmul.f32 %v8334_v16, %v8349_v12 }
 0x16b   : > { %1134 = vperm.xlu1 %6422, %v999_v49   ;;  %1137 = vperm.xlu0 %6423, %v1000_v2   ;;  %v8388_v4 = vpop.permute.xlu1 %838  ;;  %v1022_v2 = vmul.f32 %v8266_v20, %v8349_v12  ;;  %v1025_v22 = vmul.f32 %v8184_v13, %v8360_v55  ;;  %v1026_v20 = vmul.f32 %v8338_v14, %v8349_v12 }
 0x16c   : > { %v1027_v61 = vmul.f32 %v8194_v5, %v8360_v55  ;;  %v1029_v16 = vmul.f32 %v8206_v51, %v8360_v55  ;;  %v1030_v13 = vmul.f32 %v8346_v57, %v8349_v12  ;;  %v1031_v14 = vmul.f32 %v8214_v52, %v8360_v55 }
 0x16d   : > { %v1032_v5 = vmul.f32 %v8353_v1, %v8349_v12  ;;  %v1034_v51 = vmul.f32 %v8357_v48, %v8349_v12  ;;  %v1035_v52 = vmul.f32 %v8224_v46, %v8360_v55  ;;  %v1036_v1 = vmul.f32 %v8366_v43, %v8349_v12 }
 0x16e   : > { %v1037_v57 = vmul.f32 %v8228_v45, %v8360_v55  ;;  %v1038_v48 = vmul.f32 %v8372_v8, %v8349_v12  ;;  %v1040_v46 = vmul.f32 %v8382_v11, %v8349_v12  ;;  %v1041_v45 = vmul.f32 %v8236_v38, %v8360_v55 }
 0x16f   : > { %1140 = vperm.xlu1 %6422, %v1001_v10   ;;  %1143 = vperm.xlu0 %6423, %v1002_v53   ;;  %v8398_v17 = vpop.permute.xlu1 %849  ;;  %v1028_v53 = vmul.f32 %v8342_v9, %v8349_v12  ;;  %v1033_v9 = vmul.f32 %v8220_v59, %v8360_v55  ;;  %v1042_v43 = vmul.f32 %v8388_v4, %v8349_v12 }
 0x170   : > { %v1043_v8 = vmul.f32 %v8240_v36, %v8360_v55  ;;  %v1044_v11 = vmul.f32 %v8398_v17, %v8349_v12  ;;  %v1047_v36 = vmul.f32 %v8248_v31, %v8360_v55  ;;  %v1051_v31 = vmul.f32 %v8256_v27, %v8360_v55  ;;  %v7330_v27 = vld [vmem:[%s10469_s1] sm:$0xff]  }
 0x173   : > { %1146 = vperm.xlu1 %6422, %v1003_v6   ;;  %1149 = vperm.xlu0 %6423, %v1004_v40   ;;  %v8404_v33 = vpop.permute.xlu1 %860 }
 0x174   : > { %v1046_v38 = vmul.f32 %v8404_v33, %v8349_v12  ;;  %v1053_v33 = vmul.f32 %v8260_v23, %v8360_v55 }
 0x177   : > { %1152 = vperm.xlu1 %6422, %v1005_v7   ;;  %1155 = vperm.xlu0 %6423, %v1006_v47   ;;  %v8414_v49 = vpop.permute.xlu1 %871  ;;  %v1039_v47 = vmul.f32 %v8232_v54, %v8360_v55 }
 0x178   : > { %v1048_v4 = vmul.f32 %v8414_v49, %v8349_v12  ;;  %v7331_v49 = vld [vmem:[%s10469_s1 + $0x48] sm:$0xff]  }
 0x17b   : > { %1158 = vperm.xlu1 %6422, %v1007_v0   ;;  %1161 = vperm.xlu0 %6423, %v1008_v41   ;;  %v8420_v56 = vpop.permute.xlu1 %882  ;;  %v1045_v41 = vmul.f32 %v8244_v34, %v8360_v55 }
 0x17c   : > { %v1050_v17 = vmul.f32 %v8420_v56, %v8349_v12 }
 0x17f   : > { %1164 = vperm.xlu1 %6422, %v1009_v25   ;;  %1167 = vperm.xlu0 %6423, %v1010_v50   ;;  %v8430_v10 = vpop.permute.xlu1 %893  ;;  %v1049_v50 = vmul.f32 %v8252_v29, %v8360_v55 }
 0x183   : > { %1170 = vperm.xlu1 %6422, %v1011_v39   ;;  %1173 = vperm.xlu0 %6423, %v1012_v63   ;;  %v8436_v58 = vpop.permute.xlu1 %904  ;;  %v8500_v39 = vpop.permute.xlu0 %6378 }
 0x184   : > { %10593 = vst [vmem:[#allocation53_spill] sm:$0xff] %v8500_v39 }
 0x187   : > { %1176 = vperm.xlu1 %6422, %v1013_v37   ;;  %1179 = vperm.xlu0 %6423, %v1014_v35   ;;  %v8446_v6 = vpop.permute.xlu1 %915  ;;  %v8508_v63 = vpop.permute.xlu0 %6388  ;;  %v1052_v37 = vmul.f32 %v8430_v10, %v8349_v12  ;;  %v7329_v35 = vld [vmem:[%s10469_s1 + $0x40] sm:$0xff]   ;;  %v1924_v10 = vld [vmem:[#allocation2 + $0x29] sm:$0xff] }
 0x188   : > { %10595 = vst [vmem:[#allocation55_spill] sm:$0xff] %v8508_v63  ;;  %5985 = vmatprep.subr.bf16.mxu0 %v7329_v35  ;;  %v1928_v35 = vld [vmem:[#allocation2 + $0x69] sm:$0xff]  ;;  %v2036_v63 = vld [vmem:[#allocation2 + $0x131] sm:$0xff] }
 0x189   : > { %5986 = vmatpush3.bf16.msra.mxu0 %v7330_v27  ;;  %v1929_v27 = vld [vmem:[#allocation2 + $0x71] sm:$0xff] }
 0x18a   : > { %5987 = vmatprep.subr.bf16.mxu0 %v7331_v49 }
 0x18b   : > { %1182 = vperm.xlu1 %6422, %v1015_v42   ;;  %1185 = vperm.xlu0 %6423, %v1016_v3   ;;  %v8454_v40 = vpop.permute.xlu1 %926  ;;  %v1054_v42 = vmul.f32 %v8436_v58, %v8349_v12  ;;  %v1055_v3 = vmul.f32 %v8264_v21, %v8360_v55  ;;  %v1057_v21 = vmul.f32 %v8268_v19, %v8360_v55  ;;  %v1925_v19 = vld [vmem:[#allocation2 + $0x31] sm:$0xff] }
 0x18c   : > { %v8556_v58 = vld [vmem:[#allocation2 + $0x4f] sm:$0xff] }
 0x18d   : > { %10601 = vst [vmem:[#allocation61_spill] sm:$0xff] %v8556_v58 }
 0x18f   : > { %1188 = vperm.xlu1 %6422, %v1017_v32   ;;  %1191 = vperm.xlu0 %6423, %v1018_v26   ;;  %v8460_v7 = vpop.permute.xlu1 %1667  ;;  %v8526_v32 = vpop.permute.xlu0 %6398  ;;  %v7332_v26 = vld [vmem:[%s10469_s1 + $0x8] sm:$0xff]  }
 0x190   : > { %10588 = vst [vmem:[#allocation48_spill] sm:$0xff] %v8460_v7  ;;  %10597 = vst [vmem:[#allocation57_spill] sm:$0xff] %v8526_v32  ;;  %5988 = vmatpush3.bf16.msra.mxu0 %v7332_v26 }
 0x193   : > { %1194 = vperm.xlu1 %6422, %v1019_v30   ;;  %1197 = vperm.xlu0 %6423, %v1020_v28   ;;  %v8468_v59 = vpop.permute.xlu1 %1675  ;;  %v1056_v30 = vmul.f32 %v8446_v6, %v8349_v12  ;;  %v7333_v28 = vld [vmem:[%s10469_s1 + $0x50] sm:$0xff]  }
 0x194   : > { %10589 = vst [vmem:[#allocation49_spill] sm:$0xff] %v8468_v59  ;;  %5989 = vmatprep.subr.bf16.mxu0 %v7333_v28  ;;  %v6474_v28 = vpack.i.bf16 %v1929_v27, %v1928_v35 }
 0x197   : > { %1200 = vperm.xlu1 %6422, %v1021_v60   ;;  %1203 = vperm.xlu0 %6423, %v1022_v2   ;;  %v8476_v0 = vpop.permute.xlu1 %1679  ;;  %v7334_v60 = vld [vmem:[%s10469_s1 + $0x10] sm:$0xff]   ;;  %v8548_v2 = vpop.permute.xlu0 %6408 }
 0x198   : > { %10590 = vst [vmem:[#allocation50_spill] sm:$0xff] %v8476_v0  ;;  %10599 = vst [vmem:[#allocation59_spill] sm:$0xff] %v8548_v2  ;;  %5990 = vmatpush3.bf16.msra.mxu0 %v7334_v60  ;;  %v3020_v60 = vpack.c.bf16 %v1929_v27, %v1928_v35  ;;  %v1934_v27 = vld [vmem:[#allocation2 + $0xc9] sm:$0xff] }
 0x19b   : > { %1206 = vperm.xlu1 %6422, %v1023_v24   ;;  %1209 = vperm.xlu0 %6423, %v1024_v18   ;;  %v8484_v54 = vpop.permute.xlu1 %6373  ;;  %v1058_v24 = vmul.f32 %v8454_v40, %v8349_v12  ;;  %v1059_v18 = vmul.f32 %v8336_v15, %v8360_v55  ;;  %v7336_v12 = vld [vmem:[%s10469_s1 + $0x18] sm:$0xff]   ;;  %v1828_v55 = vld [vmem:[#allocation2 + $0x9] sm:$0xff]  ;;  %v8568_v6 = vpop.permute.xlu0 %6418 }
 0x19c   : > { %10591 = vst [vmem:[#allocation51_spill] sm:$0xff] %v8484_v54  ;;  %10602 = vst [vmem:[#allocation62_spill] sm:$0xff] %v8568_v6  ;;  %v1926_v40 = vld [vmem:[#allocation2 + $0x49] sm:$0xff]  ;;  %v2040_v54 = vld [vmem:[#allocation2 + $0x171] sm:$0xff] }
 0x19d   : > { %v1785_v6 = vld [vmem:[#allocation2 + $0x14f] sm:$0xff] }
 0x19f   : > { %1212 = vperm.xlu1 %6422, %v1025_v22   ;;  %1215 = vperm.xlu0 %6423, %v1026_v20   ;;  %v8492_v25 = vpop.permute.xlu1 %6383  ;;  %v8554_v22 = vld [vmem:[#allocation2 + $0x47] sm:$0xff] }
 0x1a0   : > { %10592 = vst [vmem:[#allocation52_spill] sm:$0xff] %v8492_v25  ;;  %10600 = vst [vmem:[#allocation60_spill] sm:$0xff] %v8554_v22  ;;  %v6429_v20 = vpack.i.bf16 %v8556_v58, %v8554_v22  ;;  %v10619_v58 = vld [vmem:[#allocation6_spill] sm:$0xff] }
 0x1a3   : > { %1218 = vperm.xlu1 %6422, %v1027_v61   ;;  %1221 = vperm.xlu0 %6423, %v1028_v53   ;;  %v8502_v34 = vpop.permute.xlu1 %6393  ;;  %v7335_v61 = vld [vmem:[%s10469_s1 + $0x58] sm:$0xff]   ;;  %v6424_v53 = vpack.i.bf16 %v1925_v19, %v1924_v10  ;;  %v1930_v19 = vld [vmem:[#allocation2 + $0x89] sm:$0xff] }
 0x1a4   : > { %10594 = vst [vmem:[#allocation54_spill] sm:$0xff] %v8502_v34  ;;  %5991 = vmatprep.subr.bf16.mxu0 %v7335_v61  ;;  %v2035_v34 = vld [vmem:[#allocation2 + $0x129] sm:$0xff] }
 0x1a5   : > { %5992 = vmatpush3.bf16.msra.mxu0 %v7336_v12 }
 0x1a7   : > { %1224 = vperm.xlu1 %6422, %v1029_v16   ;;  %1227 = vperm.xlu0 %6423, %v1030_v13   ;;  %v8512_v29 = vpop.permute.xlu1 %6403  ;;  %v1829_v16 = vld [vmem:[#allocation2 + $0x11] sm:$0xff]  ;;  %v7337_v13 = vld [vmem:[%s10469_s1 + $0x60] sm:$0xff]  }
 0x1a8   : > { %10596 = vst [vmem:[#allocation56_spill] sm:$0xff] %v8512_v29  ;;  %5993 = vmatprep.subr.bf16.mxu0 %v7337_v13  ;;  %v10613_v29 = vld [vmem:[#allocation41_spill] sm:$0xff] }
 0x1ab   : > { %1230 = vperm.xlu1 %6422, %v1031_v14   ;;  %1233 = vperm.xlu0 %6423, %v1032_v5   ;;  %v8528_v23 = vpop.permute.xlu1 %6413  ;;  %v7338_v14 = vld [vmem:[%s10469_s1 + $0x20] sm:$0xff]   ;;  %v6434_v5 = vpack.i.bf16 %v1829_v16, %v1828_v55  ;;  %v1775_v16 = vld [vmem:[#allocation2 + $0xaf] sm:$0xff] }
 0x1ac   : > { %10598 = vst [vmem:[#allocation58_spill] sm:$0xff] %v8528_v23  ;;  %5994 = vmatpush3.bf16.msra.mxu0 %v7338_v14  ;;  %v1774_v55 = vld [vmem:[#allocation2 + $0xa7] sm:$0xff] }
 0x1ad   : > { %v6504_v14 = vpack.i.bf16 %v1775_v16, %v1774_v55 }
 0x1af   : > { %1236 = vperm.xlu1 %6422, %v1033_v9   ;;  %1239 = vperm.xlu0 %6423, %v1034_v51   ;;  %v1927_v9 = vld [vmem:[#allocation2 + $0x51] sm:$0xff] }
 0x1b0   : > { %v8578_v51 = vld [vmem:[#allocation2 + $0x2f] sm:$0xff] }
 0x1b1   : > { %10603 = vst [vmem:[#allocation63_spill] sm:$0xff] %v8578_v51 }
 0x1b3   : > { %1242 = vperm.xlu1 %6422, %v1035_v52   ;;  %1245 = vperm.xlu0 %6423, %v1036_v1   ;;  %v8582_v1 = vld [vmem:[#allocation2 + $0x27] sm:$0xff] }
 0x1b4   : > { %10604 = vst [vmem:[#allocation64_spill] sm:$0xff] %v8582_v1 }
 0x1b7   : > { %1248 = vperm.xlu1 %6422, %v1037_v57   ;;  %1251 = vperm.xlu0 %6423, %v1038_v48   ;;  %v6449_v48 = vpack.i.bf16 %v1927_v9, %v1926_v40 }
 0x1bb   : > { %1254 = vperm.xlu1 %6422, %v1039_v47   ;;  %1257 = vperm.xlu0 %6423, %v1040_v46   ;;  %v7339_v47 = vld [vmem:[%s10469_s1 + $0x68] sm:$0xff]  }
 0x1bc   : > { %v7340_v46 = vld [vmem:[%s10469_s1 + $0x28] sm:$0xff]   ;;  %5995 = vmatprep.subr.bf16.mxu0 %v7339_v47 }
 0x1bd   : > { %5996 = vmatpush3.bf16.msra.mxu0 %v7340_v46  ;;  %v1776_v47 = vld [vmem:[#allocation2 + $0xc7] sm:$0xff]  ;;  %v1777_v46 = vld [vmem:[#allocation2 + $0xcf] sm:$0xff] }
 0x1bf   : > { %1260 = vperm.xlu1 %6422, %v1041_v45   ;;  %1263 = vperm.xlu0 %6423, %v1042_v43   ;;  %v6444_v45 = vpack.i.bf16 %v8578_v51, %v8582_v1  ;;  %v1944_v51 = vld [vmem:[#allocation2 + $0x169] sm:$0xff] }
 0x1c3   : > { %1266 = vperm.xlu1 %6422, %v1043_v8   ;;  %1269 = vperm.xlu0 %6423, %v1044_v11   ;;  %v8601_v8 = vld [vmem:[#allocation2 + $0x6f] sm:$0xff] }
 0x1c4   : > { %10606 = vst [vmem:[#allocation66_spill] sm:$0xff] %v8601_v8 }
 0x1c7   : > { %1272 = vperm.xlu1 %6422, %v1045_v41   ;;  %1275 = vperm.xlu0 %6423, %v1046_v38   ;;  %v7341_v38 = vld [vmem:[%s10469_s1 + $0x70] sm:$0xff]  }
 0x1c8   : > { %5997 = vmatprep.subr.bf16.mxu0 %v7341_v38 }
 0x1cb   : > { %1278 = vperm.xlu1 %6422, %v1047_v36   ;;  %1281 = vperm.xlu0 %6423, %v1048_v4   ;;  %v7342_v36 = vld [vmem:[%s10469_s1 + $0x30] sm:$0xff]   ;;  %v7343_v4 = vld [vmem:[%s10469_s1 + $0x80] sm:$0xff]  }
 0x1cc   : > { %5998 = vmatpush3.bf16.msra.mxu0 %v7342_v36  ;;  %6245 = vmatprep.subr.bf16.mxu1 %v7343_v4 }
 0x1cd   : > { %6246 = vmatpush3.bf16.msra.mxu1 %v7343_v4 }
 0x1cf   : > { %1284 = vperm.xlu1 %6422, %v1049_v50   ;;  %1287 = vperm.xlu0 %6423, %v1050_v17  }
 0x1d3   : > { %1290 = vperm.xlu1 %6422, %v1051_v31   ;;  %1293 = vperm.xlu0 %6423, %v1052_v37   ;;  %v7344_v31 = vld [vmem:[%s10469_s1 + $0x78] sm:$0xff]  }
 0x1d4   : > { %v7345_v37 = vld [vmem:[%s10469_s1 + $0x38] sm:$0xff]   ;;  %5999 = vmatprep.subr.bf16.mxu0 %v7344_v31  ;;  %v10608_v31 = vld [vmem:[#allocation39_spill] sm:$0xff] }
 0x1d5   : > { %6000 = vmatpush3.bf16.msra.mxu0 %v7345_v37 }
 0x1d7   : > { %1296 = vperm.xlu1 %6422, %v1053_v33   ;;  %1299 = vperm.xlu0 %6423, %v1054_v42   ;;  %v7346_v33 = vld [vmem:[%s10469_s1 + $0x88] sm:$0xff]  }
 0x1d8   : > { %v1772_v42 = vld [vmem:[#allocation2 + $0x87] sm:$0xff]  ;;  %6247 = vmatprep.subr.bf16.mxu1 %v7346_v33 }
 0x1d9   : > { %6248 = vmatpush3.bf16.msra.mxu1 %v7346_v33 }
 0x1db   : > { %1302 = vperm.xlu1 %6422, %v1055_v3   ;;  %1305 = vperm.xlu0 %6423, %v1056_v30   ;;  %v1773_v3 = vld [vmem:[#allocation2 + $0x8f] sm:$0xff] }
 0x1dc   : > { %v6479_v30 = vpack.i.bf16 %v1773_v3, %v1772_v42  ;;  %v1935_v42 = vld [vmem:[#allocation2 + $0xd1] sm:$0xff] }
 0x1df   : > { %1308 = vperm.xlu1 %6422, %v1057_v21   ;;  %1311 = vperm.xlu0 %6423, %v1058_v24   ;;  %v3017_v21 = vpack.c.bf16 %v1927_v9, %v1926_v40  ;;  %v1932_v9 = vld [vmem:[#allocation2 + $0xa9] sm:$0xff] }
 0x1e1   : > { %6249 = vmatprep.mubr.msk.bf16.mxu1 %vm337_vm0, %v3017_v21 }
 0x1e2   : > { %v8540_v56 = vpop.permute.xlu1 %1125  ;;  %6250 = vmatmul.mubr.msk.bf16.vlgmr.msra.gmra.mrb[0].mxu1 %vm337_vm0, %v3020_v60 }
 0x1e3   : > { %1314 = vperm.xlu1 %6422, %v1059_v18   ;;  %6430 = vrot.lane.b32.xlu0 %v6429_v20, %s7577_s17  ;;  %v1931_v18 = vld [vmem:[#allocation2 + $0x91] sm:$0xff] }
 0x1e4   : > { %v6499_v12 = vpack.i.bf16 %v1931_v18, %v1930_v19  ;;  %v3023_v36 = vpack.c.bf16 %v1931_v18, %v1930_v19  ;;  %v1778_v19 = vld [vmem:[#allocation2 + $0xe7] sm:$0xff]  ;;  %v1779_v18 = vld [vmem:[#allocation2 + $0xef] sm:$0xff] }
 0x1e5   : > { %v6554_v55 = vpack.i.bf16 %v1779_v18, %v1778_v19 }
 0x1e6   : > { %v8566_v15 = vpop.permute.xlu1 %1131  ;;  %v8580_v52 = vpop.permute.xlu0 %1128  ;;  %6253 = vmatprep.mubr.msk.bf16.mxu1 %vm337_vm0, %v3023_v36 }
 0x1e7   : > { %6425 = vrot.lane.b32.xlu1 %v6424_v53, %s7575_s21  ;;  %6440 = vrot.lane.b32.xlu0 %v8182_v44, %s7578_s23  ;;  %v8599_v44 = vld [vmem:[#allocation2 + $0x67] sm:$0xff] }
 0x1e8   : > { %10605 = vst [vmem:[#allocation65_spill] sm:$0xff] %v8599_v44  ;;  %v6454_v41 = vpack.i.bf16 %v8601_v8, %v8599_v44  ;;  %v3038_v44 = vpack.c.bf16 %v2036_v63, %v2035_v34 }
 0x1ea   : > { %v8586_v57 = vpop.permute.xlu1 %1134  ;;  %v8597_v43 = vpop.permute.xlu0 %1137 }
 0x1eb   : > { %6435 = vrot.lane.b32.xlu1 %v6434_v5, %s7577_s17  ;;  %6450 = vrot.lane.b32.xlu0 %v6449_v48, %s7575_s21 }
 0x1ee   : > { %v8604_v11 = vpop.permute.xlu1 %1140  ;;  %v8618_v50 = vpop.permute.xlu0 %1143 }
 0x1ef   : > { %6445 = vrot.lane.b32.xlu1 %v6444_v45, %s7578_s23  ;;  %6460 = vrot.lane.b32.xlu0 %v6424_v53, %s7577_s17 }
 0x1f2   : > { %v8621_v17 = vpop.permute.xlu1 %1146  ;;  %v8633_v49 = vpop.permute.xlu0 %1149 }
 0x1f3   : > { %6455 = vrot.lane.b32.xlu1 %v6454_v41, %s7577_s17  ;;  %6470 = vrot.lane.b32.xlu0 %v6429_v20, %s7578_s23 }
 0x1f6   : > { %v8636_v26 = vpop.permute.xlu1 %1152  ;;  %v8641_v24 = vpop.permute.xlu0 %1155 }
 0x1f7   : > { %6465 = vrot.lane.b32.xlu1 %v8130_v62, %s7578_s23  ;;  %6480 = vrot.lane.b32.xlu0 %v6479_v30, %s7577_s17  ;;  %v10607_v62 = vld [vmem:[#allocation42_spill] sm:$0xff] }
 0x1fa   : > { %v8644_v10 = vpop.permute.xlu1 %1158  ;;  %v8648_v20 = vpop.permute.xlu0 %1161 }
 0x1fb   : > { %6475 = vrot.lane.b32.xlu1 %v6474_v28, %s7575_s21  ;;  %6490 = vrot.lane.b32.xlu0 %v10607_v62, %s7578_s23 }
 0x1fe   : > { %v8652_v61 = vpop.permute.xlu1 %1164  ;;  %v8655_v53 = vpop.permute.xlu0 %1167 }
 0x1ff   : > { %6485 = vrot.lane.b32.xlu1 %v6449_v48, %s7577_s17  ;;  %6500 = vrot.lane.b32.xlu0 %v6499_v12, %s7575_s21  ;;  %v1933_v48 = vld [vmem:[#allocation2 + $0xb1] sm:$0xff] }
 0x200   : > { %v3026_v4 = vpack.c.bf16 %v1933_v48, %v1932_v9  ;;  %v6524_v37 = vpack.i.bf16 %v1933_v48, %v1932_v9  ;;  %v1937_v48 = vld [vmem:[#allocation2 + $0xf1] sm:$0xff] }
 0x202   : > { %v8658_v13 = vpop.permute.xlu1 %1170  ;;  %v8661_v5 = vpop.permute.xlu0 %1173  ;;  %6254 = vmatmul.mubr.msk.bf16.gmra.mrb[4].mxu1 %vm337_vm0, %v3026_v4 }
 0x203   : > { %6495 = vrot.lane.b32.xlu1 %v6454_v41, %s7578_s23  ;;  %6510 = vrot.lane.b32.xlu0 %v6474_v28, %s7577_s17  ;;  %v6529_v41 = vpack.i.bf16 %v1777_v46, %v1776_v47  ;;  %v6549_v28 = vpack.i.bf16 %v1935_v42, %v1934_v27  ;;  %v1780_v47 = vld [vmem:[#allocation2 + $0x107] sm:$0xff]  ;;  %v1781_v46 = vld [vmem:[#allocation2 + $0x10f] sm:$0xff] }
 0x204   : > { %v2030_v27 = vld [vmem:[#allocation2 + $0xd1] sm:$0xff] }
 0x206   : > { %v8664_v40 = vpop.permute.xlu1 %1176  ;;  %v8667_v45 = vpop.permute.xlu0 %1179 }
 0x207   : > { %6505 = vrot.lane.b32.xlu1 %v6504_v14, %s7577_s17  ;;  %6520 = vrot.lane.b32.xlu0 %v6479_v30, %s7578_s23  ;;  %v10609_v30 = vld [vmem:[#allocation43_spill] sm:$0xff] }
 0x20a   : > { %v8670_v38 = vpop.permute.xlu1 %1182  ;;  %v8675_v33 = vpop.permute.xlu0 %1185 }
 0x20b   : > { %6515 = vrot.lane.b32.xlu1 %v10608_v31, %s7578_s23  ;;  %6530 = vrot.lane.b32.xlu0 %v6529_v41, %s7577_s17  ;;  %v2029_v31 = vld [vmem:[#allocation2 + $0xc9] sm:$0xff] }
 0x20c   : > { %v3029_v19 = vpack.c.bf16 %v2030_v27, %v2029_v31  ;;  %v1782_v27 = vld [vmem:[#allocation2 + $0x127] sm:$0xff] }
 0x20e   : > { %v8679_v35 = vpop.permute.xlu1 %1188  ;;  %v8682_v3 = vpop.permute.xlu0 %1191  ;;  %6257 = vmatprep.mubr.msk.bf16.mxu1 %vm337_vm0, %v3029_v19  ;;  %v1783_v19 = vld [vmem:[#allocation2 + $0x12f] sm:$0xff] }
 0x20f   : > { %6525 = vrot.lane.b32.xlu1 %v6524_v37, %s7575_s21  ;;  %6540 = vrot.lane.b32.xlu0 %v10609_v30, %s7578_s23  ;;  %v6604_v7 = vpack.i.bf16 %v1783_v19, %v1782_v27  ;;  %v2033_v27 = vld [vmem:[#allocation2 + $0x109] sm:$0xff]  ;;  %v2034_v19 = vld [vmem:[#allocation2 + $0x111] sm:$0xff] }
 0x210   : > { %v3035_v32 = vpack.c.bf16 %v2034_v19, %v2033_v27  ;;  %v10616_v27 = vlaneseq }
 0x212   : > { %v8686_v21 = vpop.permute.xlu1 %1194  ;;  %v8689_v60 = vpop.permute.xlu0 %1197  ;;  %v8760_v19 = vand.u32 127, %v10616_v27 }
 0x213   : > { %6535 = vrot.lane.b32.xlu1 %v6499_v12, %s7577_s17  ;;  %6550 = vrot.lane.b32.xlu0 %v6549_v28, %s7575_s21  ;;  %v1936_v12 = vld [vmem:[#allocation2 + $0xe9] sm:$0xff] }
 0x214   : > { %v3032_v42 = vpack.c.bf16 %v1937_v48, %v1936_v12  ;;  %v6574_v30 = vpack.i.bf16 %v1937_v48, %v1936_v12  ;;  %10617 = vst [vmem:[#allocation43_spill] sm:$0xff] %v8760_v19 }
 0x216   : > { %v8692_v62 = vpop.permute.xlu1 %1200  ;;  %v8695_v16 = vpop.permute.xlu0 %1203  ;;  %6258 = vmatmul.mubr.msk.bf16.gmra.mrb[8].mxu1 %vm337_vm0, %v3032_v42 }
 0x217   : > { %6545 = vrot.lane.b32.xlu1 %v6504_v14, %s7578_s23  ;;  %6560 = vrot.lane.b32.xlu0 %v6524_v37, %s7577_s17  ;;  %v6579_v14 = vpack.i.bf16 %v1781_v46, %v1780_v47  ;;  %v10610_v37 = vld [vmem:[#allocation40_spill] sm:$0xff] }
 0x218   : > { %v1939_v47 = vld [vmem:[#allocation2 + $0x111] sm:$0xff]  ;;  %6261 = vmatprep.mubr.msk.bf16.mxu1 %vm337_vm0, %v3035_v32  ;;  %v1975_v32 = vld [vmem:[#allocation2 + $0x167] sm:$0xff] }
 0x21a   : > { %v8698_v9 = vpop.permute.xlu1 %1206  ;;  %v8701_v36 = vpop.permute.xlu0 %1209 }
 0x21b   : > { %6555 = vrot.lane.b32.xlu1 %v6554_v55, %s7577_s17  ;;  %6570 = vrot.lane.b32.xlu0 %v6529_v41, %s7578_s23  ;;  %v1938_v41 = vld [vmem:[#allocation2 + $0x109] sm:$0xff] }
 0x21c   : > { %v6599_v48 = vpack.i.bf16 %v1939_v47, %v1938_v41  ;;  %v1941_v41 = vld [vmem:[#allocation2 + $0x131] sm:$0xff]  ;;  %v1784_v47 = vld [vmem:[#allocation2 + $0x147] sm:$0xff] }
 0x21e   : > { %v8704_v4 = vpop.permute.xlu1 %1212  ;;  %v8708_v18 = vpop.permute.xlu0 %1215  ;;  %6262 = vmatmul.mubr.msk.bf16.gmra.mrb[12].mxu1 %vm337_vm0, %v3038_v44 }
 0x21f   : > { %6565 = vrot.lane.b32.xlu1 %v10610_v37, %s7578_s23  ;;  %10611 = vst [vmem:[#allocation42_spill] sm:$0xff] %v8708_v18  ;;  %6580 = vrot.lane.b32.xlu0 %v6579_v14, %s7577_s17  ;;  %v10612_v37 = vld [vmem:[#allocation44_spill] sm:$0xff] }
 0x222   : > { %v8712_v59 = vpop.permute.xlu1 %1218  ;;  %v8716_v46 = vpop.permute.xlu0 %1221 }
 0x223   : > { %6575 = vrot.lane.b32.xlu1 %v6574_v30, %s7575_s21  ;;  %6590 = vrot.lane.b32.xlu0 %v10612_v37, %s7578_s23 }
 0x226   : > { %v8720_v12 = vpop.permute.xlu1 %1224  ;;  %v8723_v31 = vpop.permute.xlu0 %1227 }
 0x227   : > { %6585 = vrot.lane.b32.xlu1 %v6549_v28, %s7577_s17  ;;  %6600 = vrot.lane.b32.xlu0 %v6599_v48, %s7575_s21  ;;  %v1940_v28 = vld [vmem:[#allocation2 + $0x129] sm:$0xff] }
 0x22a   : > { %v8726_v42 = vpop.permute.xlu1 %1230  ;;  %v8729_v0 = vpop.permute.xlu0 %1233 }
 0x22b   : > { %6595 = vrot.lane.b32.xlu1 %v6554_v55, %s7578_s23  ;;  %6610 = vrot.lane.b32.xlu0 %v6574_v30, %s7577_s17  ;;  %v6629_v55 = vpack.i.bf16 %v1785_v6, %v1784_v47  ;;  %v6624_v30 = vpack.i.bf16 %v1941_v41, %v1940_v28  ;;  %v1942_v6 = vld [vmem:[#allocation2 + $0x149] sm:$0xff]  ;;  %v1943_v47 = vld [vmem:[#allocation2 + $0x151] sm:$0xff] }
 0x22c   : > { %v10614_v28 = vld [vmem:[#allocation45_spill] sm:$0xff]  ;;  %v8756_v63 = vpack.i.bf16 %v1943_v47, %v1942_v6  ;;  %v1976_v41 = vld [vmem:[#allocation2 + $0x16f] sm:$0xff] }
 0x22d   : > { %v8770_v6 = vpack.i.bf16 %v1976_v41, %v1975_v32  ;;  %v2007_v47 = vld [vmem:[#allocation2 + $0x168] sm:$0xff]  ;;  %v8786_v32 = vsub.s32 %v8760_v19, %v10619_v58 }
 0x22e   : > { %v8732_v37 = vpop.permute.xlu1 %1236  ;;  %v8735_v23 = vpop.permute.xlu0 %1239  ;;  %10615 = vst [vmem:[#allocation39_spill] sm:$0xff] %v8756_v63 }
 0x22f   : > { %6605 = vrot.lane.b32.xlu1 %v6604_v7, %s7577_s17  ;;  %6620 = vrot.lane.b32.xlu0 %v6579_v14, %s7578_s23  ;;  %10618 = vst [vmem:[#allocation40_spill] sm:$0xff] %v8770_v6 }
 0x232   : > { %v8738_v2 = vpop.permute.xlu1 %1242  ;;  %v8742_v8 = vpop.permute.xlu0 %1245 }
 0x233   : > { %6615 = vrot.lane.b32.xlu1 %v10613_v29, %s7578_s23  ;;  %6630 = vrot.lane.b32.xlu0 %v6629_v55, %s7577_s17 }
 0x236   : > { %v8746_v14 = vpop.permute.xlu1 %1248  ;;  %v8750_v29 = vpop.permute.xlu0 %1251 }
 0x237   : > { %6625 = vrot.lane.b32.xlu1 %v6624_v30, %s7575_s21  ;;  %6640 = vrot.lane.b32.xlu0 %v10614_v28, %s7578_s23  ;;  %v1322_v28 = vadd.s32 4294967288, %v8760_v19  ;;  %v2038_v19 = vld [vmem:[#allocation2 + $0x151] sm:$0xff] }
 0x239   : > { %v8778_v39 = vsub.s32 %v1322_v28, %v10619_v58  ;;  %v2037_v58 = vld [vmem:[#allocation2 + $0x149] sm:$0xff] }
 0x23a   : > { %v8754_v34 = vpop.permute.xlu1 %1254  ;;  %v8762_v44 = vpop.permute.xlu0 %1257 }
 0x23b   : > { %6635 = vrot.lane.b32.xlu1 %v6599_v48, %s7577_s17  ;;  %6650 = vrot.lane.b32.xlu0 %v8756_v63, %s7575_s21  ;;  %v2008_v48 = vld [vmem:[#allocation2 + $0x170] sm:$0xff]  ;;  %v1345_v28 = vrot.slane %v8604_v11, %v8778_v39  ;;  %v1354_v1 = vrot.slane %v8621_v17, %v8778_v39  ;;  %v3041_v11 = vpack.c.bf16 %v2038_v19, %v2037_v58 }
 0x23c   : > { %v8782_v63 = vpack.i.bf16 %v2008_v48, %v2007_v47  ;;  %v1350_v17 = vrot.slane %v8618_v50, %v8786_v32  ;;  %v1372_v58 = vrot.slane %v8644_v10, %v8778_v39 }
 0x23d   : > { %6265 = vmatprep.mubr.msk.bf16.mxu1 %vm337_vm0, %v3041_v11 }
 0x23e   : > { %v8766_v25 = vpop.permute.xlu1 %1260  ;;  %v8772_v22 = vpop.permute.xlu0 %1263  ;;  %v1355_v10 = vsel %vm1327_vm2, %v1354_v1, %v1350_v17  ;;  %v1417_v17 = vrot.slane %v8679_v35, %v8778_v39 }
 0x23f   : > { %6645 = vrot.lane.b32.xlu1 %v6604_v7, %s7578_s23  ;;  %6660 = vrot.lane.b32.xlu0 %v6624_v30, %s7577_s17  ;;  %v1945_v7 = vld [vmem:[#allocation2 + $0x171] sm:$0xff]  ;;  %v1336_v30 = vrot.slane %v8586_v57, %v8778_v39  ;;  %v1326_v57 = vrot.slane %v8580_v52, %v8778_v39  ;;  %v1321_v52 = vrot.slane %v8540_v56, %v8786_v32 }
 0x240   : > { %v8797_v48 = vpack.i.bf16 %v1945_v7, %v1944_v51  ;;  %v1341_v51 = vrot.slane %v8597_v43, %v8786_v32  ;;  %v1363_v7 = vrot.slane %v8636_v26, %v8778_v39  ;;  %v1381_v56 = vrot.slane %v8652_v61, %v8778_v39 }
 0x241   : > { %v1328_v50 = vsel %vm1327_vm2, %v1326_v57, %v1321_v52  ;;  %v1408_v57 = vrot.slane %v8670_v38, %v8778_v39  ;;  %v1404_v38 = vrot.slane %v8667_v45, %v8786_v32  ;;  %v1426_v45 = vrot.slane %v8686_v21, %v8778_v39 }
 0x242   : > { %v8775_v27 = vpop.permute.xlu1 %1266  ;;  %v8790_v41 = vpop.permute.xlu0 %1269  ;;  %v1346_v43 = vsel %vm1327_vm2, %v1345_v28, %v1341_v51  ;;  %v1377_v28 = vrot.slane %v8648_v20, %v8786_v32  ;;  %v1399_v20 = vrot.slane %v8664_v40, %v8778_v39  ;;  %v1422_v21 = vrot.slane %v8682_v3, %v8786_v32 }
 0x243   : > { %6655 = vrot.lane.b32.xlu1 %v8770_v6, %s7577_s17  ;;  %6670 = vrot.lane.b32.xlu0 %v6629_v55, %s7578_s23  ;;  %v1332_v6 = vrot.slane %v8566_v15, %v8786_v32  ;;  %v2039_v55 = vld [vmem:[#allocation2 + $0x169] sm:$0xff]  ;;  %v1409_v52 = vsel %vm1327_vm2, %v1408_v57, %v1404_v38  ;;  %v1431_v3 = vrot.slane %v8689_v60, %v8786_v32 }
 0x244   : > { %v3044_v15 = vpack.c.bf16 %v2040_v54, %v2039_v55  ;;  %v1359_v54 = vrot.slane %v8633_v49, %v8786_v32  ;;  %v1382_v55 = vsel %vm1327_vm2, %v1381_v56, %v1377_v28  ;;  %v1480_v56 = vrot.slane %v8726_v42, %v8778_v39 }
 0x245   : > { %v1337_v18 = vsel %vm1327_vm2, %v1336_v30, %v1332_v6  ;;  %v1368_v6 = vrot.slane %v8641_v24, %v8786_v32  ;;  %v1390_v30 = vrot.slane %v8658_v13, %v8778_v39  ;;  %v1386_v13 = vrot.slane %v8655_v53, %v8786_v32 }
 0x246   : > { %v8795_v47 = vpop.permute.xlu1 %1272  ;;  %v8818_v19 = vpop.permute.xlu0 %1275  ;;  %6266 = vmatmul.mubr.msk.bf16.gmra.mrb[16].mxu1 %vm337_vm0, %v3044_v15  ;;  %v1609_v49 = vsel %vm1608_vm3, %v1337_v18, %v1328_v50  ;;  %v1364_v61 = vsel %vm1327_vm2, %v1363_v7, %v1359_v54  ;;  %v1395_v53 = vrot.slane %v8661_v5, %v8786_v32  ;;  %v1413_v5 = vrot.slane %v8675_v33, %v8786_v32 }
 0x247   : > { %6665 = vrot.lane.b32.xlu1 %v8782_v63, %s7578_s23  ;;  %v1611_v1 = vsel %vm1610_vm4, %v1346_v43, %v1609_v49  ;;  %v1373_v24 = vsel %vm1327_vm2, %v1372_v58, %v1368_v6  ;;  %v1391_v15 = vsel %vm1327_vm2, %v1390_v30, %v1386_v13  ;;  %v1435_v6 = vrot.slane %v8692_v62, %v8778_v39 }
 0x248   : > { %v1613_v18 = vsel %vm1612_vm5, %v1355_v10, %v1611_v1  ;;  %v1400_v54 = vsel %vm1327_vm2, %v1399_v20, %v1395_v53  ;;  %v1489_v30 = vrot.slane %v8732_v37, %v8778_v39  ;;  %v1418_v33 = vsel %vm1327_vm2, %v1417_v17, %v1413_v5 }
 0x249   : > { %v1615_v7 = vsel %vm1614_vm6, %v1364_v61, %v1613_v18  ;;  %v1622_v10 = vsel %vm1608_vm3, %v1409_v52, %v1400_v54  ;;  %v1471_v42 = vrot.slane %v8720_v12, %v8778_v39  ;;  %v1476_v49 = vrot.slane %v8723_v31, %v8786_v32 }
 0x24a   : > { %v8826_v26 = vpop.permute.xlu1 %1278  ;;  %v8847_v11 = vpop.permute.xlu0 %1281  ;;  %v1617_v40 = vsel %vm1616_vm7, %v1373_v24, %v1615_v7  ;;  %v1498_v61 = vrot.slane %v8738_v2, %v8778_v39  ;;  %v1427_v28 = vsel %vm1327_vm2, %v1426_v45, %v1422_v21  ;;  %v1485_v62 = vrot.slane %v8729_v0, %v8786_v32 }
 0x24b   : > { %6675 = vrot.lane.b32.xlu1 %v8797_v48, %s7575_s21  ;;  %v1619_v43 = vsel %vm1618_vm8, %v1382_v55, %v1617_v40  ;;  %v1507_v37 = vrot.slane %v8746_v14, %v8778_v39  ;;  %v1444_v12 = vrot.slane %v8698_v9, %v8778_v39  ;;  %v1467_v31 = vrot.slane %v8716_v46, %v8786_v32 }
 0x24c   : > { %v1621_v35 = vsel %vm1620_vm9, %v1391_v15, %v1619_v43  ;;  %v1481_v2 = vsel %vm1327_vm2, %v1480_v56, %v1476_v49  ;;  %v1494_v1 = vrot.slane %v8735_v23, %v8786_v32  ;;  %v1436_v60 = vsel %vm1327_vm2, %v1435_v6, %v1431_v3 }
 0x24d   : > { %v1490_v0 = vsel %vm1327_vm2, %v1489_v30, %v1485_v62  ;;  %v1503_v14 = vrot.slane %v8742_v8, %v8786_v32  ;;  %v1516_v13 = vrot.slane %v8754_v34, %v8778_v39  ;;  %v1623_v9 = vsel %vm1610_vm4, %v1418_v33, %v1622_v10 }
 0x24e   : > { %v8855_v51 = vpop.permute.xlu1 %1284  ;;  %v8867_v58 = vpop.permute.xlu0 %1287  ;;  %v1440_v46 = vrot.slane %v8695_v16, %v8786_v32  ;;  %v1472_v18 = vsel %vm1327_vm2, %v1471_v42, %v1467_v31  ;;  %v1499_v23 = vsel %vm1327_vm2, %v1498_v61, %v1494_v1  ;;  %v1624_v55 = vsel %vm1612_vm5, %v1427_v28, %v1623_v9 }
 0x24f   : > { %v1629_v20 = vsel %vm1608_vm3, %v1481_v2, %v1472_v18  ;;  %v1508_v38 = vsel %vm1327_vm2, %v1507_v37, %v1503_v14  ;;  %v1512_v8 = vrot.slane %v8750_v29, %v8786_v32  ;;  %v1625_v34 = vsel %vm1614_vm6, %v1436_v60, %v1624_v55 }
 0x250   : > { %v1445_v15 = vsel %vm1327_vm2, %v1444_v12, %v1440_v46  ;;  %v1630_v16 = vsel %vm1610_vm4, %v1490_v0, %v1629_v20  ;;  %v1648_v52 = vsel %vm1647_vm10, %v1621_v35, 0.0  ;;  %v1453_v17 = vrot.slane %v8704_v4, %v8778_v39 }
 0x251   : > { %v1631_v40 = vsel %vm1612_vm5, %v1499_v23, %v1630_v16  ;;  %v1517_v45 = vsel %vm1327_vm2, %v1516_v13, %v1512_v8  ;;  %v1552_v29 = vrot.slane %v8826_v26, %v8778_v39  ;;  %v1462_v43 = vrot.slane %v8712_v59, %v8778_v39  ;;  %v10620_v13 = vld [vmem:[#allocation42_spill] sm:$0xff]  ;;  %v1892_v8 = vld [vmem:[#allocation2 + $0x28] sm:$0xff] }
 0x252   : > { %v8875_v50 = vpop.permute.xlu1 %1290  ;;  %v1294_v57 = vpop.permute.xlu0 %1293  ;;  %v1632_v54 = vsel %vm1614_vm6, %v1508_v38, %v1631_v40  ;;  %v1521_v5 = vrot.slane %v8762_v44, %v8786_v32  ;;  %v1561_v56 = vrot.slane %v8855_v51, %v8778_v39  ;;  %v1525_v4 = vrot.slane %v8766_v25, %v8778_v39 }
 0x253   : > { %v1543_v35 = vrot.slane %v8795_v47, %v8778_v39  ;;  %v1548_v26 = vrot.slane %v8818_v19, %v8786_v32  ;;  %v1570_v59 = vrot.slane %v8875_v50, %v8778_v39  ;;  %v1534_v21 = vrot.slane %v8775_v27, %v8778_v39 }
 0x254   : > { %v1557_v44 = vrot.slane %v8847_v11, %v8786_v32  ;;  %v1633_v25 = vsel %vm1616_vm7, %v1517_v45, %v1632_v54  ;;  %v1539_v47 = vrot.slane %v8790_v41, %v8786_v32  ;;  %v1566_v50 = vrot.slane %v8867_v58, %v8786_v32 }
 0x255   : > { %v1553_v19 = vsel %vm1327_vm2, %v1552_v29, %v1548_v26  ;;  %v1530_v27 = vrot.slane %v8772_v22, %v8786_v32  ;;  %v1575_v33 = vrot.slane %v1294_v57, %v8786_v32  ;;  %v1526_v49 = vsel %vm1327_vm2, %v1525_v4, %v1521_v5 }
 0x256   : > { %v1297_v24 = vpop.permute.xlu1 %1296  ;;  %v1300_v7 = vpop.permute.xlu0 %1299  ;;  %v1562_v11 = vsel %vm1327_vm2, %v1561_v56, %v1557_v44  ;;  %v1544_v41 = vsel %vm1327_vm2, %v1543_v35, %v1539_v47  ;;  %v1571_v61 = vsel %vm1327_vm2, %v1570_v59, %v1566_v50  ;;  %v1634_v14 = vsel %vm1618_vm8, %v1526_v49, %v1633_v25  ;;  %v1764_v47 = vld [vmem:[#allocation2 + $0x7] sm:$0xff] }
 0x257   : > { %v1579_v51 = vrot.slane %v1297_v24, %v8778_v39  ;;  %v1584_v28 = vrot.slane %v1300_v7, %v8786_v32  ;;  %v1636_v3 = vsel %vm1608_vm3, %v1553_v19, %v1544_v41  ;;  %v1535_v57 = vsel %vm1327_vm2, %v1534_v21, %v1530_v27  ;;  %v1893_v7 = vld [vmem:[#allocation2 + $0x30] sm:$0xff]  ;;  %v10621_v21 = vld [vmem:[#allocation47_spill] sm:$0xff] }
 0x258   : > { %v1637_v12 = vsel %vm1610_vm4, %v1562_v11, %v1636_v3  ;;  %v1449_v24 = vrot.slane %v8701_v36, %v8786_v32  ;;  %v1458_v9 = vrot.slane %v10620_v13, %v8786_v32  ;;  %v1635_v23 = vsel %vm1620_vm9, %v1535_v57, %v1634_v14  ;;  %v1765_v19 = vld [vmem:[#allocation2 + $0xf] sm:$0xff] }
 0x259   : > { %v1580_v62 = vsel %vm1327_vm2, %v1579_v51, %v1575_v33  ;;  %v1638_v60 = vsel %vm1612_vm5, %v1571_v61, %v1637_v12  ;;  %v1626_v16 = vsel %vm1616_vm7, %v1445_v15, %v1625_v34  ;;  %v1654_v5 = vsel %vm1647_vm10, %v1635_v23, 0.0  ;;  %v1894_v13 = vld [vmem:[#allocation2 + $0x48] sm:$0xff] }
 0x25a   : > { %v1303_v53 = vpop.permute.xlu1 %1302  ;;  %v1306_v10 = vpop.permute.xlu0 %1305  ;;  %v1639_v46 = vsel %vm1614_vm6, %v1580_v62, %v1638_v60  ;;  %v1454_v20 = vsel %vm1327_vm2, %v1453_v17, %v1449_v24  ;;  %v6371_v44 = vunpack.i.h.bf16 %v10621_v21  ;;  %v6370_v51 = vunpack.i.l.bf16 %v10621_v21 }
 0x25b   : > { %v1588_v30 = vrot.slane %v1303_v53, %v8778_v39  ;;  %v1593_v22 = vrot.slane %v1306_v10, %v8786_v32  ;;  %v1627_v34 = vsel %vm1618_vm8, %v1454_v20, %v1626_v16  ;;  %v10623_v20 = vld [vmem:[#allocation64_spill] sm:$0xff] }
 0x25c   : > { %v2821_v61 = vsel %vm337_vm0, %v1764_v47, %v6370_v51 }
 0x25d   : > { %v1589_v31 = vsel %vm1327_vm2, %v1588_v30, %v1584_v28  ;;  %v2822_v28 = vsel %vm337_vm0, %v1765_v19, %v6371_v44 }
 0x25e   : > { %v1309_v6 = vpop.permute.xlu1 %1308  ;;  %v1312_v58 = vpop.permute.xlu0 %1311  ;;  %v1640_v38 = vsel %vm1616_vm7, %v1589_v31, %v1639_v46 }
 0x25f   : > { %v1597_v42 = vrot.slane %v1309_v6, %v8778_v39  ;;  %v1602_v2 = vrot.slane %v1312_v58, %v8786_v32 }
 0x261   : > { %v1598_v0 = vsel %vm1327_vm2, %v1597_v42, %v1593_v22 }
 0x262   : > { %v1315_v37 = vpop.permute.xlu1 %1314  ;;  %1649 = vadd.xlane.f32.xlu0 %v1648_v52  ;;  %v6431_v18 = vpop.permute.xlu0 %6430  ;;  %v1641_v45 = vsel %vm1618_vm8, %v1598_v0, %v1640_v38  ;;  %v1463_v52 = vsel %vm1327_vm2, %v1462_v43, %v1458_v9  ;;  %v1895_v9 = vld [vmem:[#allocation2 + $0x50] sm:$0xff]  ;;  %v10624_v38 = vld [vmem:[#allocation63_spill] sm:$0xff] }
 0x263   : > { %v1606_v1 = vrot.slane %v1315_v37, %v8778_v39  ;;  %v6433_v29 = vunpack.i.h.bf16 %v6431_v18  ;;  %v6432_v54 = vunpack.i.l.bf16 %v6431_v18  ;;  %v1628_v25 = vsel %vm1620_vm9, %v1463_v52, %v1627_v34  ;;  %v10622_v37 = vld [vmem:[#allocation51_spill] sm:$0xff] }
 0x264   : > { %v1651_v41 = vsel %vm1647_vm10, %v1628_v25, 0.0  ;;  %v6376_v57 = vunpack.i.h.bf16 %v10622_v37  ;;  %v6375_v12 = vunpack.i.l.bf16 %v10622_v37 }
 0x265   : > { %v1607_v55 = vsel %vm1327_vm2, %v1606_v1, %v1602_v2 }
 0x266   : > { %v6426_v36 = vpop.permute.xlu1 %6425  ;;  %v1642_v17 = vsel %vm1620_vm9, %v1607_v55, %v1641_v45  ;;  %1655 = vadd.xlane.f32.xlu0 %v1654_v5  ;;  %v6441_v56 = vpop.permute.xlu0 %6440 }
 0x267   : > { %v6428_v53 = vunpack.i.h.bf16 %v6426_v36  ;;  %v6427_v40 = vunpack.i.l.bf16 %v6426_v36  ;;  %v6443_v15 = vunpack.i.h.bf16 %v6441_v56  ;;  %v6442_v26 = vunpack.i.l.bf16 %v6441_v56 }
 0x268   : > { %v1657_v6 = vsel %vm1647_vm10, %v1642_v17, 0.0  ;;  %v2823_v36 = vsel %vm337_vm0, %v10623_v20, %v6375_v12 }
 0x269   : > { %v2919_v4 = vsel %vm337_vm0, %v1892_v8, %v6427_v40  ;;  %v2920_v35 = vsel %vm337_vm0, %v1893_v7, %v6428_v53  ;;  %v2824_v8 = vsel %vm337_vm0, %v10624_v38, %v6376_v57 }
 0x26a   : > { %v6436_v59 = vpop.permute.xlu1 %6435  ;;  %v2951_v43 = vsel %vm2853_vm11, %v2919_v4, %v6432_v54  ;;  %v2952_v10 = vsel %vm2853_vm11, %v2920_v35, %v6433_v29  ;;  %1658 = vadd.xlane.f32.xlu0 %v1657_v6  ;;  %v6451_v33 = vpop.permute.xlu0 %6450 }
 0x26b   : > { %v6438_v50 = vunpack.i.h.bf16 %v6436_v59  ;;  %v6437_v30 = vunpack.i.l.bf16 %v6436_v59  ;;  %v2983_v27 = vsel %vm2886_vm12, %v2951_v43, %v6442_v26  ;;  %v2984_v11 = vsel %vm2886_vm12, %v2952_v10, %v6443_v15  ;;  %v1896_v43 = vld [vmem:[#allocation2 + $0x68] sm:$0xff]  ;;  %v1897_v10 = vld [vmem:[#allocation2 + $0x70] sm:$0xff] }
 0x26c   : > { %v3016_v42 = vpack.c.bf16 %v2984_v11, %v2983_v27  ;;  %v6453_v24 = vunpack.i.h.bf16 %v6451_v33  ;;  %v6452_v60 = vunpack.i.l.bf16 %v6451_v33  ;;  %v10625_v27 = vld [vmem:[#allocation53_spill] sm:$0xff] }
 0x26d   : > { %v2854_v62 = vsel %vm2853_vm11, %v2821_v61, %v6437_v30  ;;  %v2855_v22 = vsel %vm2853_vm11, %v2822_v28, %v6438_v50  ;;  %v9027_v50 = vld [vmem:[#allocation2 + $0x187] sm:$0xff]  ;;  %v9029_v30 = vld [vmem:[#allocation2 + $0x18f] sm:$0xff]  ;;  %v6381_v11 = vunpack.i.h.bf16 %v10625_v27 }
 0x26e   : > { %v6446_v49 = vpop.permute.xlu1 %6445  ;;  %3287 = vmatprep.mubr.bf16.mxu0 %v3016_v42  ;;  %v6461_v31 = vpop.permute.xlu0 %6460  ;;  %v2922_v16 = vsel %vm337_vm0, %v1895_v9, %v6453_v24  ;;  %v2921_v53 = vsel %vm337_vm0, %v1894_v13, %v6452_v60  ;;  %v10626_v24 = vld [vmem:[#allocation39_spill] sm:$0xff] }
 0x26f   : > { %v6448_v58 = vunpack.i.h.bf16 %v6446_v49  ;;  %v6447_v3 = vunpack.i.l.bf16 %v6446_v49  ;;  %1652 = vadd.xlane.f32.xlu1 %v1651_v41  ;;  %v6463_v46 = vunpack.i.h.bf16 %v6461_v31  ;;  %v6462_v18 = vunpack.i.l.bf16 %v6461_v31 }
 0x271   : > { %v2887_v2 = vsel %vm2886_vm12, %v2854_v62, %v6447_v3  ;;  %v2888_v1 = vsel %vm2886_vm12, %v2855_v22, %v6448_v58  ;;  %v2856_v5 = vsel %vm2853_vm11, %v2823_v36, %v6462_v18  ;;  %v2857_v17 = vsel %vm2853_vm11, %v2824_v8, %v6463_v46  ;;  %v10628_v46 = vld [vmem:[#allocation60_spill] sm:$0xff] }
 0x272   : > { %v6456_v0 = vpop.permute.xlu1 %6455  ;;  %v3015_v14 = vpack.c.bf16 %v2888_v1, %v2887_v2  ;;  %v6471_v7 = vpop.permute.xlu0 %6470  ;;  %v6380_v62 = vunpack.i.l.bf16 %v10625_v27  ;;  %v9039_v22 = vpack.i.bf16 %v9029_v30, %v9027_v50  ;;  %v9043_v2 = vld [vmem:[#allocation2 + $0x188] sm:$0xff]  ;;  %v9045_v1 = vld [vmem:[#allocation2 + $0x190] sm:$0xff] }
 0x273   : > { %v6458_v23 = vunpack.i.h.bf16 %v6456_v0  ;;  %v6457_v55 = vunpack.i.l.bf16 %v6456_v0  ;;  %v6473_v40 = vunpack.i.h.bf16 %v6471_v7  ;;  %v6472_v45 = vunpack.i.l.bf16 %v6471_v7  ;;  %v10629_v36 = vld [vmem:[#allocation52_spill] sm:$0xff] }
 0x274   : > { %3288 = vmatmul.mubr.bf16.vlgmr.msra.gmra.mrb[0].mxu0 %v3015_v14  ;;  %v10627_v14 = vld [vmem:[#allocation61_spill] sm:$0xff]  ;;  %v2825_v18 = vsel %vm337_vm0, %v10628_v46, %v6380_v62  ;;  %v9057_v20 = vpack.i.bf16 %v9045_v1, %v9043_v2  ;;  %v6386_v38 = vunpack.i.h.bf16 %v10629_v36  ;;  %v6385_v8 = vunpack.i.l.bf16 %v10629_v36 }
 0x275   : > { %v2953_v56 = vsel %vm2853_vm11, %v2921_v53, %v6457_v55  ;;  %v2954_v4 = vsel %vm2853_vm11, %v2922_v16, %v6458_v23  ;;  %v2889_v35 = vsel %vm2886_vm12, %v2856_v5, %v6472_v45  ;;  %v2890_v34 = vsel %vm2886_vm12, %v2857_v17, %v6473_v40  ;;  %v1946_v53 = vld [vmem:[#allocation2 + $0x189] sm:$0xff]  ;;  %v1947_v40 = vld [vmem:[#allocation2 + $0x191] sm:$0xff] }
 0x276   : > { %v6466_v52 = vpop.permute.xlu1 %6465  ;;  %v6481_v15 = vpop.permute.xlu0 %6480  ;;  %v3018_v25 = vpack.c.bf16 %v2890_v34, %v2889_v35  ;;  %v2826_v13 = vsel %vm337_vm0, %v10627_v14, %v6381_v11  ;;  %v10630_v45 = vld [vmem:[#allocation40_spill] sm:$0xff] }
 0x277   : > { %v6468_v29 = vunpack.i.h.bf16 %v6466_v52  ;;  %v6467_v54 = vunpack.i.l.bf16 %v6466_v52  ;;  %v6483_v47 = vunpack.i.h.bf16 %v6481_v15  ;;  %v6482_v19 = vunpack.i.l.bf16 %v6481_v15  ;;  %v1898_v52 = vld [vmem:[#allocation2 + $0x88] sm:$0xff]  ;;  %v9097_v14 = vld [vmem:[#allocation2 + $0x1b0] sm:$0xff] }
 0x279   : > { %v2985_v26 = vsel %vm2886_vm12, %v2953_v56, %v6467_v54  ;;  %v2986_v59 = vsel %vm2886_vm12, %v2954_v4, %v6468_v29  ;;  %v1899_v4 = vld [vmem:[#allocation2 + $0x90] sm:$0xff] }
 0x27a   : > { %v6476_v21 = vpop.permute.xlu1 %6475  ;;  %v3019_v44 = vpack.c.bf16 %v2986_v59, %v2985_v26  ;;  %v6491_v49 = vpop.permute.xlu0 %6490  ;;  %v9067_v59 = vld [vmem:[#allocation2 + $0x1a7] sm:$0xff] }
 0x27b   : > { %v6478_v51 = vunpack.i.h.bf16 %v6476_v21  ;;  %v6477_v6 = vunpack.i.l.bf16 %v6476_v21  ;;  %v6493_v41 = vunpack.i.h.bf16 %v6491_v49  ;;  %v6492_v61 = vunpack.i.l.bf16 %v6491_v49  ;;  %v10631_v21 = vld [vmem:[#allocation66_spill] sm:$0xff] }
 0x27c   : > { %3295 = vmatprep.mubr.bf16.mxu0 %v3019_v44  ;;  %v2828_v44 = vsel %vm337_vm0, %v10631_v21, %v6386_v38 }
 0x27d   : > { %v2924_v33 = vsel %vm337_vm0, %v1897_v10, %v6478_v51  ;;  %v2923_v42 = vsel %vm337_vm0, %v1896_v43, %v6477_v6  ;;  %3296 = vmatmul.mubr.bf16.gmra.mrb[4].mxu0 %v3018_v25  ;;  %v9069_v43 = vld [vmem:[#allocation2 + $0x1af] sm:$0xff]  ;;  %v9073_v10 = vpack.i.bf16 %v1947_v40, %v1946_v53  ;;  %v10632_v25 = vld [vmem:[#allocation65_spill] sm:$0xff] }
 0x27e   : > { %v6486_v28 = vpop.permute.xlu1 %6485  ;;  %v2955_v58 = vsel %vm2853_vm11, %v2923_v42, %v6482_v19  ;;  %v2956_v3 = vsel %vm2853_vm11, %v2924_v33, %v6483_v47  ;;  %v6501_v60 = vpop.permute.xlu0 %6500  ;;  %v2827_v47 = vsel %vm337_vm0, %v10632_v25, %v6385_v8  ;;  %v9085_v33 = vpack.i.bf16 %v9069_v43, %v9067_v59 }
 0x27f   : > { %v6488_v37 = vunpack.i.h.bf16 %v6486_v28  ;;  %v6487_v57 = vunpack.i.l.bf16 %v6486_v28  ;;  %v2987_v12 = vsel %vm2886_vm12, %v2955_v58, %v6492_v61  ;;  %v2988_v31 = vsel %vm2886_vm12, %v2956_v3, %v6493_v41  ;;  %v1949_v58 = vld [vmem:[#allocation2 + $0x1b1] sm:$0xff] }
 0x280   : > { %6685 = vrot.lane.b32.xlu1 %v10626_v24, %s7577_s17  ;;  %v3022_v0 = vpack.c.bf16 %v2988_v31, %v2987_v12  ;;  %6680 = vrot.lane.b32.xlu0 %v9039_v22, %s7577_s17  ;;  %v6503_v29 = vunpack.i.h.bf16 %v6501_v60  ;;  %v6502_v54 = vunpack.i.l.bf16 %v6501_v60 }
 0x281   : > { %v2858_v7 = vsel %vm2853_vm11, %v2825_v18, %v6487_v57  ;;  %v2859_v16 = vsel %vm2853_vm11, %v2826_v13, %v6488_v37  ;;  %v3047_v37 = vpack.c.bf16 %v1947_v40, %v1946_v53  ;;  %v1900_v18 = vld [vmem:[#allocation2 + $0xa8] sm:$0xff] }
 0x282   : > { %v6496_v9 = vpop.permute.xlu1 %6495  ;;  %3303 = vmatprep.mubr.bf16.mxu0 %v3022_v0  ;;  %v6511_v5 = vpop.permute.xlu0 %6510  ;;  %v2926_v19 = vsel %vm337_vm0, %v1899_v4, %v6503_v29  ;;  %v2925_v27 = vsel %vm337_vm0, %v1898_v52, %v6502_v54  ;;  %v9095_v0 = vld [vmem:[#allocation2 + $0x1a8] sm:$0xff] }
 0x283   : > { %v6498_v23 = vunpack.i.h.bf16 %v6496_v9  ;;  %v6497_v55 = vunpack.i.l.bf16 %v6496_v9  ;;  %v6513_v35 = vunpack.i.h.bf16 %v6511_v5  ;;  %v6512_v34 = vunpack.i.l.bf16 %v6511_v5  ;;  %6269 = vmatprep.mubr.msk.bf16.mxu1 %vm337_vm0, %v3047_v37  ;;  %v10633_v40 = vld [vmem:[#allocation55_spill] sm:$0xff] }
 0x284   : > { %6695 = vrot.lane.b32.xlu1 %v10630_v45, %s7578_s23  ;;  %6690 = vrot.lane.b32.xlu0 %v9057_v20, %s7578_s23  ;;  %v6391_v45 = vunpack.i.h.bf16 %v10633_v40 }
 0x285   : > { %v2891_v17 = vsel %vm2886_vm12, %v2858_v7, %v6497_v55  ;;  %v2892_v56 = vsel %vm2886_vm12, %v2859_v16, %v6498_v23  ;;  %v2860_v61 = vsel %vm2853_vm11, %v2827_v47, %v6512_v34  ;;  %v2861_v28 = vsel %vm2853_vm11, %v2828_v44, %v6513_v35  ;;  %v1901_v23 = vld [vmem:[#allocation2 + $0xb0] sm:$0xff] }
 0x286   : > { %v6506_v15 = vpop.permute.xlu1 %6505  ;;  %v3021_v26 = vpack.c.bf16 %v2892_v56, %v2891_v17  ;;  %v6521_v11 = vpop.permute.xlu0 %6520  ;;  %v6390_v34 = vunpack.i.l.bf16 %v10633_v40 }
 0x287   : > { %v6508_v51 = vunpack.i.h.bf16 %v6506_v15  ;;  %v6507_v6 = vunpack.i.l.bf16 %v6506_v15  ;;  %v6523_v42 = vunpack.i.h.bf16 %v6521_v11  ;;  %v6522_v49 = vunpack.i.l.bf16 %v6521_v11 }
 0x288   : > { %3304 = vmatmul.mubr.bf16.gmra.mrb[8].mxu0 %v3021_v26  ;;  %6705 = vrot.lane.b32.xlu1 %v8782_v63, %s7575_s21  ;;  %v1948_v63 = vld [vmem:[#allocation2 + $0x1a9] sm:$0xff] }
 0x289   : > { %6700 = vrot.lane.b32.xlu0 %v9073_v10, %s7575_s21  ;;  %v3050_v57 = vpack.c.bf16 %v1949_v58, %v1948_v63  ;;  %v2957_v12 = vsel %vm2853_vm11, %v2925_v27, %v6507_v6  ;;  %v2958_v31 = vsel %vm2853_vm11, %v2926_v19, %v6508_v51  ;;  %v2893_v24 = vsel %vm2886_vm12, %v2860_v61, %v6522_v49  ;;  %v9125_v51 = vld [vmem:[#allocation2 + $0x1c7] sm:$0xff]  ;;  %v9127_v6 = vld [vmem:[#allocation2 + $0x1cf] sm:$0xff] }
 0x28a   : > { %v6516_v41 = vpop.permute.xlu1 %6515  ;;  %v2894_v60 = vsel %vm2886_vm12, %v2861_v28, %v6523_v42  ;;  %v6531_v13 = vpop.permute.xlu0 %6530  ;;  %v7493_v19 = vld [vmem:[#allocation2 + $0x8f] sm:$0xff]  ;;  %v7494_v42 = vld [vmem:[#allocation2 + $0x87] sm:$0xff]  ;;  %v9137_v28 = vpack.i.bf16 %v9127_v6, %v9125_v51 }
 0x28b   : > { %v6518_v3 = vunpack.i.h.bf16 %v6516_v41  ;;  %v6517_v62 = vunpack.i.l.bf16 %v6516_v41  ;;  %6270 = vmatmul.mubr.msk.bf16.gmra.mrb[20].mxu1 %vm337_vm0, %v3050_v57  ;;  %v3024_v7 = vpack.c.bf16 %v2894_v60, %v2893_v24  ;;  %v6533_v16 = vunpack.i.h.bf16 %v6531_v13 }
 0x28c   : > { %6715 = vrot.lane.b32.xlu1 %v8797_v48, %s7577_s17  ;;  %v9109_v48 = vpack.i.bf16 %v9097_v14, %v9095_v0  ;;  %v6532_v53 = vunpack.i.l.bf16 %v6531_v13  ;;  %v2830_v27 = vsel %vm337_vm0, %v7493_v19, %v6391_v45  ;;  %v2829_v49 = vsel %vm337_vm0, %v7494_v42, %v6390_v34  ;;  %v7496_v45 = vld [vmem:[#allocation2 + $0xa7] sm:$0xff] }
 0x28d   : > { %v2989_v9 = vsel %vm2886_vm12, %v2957_v12, %v6517_v62  ;;  %v2990_v46 = vsel %vm2886_vm12, %v2958_v31, %v6518_v3  ;;  %6710 = vrot.lane.b32.xlu0 %v9085_v33, %s7577_s17  ;;  %v9143_v3 = vld [vmem:[#allocation2 + $0x1d0] sm:$0xff]  ;;  %v10634_v62 = vld [vmem:[#allocation54_spill] sm:$0xff]  ;;  %v1904_v42 = vld [vmem:[#allocation2 + $0xe8] sm:$0xff] }
 0x28e   : > { %v6526_v55 = vpop.permute.xlu1 %6525  ;;  %v3025_v36 = vpack.c.bf16 %v2990_v46, %v2989_v9  ;;  %v6541_v54 = vpop.permute.xlu0 %6540  ;;  %v6396_v37 = vunpack.i.h.bf16 %v10634_v62  ;;  %v6395_v57 = vunpack.i.l.bf16 %v10634_v62 }
 0x28f   : > { %v6528_v38 = vunpack.i.h.bf16 %v6526_v55  ;;  %v6527_v8 = vunpack.i.l.bf16 %v6526_v55  ;;  %v6543_v5 = vunpack.i.h.bf16 %v6541_v54  ;;  %v6542_v17 = vunpack.i.l.bf16 %v6541_v54  ;;  %v1902_v55 = vld [vmem:[#allocation2 + $0xc8] sm:$0xff] }
 0x290   : > { %3311 = vmatprep.mubr.bf16.mxu0 %v3025_v36  ;;  %6725 = vrot.lane.b32.xlu1 %v9039_v22, %s7578_s23  ;;  %v9121_v22 = vpack.i.bf16 %v1949_v58, %v1948_v63  ;;  %v9141_v58 = vld [vmem:[#allocation2 + $0x1c8] sm:$0xff]  ;;  %v1903_v36 = vld [vmem:[#allocation2 + $0xd0] sm:$0xff] }
 0x291   : > { %v2928_v52 = vsel %vm337_vm0, %v1901_v23, %v6528_v38  ;;  %v2927_v29 = vsel %vm337_vm0, %v1900_v18, %v6527_v8  ;;  %3312 = vmatmul.mubr.bf16.gmra.mrb[12].mxu0 %v3024_v7  ;;  %6720 = vrot.lane.b32.xlu0 %v9109_v48, %s7578_s23  ;;  %v9151_v18 = vld [vmem:[#allocation2 + $0x1c9] sm:$0xff]  ;;  %v1951_v23 = vld [vmem:[#allocation2 + $0x1d1] sm:$0xff]  ;;  %v9157_v8 = vpack.i.bf16 %v9143_v3, %v9141_v58 }
 0x292   : > { %v6536_v56 = vpop.permute.xlu1 %6535  ;;  %v2959_v4 = vsel %vm2853_vm11, %v2927_v29, %v6532_v53  ;;  %v2960_v35 = vsel %vm2853_vm11, %v2928_v52, %v6533_v16  ;;  %v6551_v25 = vpop.permute.xlu0 %6550  ;;  %v7495_v53 = vld [vmem:[#allocation2 + $0xaf] sm:$0xff]  ;;  %v2831_v52 = vsel %vm337_vm0, %v7496_v45, %v6395_v57  ;;  %v9164_v54 = vpack.i.bf16 %v1951_v23, %v9151_v18 }
 0x293   : > { %v6538_v15 = vunpack.i.h.bf16 %v6536_v56  ;;  %v6537_v26 = vunpack.i.l.bf16 %v6536_v56  ;;  %v2991_v21 = vsel %vm2886_vm12, %v2959_v4, %v6542_v17  ;;  %v2992_v44 = vsel %vm2886_vm12, %v2960_v35, %v6543_v5  ;;  %v1952_v57 = vld [vmem:[#allocation2 + $0x1e9] sm:$0xff] }
 0x294   : > { %6735 = vrot.lane.b32.xlu1 %v9057_v20, %s7575_s21  ;;  %v3028_v47 = vpack.c.bf16 %v2992_v44, %v2991_v21  ;;  %v6553_v60 = vunpack.i.h.bf16 %v6551_v25  ;;  %v6552_v13 = vunpack.i.l.bf16 %v6551_v25  ;;  %v2832_v40 = vsel %vm337_vm0, %v7495_v53, %v6396_v37  ;;  %v9172_v21 = vld [vmem:[#allocation2 + $0x1e7] sm:$0xff]  ;;  %v9174_v44 = vld [vmem:[#allocation2 + $0x1ef] sm:$0xff] }
 0x295   : > { %6730 = vrot.lane.b32.xlu0 %v9121_v22, %s7575_s21  ;;  %v2862_v20 = vsel %vm2853_vm11, %v2829_v49, %v6537_v26  ;;  %v2863_v63 = vsel %vm2853_vm11, %v2830_v27, %v6538_v15  ;;  %v9186_v37 = vpack.i.bf16 %v9174_v44, %v9172_v21 }
 0x296   : > { %v6546_v11 = vpop.permute.xlu1 %6545  ;;  %3319 = vmatprep.mubr.bf16.mxu0 %v3028_v47  ;;  %v6561_v12 = vpop.permute.xlu0 %6560  ;;  %v2930_v5 = vsel %vm337_vm0, %v1903_v36, %v6553_v60  ;;  %v2929_v17 = vsel %vm337_vm0, %v1902_v55, %v6552_v13  ;;  %v9193_v55 = vld [vmem:[#allocation2 + $0x1f0] sm:$0xff]  ;;  %v10635_v36 = vld [vmem:[#allocation57_spill] sm:$0xff] }
 0x297   : > { %v6548_v41 = vunpack.i.h.bf16 %v6546_v11  ;;  %v6547_v61 = vunpack.i.l.bf16 %v6546_v11  ;;  %v6563_v38 = vunpack.i.h.bf16 %v6561_v12 }
 0x298   : > { %6745 = vrot.lane.b32.xlu1 %v9073_v10, %s7577_s17  ;;  %v6562_v10 = vunpack.i.l.bf16 %v6561_v12  ;;  %v1953_v12 = vld [vmem:[#allocation2 + $0x1f1] sm:$0xff] }
 0x299   : > { %v2895_v31 = vsel %vm2886_vm12, %v2862_v20, %v6547_v61  ;;  %v2896_v24 = vsel %vm2886_vm12, %v2863_v63, %v6548_v41  ;;  %6740 = vrot.lane.b32.xlu0 %v9137_v28, %s7577_s17  ;;  %v2865_v26 = vsel %vm2853_vm11, %v2832_v40, %v6563_v38  ;;  %v1905_v61 = vld [vmem:[#allocation2 + $0xf0] sm:$0xff]  ;;  %v3056_v60 = vpack.c.bf16 %v1953_v12, %v1952_v57 }
 0x29a   : > { %v6556_v9 = vpop.permute.xlu1 %6555  ;;  %v3027_v46 = vpack.c.bf16 %v2896_v24, %v2895_v31  ;;  %v6571_v29 = vpop.permute.xlu0 %6570  ;;  %v6401_v38 = vunpack.i.h.bf16 %v10635_v36 }
 0x29b   : > { %v6558_v7 = vunpack.i.h.bf16 %v6556_v9  ;;  %v6557_v16 = vunpack.i.l.bf16 %v6556_v9  ;;  %v6573_v56 = vunpack.i.h.bf16 %v6571_v29  ;;  %v6572_v4 = vunpack.i.l.bf16 %v6571_v29 }
 0x29c   : > { %3320 = vmatmul.mubr.bf16.gmra.mrb[16].mxu0 %v3027_v46  ;;  %6755 = vrot.lane.b32.xlu1 %v9085_v33, %s7578_s23  ;;  %v2864_v33 = vsel %vm2853_vm11, %v2831_v52, %v6562_v10  ;;  %v9191_v46 = vld [vmem:[#allocation2 + $0x1e8] sm:$0xff] }
 0x29d   : > { %6750 = vrot.lane.b32.xlu0 %v9157_v8, %s7578_s23  ;;  %v2961_v25 = vsel %vm2853_vm11, %v2929_v17, %v6557_v16  ;;  %v2962_v47 = vsel %vm2853_vm11, %v2930_v5, %v6558_v7  ;;  %v2897_v19 = vsel %vm2886_vm12, %v2864_v33, %v6572_v4  ;;  %v2898_v27 = vsel %vm2886_vm12, %v2865_v26, %v6573_v56  ;;  %v7498_v26 = vld [vmem:[#allocation2 + $0xc7] sm:$0xff] }
 0x29e   : > { %v6566_v35 = vpop.permute.xlu1 %6565  ;;  %v6581_v11 = vpop.permute.xlu0 %6580  ;;  %v3030_v62 = vpack.c.bf16 %v2898_v27, %v2897_v19  ;;  %v9209_v52 = vpack.i.bf16 %v9193_v55, %v9191_v46  ;;  %v9219_v27 = vpack.i.bf16 %v1953_v12, %v1952_v57 }
 0x29f   : > { %v6568_v34 = vunpack.i.h.bf16 %v6566_v35  ;;  %v6567_v15 = vunpack.i.l.bf16 %v6566_v35  ;;  %v6583_v13 = vunpack.i.h.bf16 %v6581_v11  ;;  %v6582_v9 = vunpack.i.l.bf16 %v6581_v11 }
 0x2a0   : > { %6765 = vrot.lane.b32.xlu1 %v9109_v48, %s7575_s21  ;;  %v3053_v48 = vpack.c.bf16 %v1951_v23, %v9151_v18 }
 0x2a1   : > { %v2993_v49 = vsel %vm2886_vm12, %v2961_v25, %v6567_v15  ;;  %v2994_v41 = vsel %vm2886_vm12, %v2962_v47, %v6568_v34  ;;  %6760 = vrot.lane.b32.xlu0 %v9164_v54, %s7575_s21  ;;  %v7497_v34 = vld [vmem:[#allocation2 + $0xcf] sm:$0xff] }
 0x2a2   : > { %v6576_v20 = vpop.permute.xlu1 %6575  ;;  %v3031_v63 = vpack.c.bf16 %v2994_v41, %v2993_v49  ;;  %v6591_v16 = vpop.permute.xlu0 %6590  ;;  %6273 = vmatprep.mubr.msk.bf16.mxu1 %vm337_vm0, %v3053_v48  ;;  %v2834_v15 = vsel %vm337_vm0, %v7497_v34, %v6401_v38  ;;  %v1986_v49 = vld [vmem:[#allocation2 + $0x20f] sm:$0xff] }
 0x2a3   : > { %v6578_v31 = vunpack.i.h.bf16 %v6576_v20  ;;  %v6577_v24 = vunpack.i.l.bf16 %v6576_v20  ;;  %v6593_v18 = vunpack.i.h.bf16 %v6591_v16  ;;  %v6592_v23 = vunpack.i.l.bf16 %v6591_v16  ;;  %6274 = vmatmul.mubr.msk.bf16.gmra.mrb[24].mxu1 %vm337_vm0, %v3056_v60  ;;  %v10636_v41 = vld [vmem:[#allocation56_spill] sm:$0xff]  ;;  %v9229_v60 = vld [vmem:[#allocation2 + $0x208] sm:$0xff] }
 0x2a4   : > { %3327 = vmatprep.mubr.bf16.mxu0 %v3031_v63  ;;  %6775 = vrot.lane.b32.xlu1 %v9121_v22, %s7577_s17  ;;  %v6400_v22 = vunpack.i.l.bf16 %v10635_v36  ;;  %v6405_v20 = vunpack.i.l.bf16 %v10636_v41  ;;  %v1907_v36 = vld [vmem:[#allocation2 + $0x110] sm:$0xff] }
 0x2a5   : > { %v2932_v10 = vsel %vm337_vm0, %v1905_v61, %v6578_v31  ;;  %v2931_v7 = vsel %vm337_vm0, %v1904_v42, %v6577_v24  ;;  %3328 = vmatmul.mubr.bf16.gmra.mrb[20].mxu0 %v3030_v62  ;;  %6770 = vrot.lane.b32.xlu0 %v9186_v37, %s7577_s17  ;;  %v1985_v42 = vld [vmem:[#allocation2 + $0x207] sm:$0xff]  ;;  %v6406_v61 = vunpack.i.h.bf16 %v10636_v41 }
 0x2a6   : > { %v6586_v53 = vpop.permute.xlu1 %6585  ;;  %v2963_v40 = vsel %vm2853_vm11, %v2931_v7, %v6582_v9  ;;  %v2964_v45 = vsel %vm2853_vm11, %v2932_v10, %v6583_v13  ;;  %v6601_v4 = vpop.permute.xlu0 %6600  ;;  %v2833_v25 = vsel %vm337_vm0, %v7498_v26, %v6400_v22  ;;  %v9231_v13 = vld [vmem:[#allocation2 + $0x210] sm:$0xff]  ;;  %v1906_v9 = vld [vmem:[#allocation2 + $0x108] sm:$0xff]  ;;  %v9235_v10 = vpack.i.bf16 %v1986_v49, %v1985_v42 }
 0x2a7   : > { %v6588_v29 = vunpack.i.h.bf16 %v6586_v53  ;;  %v6587_v5 = vunpack.i.l.bf16 %v6586_v53  ;;  %v2995_v17 = vsel %vm2886_vm12, %v2963_v40, %v6592_v23  ;;  %v2996_v56 = vsel %vm2886_vm12, %v2964_v45, %v6593_v18  ;;  %v7499_v18 = vld [vmem:[#allocation2 + $0xef] sm:$0xff]  ;;  %v7500_v53 = vld [vmem:[#allocation2 + $0xe7] sm:$0xff] }
 0x2a8   : > { %6785 = vrot.lane.b32.xlu1 %v9137_v28, %s7578_s23  ;;  %v3034_v35 = vpack.c.bf16 %v2996_v56, %v2995_v17  ;;  %v6603_v57 = vunpack.i.h.bf16 %v6601_v4  ;;  %v6602_v12 = vunpack.i.l.bf16 %v6601_v4  ;;  %v2836_v23 = vsel %vm337_vm0, %v7499_v18, %v6406_v61  ;;  %v1908_v41 = vld [vmem:[#allocation2 + $0x128] sm:$0xff]  ;;  %v1909_v61 = vld [vmem:[#allocation2 + $0x130] sm:$0xff] }
 0x2a9   : > { %6780 = vrot.lane.b32.xlu0 %v9209_v52, %s7578_s23  ;;  %v2866_v11 = vsel %vm2853_vm11, %v2833_v25, %v6587_v5  ;;  %v2867_v28 = vsel %vm2853_vm11, %v2834_v15, %v6588_v29  ;;  %v2835_v40 = vsel %vm337_vm0, %v7500_v53, %v6405_v20  ;;  %v6809_v22 = vpack.i.bf16 %v9231_v13, %v9229_v60 }
 0x2aa   : > { %v6596_v33 = vpop.permute.xlu1 %6595  ;;  %3335 = vmatprep.mubr.bf16.mxu0 %v3034_v35  ;;  %v6611_v63 = vpop.permute.xlu0 %6610  ;;  %v2934_v29 = vsel %vm337_vm0, %v1907_v36, %v6603_v57  ;;  %v2933_v5 = vsel %vm337_vm0, %v1906_v9, %v6602_v12  ;;  %v1987_v9 = vld [vmem:[#allocation2 + $0x227] sm:$0xff] }
 0x2ab   : > { %v6598_v47 = vunpack.i.h.bf16 %v6596_v33  ;;  %v6597_v19 = vunpack.i.l.bf16 %v6596_v33  ;;  %v6612_v38 = vunpack.i.l.bf16 %v6611_v63  ;;  %v10637_v36 = vld [vmem:[#allocation59_spill] sm:$0xff] }
 0x2ac   : > { %6795 = vrot.lane.b32.xlu1 %v9157_v8, %s7575_s21  ;;  %v6613_v8 = vunpack.i.h.bf16 %v6611_v63 }
 0x2ad   : > { %v2899_v62 = vsel %vm2886_vm12, %v2866_v11, %v6597_v19  ;;  %v2900_v31 = vsel %vm2886_vm12, %v2867_v28, %v6598_v47  ;;  %6790 = vrot.lane.b32.xlu0 %v9219_v27, %s7575_s21  ;;  %v1954_v19 = vld [vmem:[#allocation2 + $0x209] sm:$0xff]  ;;  %v1955_v11 = vld [vmem:[#allocation2 + $0x211] sm:$0xff] }
 0x2ae   : > { %v6606_v24 = vpop.permute.xlu1 %6605  ;;  %v3033_v48 = vpack.c.bf16 %v2900_v31, %v2899_v62  ;;  %v6621_v45 = vpop.permute.xlu0 %6620  ;;  %v2869_v15 = vsel %vm2853_vm11, %v2836_v23, %v6613_v8  ;;  %v6819_v12 = vpack.i.bf16 %v1955_v11, %v1954_v19  ;;  %v6411_v8 = vunpack.i.h.bf16 %v10637_v36 }
 0x2af   : > { %v6608_v7 = vunpack.i.h.bf16 %v6606_v24  ;;  %v6607_v16 = vunpack.i.l.bf16 %v6606_v24  ;;  %v6623_v17 = vunpack.i.h.bf16 %v6621_v45  ;;  %v6622_v56 = vunpack.i.l.bf16 %v6621_v45 }
 0x2b0   : > { %3336 = vmatmul.mubr.bf16.gmra.mrb[24].mxu0 %v3033_v48  ;;  %6805 = vrot.lane.b32.xlu1 %v9164_v54, %s7577_s17  ;;  %v2868_v54 = vsel %vm2853_vm11, %v2835_v40, %v6612_v38 }
 0x2b1   : > { %6800 = vrot.lane.b32.xlu0 %v9235_v10, %s7577_s17  ;;  %v2965_v33 = vsel %vm2853_vm11, %v2933_v5, %v6607_v16  ;;  %v2966_v26 = vsel %vm2853_vm11, %v2934_v29, %v6608_v7  ;;  %v2901_v25 = vsel %vm2886_vm12, %v2868_v54, %v6622_v56  ;;  %v2902_v47 = vsel %vm2886_vm12, %v2869_v15, %v6623_v17  ;;  %v2051_v17 = vld [vmem:[#allocation2 + $0x229] sm:$0xff]  ;;  %v2052_v56 = vld [vmem:[#allocation2 + $0x231] sm:$0xff] }
 0x2b2   : > { %v6616_v4 = vpop.permute.xlu1 %6615  ;;  %v6631_v28 = vpop.permute.xlu0 %6630  ;;  %v3036_v57 = vpack.c.bf16 %v2902_v47, %v2901_v25  ;;  %v3059_v5 = vpack.c.bf16 %v1955_v11, %v1954_v19  ;;  %v2019_v54 = vld [vmem:[#allocation2 + $0x228] sm:$0xff]  ;;  %v2020_v15 = vld [vmem:[#allocation2 + $0x230] sm:$0xff] }
 0x2b3   : > { %v6618_v35 = vunpack.i.h.bf16 %v6616_v4  ;;  %v6617_v34 = vunpack.i.l.bf16 %v6616_v4  ;;  %v6633_v24 = vunpack.i.h.bf16 %v6631_v28  ;;  %v6632_v48 = vunpack.i.l.bf16 %v6631_v28  ;;  %v7501_v47 = vld [vmem:[#allocation2 + $0x10f] sm:$0xff]  ;;  %v7502_v28 = vld [vmem:[#allocation2 + $0x107] sm:$0xff] }
 0x2b4   : > { %6815 = vrot.lane.b32.xlu1 %v9186_v37, %s7578_s23  ;;  %v1988_v37 = vld [vmem:[#allocation2 + $0x22f] sm:$0xff]  ;;  %6277 = vmatprep.mubr.msk.bf16.mxu1 %vm337_vm0, %v3059_v5  ;;  %v2838_v19 = vsel %vm337_vm0, %v7501_v47, %v6411_v8 }
 0x2b5   : > { %v2997_v42 = vsel %vm2886_vm12, %v2965_v33, %v6617_v34  ;;  %v2998_v49 = vsel %vm2886_vm12, %v2966_v26, %v6618_v35  ;;  %6810 = vrot.lane.b32.xlu0 %v6809_v22, %s7578_s23  ;;  %v6410_v22 = vunpack.i.l.bf16 %v10637_v36  ;;  %v3062_v33 = vpack.c.bf16 %v2052_v56, %v2051_v17  ;;  %v1910_v8 = vld [vmem:[#allocation2 + $0x148] sm:$0xff] }
 0x2b6   : > { %v6626_v20 = vpop.permute.xlu1 %6625  ;;  %v3037_v63 = vpack.c.bf16 %v2998_v49, %v2997_v42  ;;  %v6641_v16 = vpop.permute.xlu0 %6640 }
 0x2b7   : > { %v6628_v62 = vunpack.i.h.bf16 %v6626_v20  ;;  %v6627_v31 = vunpack.i.l.bf16 %v6626_v20  ;;  %v6643_v18 = vunpack.i.h.bf16 %v6641_v16  ;;  %v6642_v23 = vunpack.i.l.bf16 %v6641_v16  ;;  %6278 = vmatmul.mubr.msk.bf16.gmra.mrb[28].mxu1 %vm337_vm0, %v3062_v33 }
 0x2b8   : > { %3343 = vmatprep.mubr.bf16.mxu0 %v3037_v63  ;;  %6825 = vrot.lane.b32.xlu1 %v9209_v52, %s7575_s21  ;;  %v6829_v52 = vpack.i.bf16 %v1988_v37, %v1987_v9  ;;  %v2837_v42 = vsel %vm337_vm0, %v7502_v28, %v6410_v22  ;;  %v10638_v63 = vld [vmem:[#allocation58_spill] sm:$0xff] }
 0x2b9   : > { %v2936_v38 = vsel %vm337_vm0, %v1909_v61, %v6628_v62  ;;  %v2935_v7 = vsel %vm337_vm0, %v1908_v41, %v6627_v31  ;;  %3344 = vmatmul.mubr.bf16.gmra.mrb[28].mxu0 %v3036_v57  ;;  %6820 = vrot.lane.b32.xlu0 %v6819_v12, %s7575_s21  ;;  %v6416_v62 = vunpack.i.h.bf16 %v10638_v63  ;;  %v6415_v31 = vunpack.i.l.bf16 %v10638_v63 }
 0x2ba   : > { %v6636_v53 = vpop.permute.xlu1 %6635  ;;  %v2967_v40 = vsel %vm2853_vm11, %v2935_v7, %v6632_v48  ;;  %v2968_v45 = vsel %vm2853_vm11, %v2936_v38, %v6633_v24  ;;  %v6651_v26 = vpop.permute.xlu0 %6650  ;;  %v1911_v38 = vld [vmem:[#allocation2 + $0x150] sm:$0xff] }
 0x2bb   : > { %v6638_v29 = vunpack.i.h.bf16 %v6636_v53  ;;  %v6637_v4 = vunpack.i.l.bf16 %v6636_v53  ;;  %v2999_v35 = vsel %vm2886_vm12, %v2967_v40, %v6642_v23  ;;  %v3000_v34 = vsel %vm2886_vm12, %v2968_v45, %v6643_v18  ;;  %v7503_v23 = vld [vmem:[#allocation2 + $0x12f] sm:$0xff]  ;;  %v7504_v40 = vld [vmem:[#allocation2 + $0x127] sm:$0xff] }
 0x2bc   : > { %6835 = vrot.lane.b32.xlu1 %v9219_v27, %s7577_s17  ;;  %v3040_v25 = vpack.c.bf16 %v3000_v34, %v2999_v35  ;;  %v6839_v27 = vpack.i.bf16 %v2020_v15, %v2019_v54  ;;  %v6653_v48 = vunpack.i.h.bf16 %v6651_v26  ;;  %v6652_v9 = vunpack.i.l.bf16 %v6651_v26 }
 0x2bd   : > { %6830 = vrot.lane.b32.xlu0 %v6829_v52, %s7577_s17  ;;  %v2870_v61 = vsel %vm2853_vm11, %v2837_v42, %v6637_v4  ;;  %v2871_v20 = vsel %vm2853_vm11, %v2838_v19, %v6638_v29  ;;  %v2840_v53 = vsel %vm337_vm0, %v7503_v23, %v6416_v62  ;;  %v2839_v45 = vsel %vm337_vm0, %v7504_v40, %v6415_v31  ;;  %v9297_v42 = vpop.f32.mrb[0].mxu1  ;;  %v3706_v62 = vld [vmem:[#allocation2 + $0x9] sm:$0xff]  ;;  %v3707_v31 = vld [vmem:[#allocation2 + $0x11] sm:$0xff] }
 0x2be   : > { %v6646_v11 = vpop.permute.xlu1 %6645  ;;  %3351 = vmatprep.mubr.bf16.mxu0 %v3040_v25  ;;  %v6661_v57 = vpop.permute.xlu0 %6660  ;;  %v2938_v29 = vsel %vm337_vm0, %v1911_v38, %v6653_v48  ;;  %v2937_v52 = vsel %vm337_vm0, %v1910_v8, %v6652_v9 }
 0x2bf   : > { %v6648_v49 = vunpack.i.h.bf16 %v6646_v11  ;;  %v6647_v41 = vunpack.i.l.bf16 %v6646_v11  ;;  %v6663_v7 = vunpack.i.h.bf16 %v6661_v57  ;;  %v6662_v16 = vunpack.i.l.bf16 %v6661_v57 }
 0x2c0   : > { %6845 = vrot.lane.b32.xlu1 %v9235_v10, %s7578_s23  ;;  %v6864_v57 = vpack.i.bf16 %v3707_v31, %v3706_v62 }
 0x2c1   : > { %v2903_v12 = vsel %vm2886_vm12, %v2870_v61, %v6647_v41  ;;  %v2904_v24 = vsel %vm2886_vm12, %v2871_v20, %v6648_v49  ;;  %6840 = vrot.lane.b32.xlu0 %v6839_v27, %s7578_s23  ;;  %v2872_v34 = vsel %vm2853_vm11, %v2839_v45, %v6662_v16  ;;  %v2873_v54 = vsel %vm2853_vm11, %v2840_v53, %v6663_v7  ;;  %v9299_v49 = vpop.f32.mrb[1].mxu1  ;;  %v3674_v61 = vld [vmem:[#allocation2 + $0x8] sm:$0xff]  ;;  %v3675_v20 = vld [vmem:[#allocation2 + $0x10] sm:$0xff] }
 0x2c2   : > { %v6656_v37 = vpop.permute.xlu1 %6655  ;;  %v3039_v36 = vpack.c.bf16 %v2904_v24, %v2903_v12  ;;  %v6671_v22 = vpop.permute.xlu0 %6670  ;;  %v6854_v63 = vpack.i.bf16 %v3675_v20, %v3674_v61  ;;  %v7506_v20 = vld [vmem:[#allocation2 + $0x147] sm:$0xff] }
 0x2c3   : > { %v6658_v10 = vunpack.i.h.bf16 %v6656_v37  ;;  %v6657_v18 = vunpack.i.l.bf16 %v6656_v37  ;;  %v6673_v5 = vunpack.i.h.bf16 %v6671_v22  ;;  %v6672_v17 = vunpack.i.l.bf16 %v6671_v22  ;;  %v9301_v41 = vpop.f32.mrb[2].mxu1  ;;  %v9318_v37 = vld [vmem:[%s10470_s2 + $0x80] sm:$0xff]  }
 0x2c4   : > { %3352 = vmatmul.mubr.bf16.gmra.mrb[32].mxu0 %v3039_v36  ;;  %v9303_v27 = vpop.f32.mrb[3].mxu1  ;;  %6855 = vrot.lane.b32.xlu1 %v6854_v63, %s7575_s21  ;;  %v7348_v36 = vld [vmem:[%s10470_s2 + $0x88] sm:$0xff]  }
 0x2c5   : > { %v2969_v15 = vsel %vm2853_vm11, %v2937_v52, %v6657_v18  ;;  %v2970_v33 = vsel %vm2853_vm11, %v2938_v29, %v6658_v10  ;;  %v2905_v26 = vsel %vm2886_vm12, %v2872_v34, %v6672_v17  ;;  %v2906_v25 = vsel %vm2886_vm12, %v2873_v54, %v6673_v5  ;;  %6281 = vmatprep.subr.bf16.mxu0 %v9318_v37  ;;  %v10639_v52 = vld [vmem:[#allocation62_spill] sm:$0xff] }
 0x2c6   : > { %v6666_v56 = vpop.permute.xlu1 %6665  ;;  %v3042_v28 = vpack.c.bf16 %v2906_v25, %v2905_v26  ;;  %6282 = vmatpush3.bf16.msra.mxu0 %v9318_v37  ;;  %v6421_v5 = vunpack.i.h.bf16 %v10639_v52  ;;  %v6420_v17 = vunpack.i.l.bf16 %v10639_v52 }
 0x2c7   : > { %v6668_v4 = vunpack.i.h.bf16 %v6666_v56  ;;  %v6667_v35 = vunpack.i.l.bf16 %v6666_v56  ;;  %6283 = vmatprep.subr.bf16.mxu0 %v7348_v36  ;;  %v1912_v56 = vld [vmem:[#allocation2 + $0x168] sm:$0xff] }
 0x2c8   : > { %6865 = vrot.lane.b32.xlu1 %v6864_v57, %s7577_s17  ;;  %v2841_v63 = vsel %vm337_vm0, %v7506_v20, %v6420_v17 }
 0x2c9   : > { %v3001_v47 = vsel %vm2886_vm12, %v2969_v15, %v6667_v35  ;;  %v3002_v19 = vsel %vm2886_vm12, %v2970_v33, %v6668_v4  ;;  %v1913_v4 = vld [vmem:[#allocation2 + $0x170] sm:$0xff] }
 0x2ca   : > { %v3043_v11 = vpack.c.bf16 %v3002_v19, %v3001_v47  ;;  %6284 = vmatpush3.bf16.msra.mxu0 %v7348_v36  ;;  %v6676_v18 = vpop.permute.xlu1 %6675 }
 0x2cb   : > { %v6678_v22 = vunpack.i.h.bf16 %v6676_v18  ;;  %v6677_v29 = vunpack.i.l.bf16 %v6676_v18 }
 0x2cc   : > { %3359 = vmatprep.mubr.bf16.mxu0 %v3043_v11 }
 0x2cd   : > { %3360 = vmatmul.mubr.bf16.gmra.mrb[36].mxu0 %v3042_v28  ;;  %v2940_v25 = vsel %vm337_vm0, %v1913_v4, %v6678_v22  ;;  %v2939_v47 = vsel %vm337_vm0, %v1912_v56, %v6677_v29  ;;  %v7505_v28 = vld [vmem:[#allocation2 + $0x14f] sm:$0xff] }
 0x2ce   : > { %v2842_v61 = vsel %vm337_vm0, %v7505_v28, %v6421_v5 }
 0x2d5   : > { %v9307_v12 = vpop.f32.mrb[4].mxu1 }
 0x2d6   : > { %v9309_v24 = vpop.f32.mrb[5].mxu1 }
 0x2d7   : > { %v9311_v48 = vpop.f32.mrb[6].mxu1 }
 0x2d8   : > { %v9313_v9 = vpop.f32.mrb[7].mxu1 }
 0x2e9   : > { %v9327_v38 = vpop.f32.mrb[8].mxu1 }
 0x2ea   : > { %v9331_v16 = vpop.f32.mrb[9].mxu1 }
 0x2eb   : > { %v9333_v10 = vpop.f32.mrb[10].mxu1 }
 0x2ec   : > { %v9335_v23 = vpop.f32.mrb[11].mxu1 }
 0x2ef   : > { %v9325_v8 = vpop.xlane.xlu0 %1649 }
 0x2f3   : > { %v9329_v7 = vpop.xlane.xlu0 %1655 }
 0x2f7   : > { %v9337_v53 = vpop.xlane.xlu0 %1658 }
 0x2fb   : > { %v6681_v45 = vpop.permute.xlu0 %6680 }
 0x2fc   : > { %v9339_v40 = vpop.xlane.xlu1 %1652  ;;  %v6683_v35 = vunpack.i.h.bf16 %v6681_v45  ;;  %v6682_v34 = vunpack.i.l.bf16 %v6681_v45 }
 0x2fe   : > { %v2971_v31 = vsel %vm2853_vm11, %v2939_v47, %v6682_v34  ;;  %v2972_v57 = vsel %vm2853_vm11, %v2940_v25, %v6683_v35  ;;  %v9355_v25 = vpop.f32.mrb[12].mxu1 }
 0x2ff   : > { %v6691_v15 = vpop.permute.xlu0 %6690 }
 0x300   : > { %v6686_v54 = vpop.permute.xlu1 %6685  ;;  %v6693_v19 = vunpack.i.h.bf16 %v6691_v15  ;;  %v6692_v11 = vunpack.i.l.bf16 %v6691_v15 }
 0x301   : > { %v6688_v33 = vunpack.i.h.bf16 %v6686_v54  ;;  %v6687_v26 = vunpack.i.l.bf16 %v6686_v54 }
 0x302   : > { %v3003_v45 = vsel %vm2886_vm12, %v2971_v31, %v6692_v11  ;;  %v3004_v22 = vsel %vm2886_vm12, %v2972_v57, %v6693_v19  ;;  %v9357_v19 = vpop.f32.mrb[13].mxu1  ;;  %v1786_v57 = vld [vmem:[#allocation2 + $0x167] sm:$0xff] }
 0x303   : > { %v6701_v29 = vpop.permute.xlu0 %6700  ;;  %v3046_v52 = vpack.c.bf16 %v3004_v22, %v3003_v45  ;;  %v2874_v56 = vsel %vm2853_vm11, %v2841_v63, %v6687_v26  ;;  %v2875_v5 = vsel %vm2853_vm11, %v2842_v61, %v6688_v33  ;;  %v9359_v11 = vpop.f32.mrb[14].mxu1 }
 0x304   : > { %v6696_v62 = vpop.permute.xlu1 %6695  ;;  %v6703_v35 = vunpack.i.h.bf16 %v6701_v29  ;;  %v6702_v15 = vunpack.i.l.bf16 %v6701_v29  ;;  %v9361_v63 = vpop.f32.mrb[15].mxu1 }
 0x305   : > { %v6698_v36 = vunpack.i.h.bf16 %v6696_v62  ;;  %v6697_v18 = vunpack.i.l.bf16 %v6696_v62  ;;  %3367 = vmatprep.mubr.bf16.mxu0 %v3046_v52 }
 0x306   : > { %v2942_v62 = vsel %vm337_vm0, %v9045_v1, %v6703_v35  ;;  %v2941_v31 = vsel %vm337_vm0, %v9043_v2, %v6702_v15 }
 0x307   : > { %v2907_v4 = vsel %vm2886_vm12, %v2874_v56, %v6697_v18  ;;  %v2908_v17 = vsel %vm2886_vm12, %v2875_v5, %v6698_v36  ;;  %v6711_v47 = vpop.permute.xlu0 %6710  ;;  %v1787_v36 = vld [vmem:[#allocation2 + $0x16f] sm:$0xff] }
 0x308   : > { %v6706_v34 = vpop.permute.xlu1 %6705  ;;  %v3045_v54 = vpack.c.bf16 %v2908_v17, %v2907_v4  ;;  %v6713_v26 = vunpack.i.h.bf16 %v6711_v47  ;;  %v6712_v28 = vunpack.i.l.bf16 %v6711_v47 }
 0x309   : > { %v6708_v33 = vunpack.i.h.bf16 %v6706_v34  ;;  %v6707_v61 = vunpack.i.l.bf16 %v6706_v34 }
 0x30a   : > { %3368 = vmatmul.mubr.bf16.gmra.mrb[40].mxu0 %v3045_v54  ;;  %v2973_v17 = vsel %vm2853_vm11, %v2941_v31, %v6712_v28  ;;  %v2974_v34 = vsel %vm2853_vm11, %v2942_v62, %v6713_v26 }
 0x30b   : > { %v6721_v18 = vpop.permute.xlu0 %6720  ;;  %v2844_v56 = vsel %vm337_vm0, %v1787_v36, %v6708_v33  ;;  %v2843_v5 = vsel %vm337_vm0, %v1786_v57, %v6707_v61 }
 0x30c   : > { %v6716_v20 = vpop.permute.xlu1 %6715  ;;  %v6723_v29 = vunpack.i.h.bf16 %v6721_v18  ;;  %v6722_v52 = vunpack.i.l.bf16 %v6721_v18 }
 0x30d   : > { %v6718_v45 = vunpack.i.h.bf16 %v6716_v20  ;;  %v6717_v22 = vunpack.i.l.bf16 %v6716_v20 }
 0x30e   : > { %v3005_v2 = vsel %vm2886_vm12, %v2973_v17, %v6722_v52  ;;  %v3006_v35 = vsel %vm2886_vm12, %v2974_v34, %v6723_v29 }
 0x30f   : > { %v6731_v15 = vpop.permute.xlu0 %6730  ;;  %v3049_v47 = vpack.c.bf16 %v3006_v35, %v3005_v2  ;;  %v2876_v20 = vsel %vm2853_vm11, %v2843_v5, %v6717_v22  ;;  %v2877_v18 = vsel %vm2853_vm11, %v2844_v56, %v6718_v45 }
 0x310   : > { %v6726_v4 = vpop.permute.xlu1 %6725  ;;  %v6733_v26 = vunpack.i.h.bf16 %v6731_v15  ;;  %v6732_v62 = vunpack.i.l.bf16 %v6731_v15 }
 0x311   : > { %v6728_v1 = vunpack.i.h.bf16 %v6726_v4  ;;  %v6727_v54 = vunpack.i.l.bf16 %v6726_v4  ;;  %3375 = vmatprep.mubr.bf16.mxu0 %v3049_v47 }
 0x312   : > { %v2944_v22 = vsel %vm337_vm0, %v9097_v14, %v6733_v26  ;;  %v2943_v45 = vsel %vm337_vm0, %v9095_v0, %v6732_v62 }
 0x313   : > { %v2909_v33 = vsel %vm2886_vm12, %v2876_v20, %v6727_v54  ;;  %v2910_v61 = vsel %vm2886_vm12, %v2877_v18, %v6728_v1  ;;  %v6741_v57 = vpop.permute.xlu0 %6740 }
 0x314   : > { %v6736_v28 = vpop.permute.xlu1 %6735  ;;  %v3048_v31 = vpack.c.bf16 %v2910_v61, %v2909_v33  ;;  %v6743_v36 = vunpack.i.h.bf16 %v6741_v57  ;;  %v6742_v52 = vunpack.i.l.bf16 %v6741_v57 }
 0x315   : > { %v6738_v29 = vunpack.i.h.bf16 %v6736_v28  ;;  %v6737_v4 = vunpack.i.l.bf16 %v6736_v28 }
 0x316   : > { %3376 = vmatmul.mubr.bf16.gmra.mrb[44].mxu0 %v3048_v31  ;;  %v2975_v47 = vsel %vm2853_vm11, %v2943_v45, %v6742_v52  ;;  %v2976_v20 = vsel %vm2853_vm11, %v2944_v22, %v6743_v36 }
 0x317   : > { %v6751_v56 = vpop.permute.xlu0 %6750  ;;  %v2846_v2 = vsel %vm337_vm0, %v9029_v30, %v6738_v29  ;;  %v2845_v35 = vsel %vm337_vm0, %v9027_v50, %v6737_v4 }
 0x318   : > { %v6746_v17 = vpop.permute.xlu1 %6745  ;;  %v6753_v1 = vunpack.i.h.bf16 %v6751_v56  ;;  %v6752_v54 = vunpack.i.l.bf16 %v6751_v56 }
 0x319   : > { %v6748_v5 = vunpack.i.h.bf16 %v6746_v17  ;;  %v6747_v34 = vunpack.i.l.bf16 %v6746_v17  ;;  %v9389_v61 = vpop.f32.mrb[16].mxu1 }
 0x31a   : > { %v3007_v0 = vsel %vm2886_vm12, %v2975_v47, %v6752_v54  ;;  %v3008_v33 = vsel %vm2886_vm12, %v2976_v20, %v6753_v1  ;;  %v9393_v50 = vpop.f32.mrb[17].mxu1 }
 0x31b   : > { %v6761_v28 = vpop.permute.xlu0 %6760  ;;  %v3052_v31 = vpack.c.bf16 %v3008_v33, %v3007_v0  ;;  %v2878_v30 = vsel %vm2853_vm11, %v2845_v35, %v6747_v34  ;;  %v2879_v26 = vsel %vm2853_vm11, %v2846_v2, %v6748_v5  ;;  %v9397_v36 = vpop.f32.mrb[18].mxu1 }
 0x31c   : > { %v6756_v15 = vpop.permute.xlu1 %6755  ;;  %v9399_v4 = vpop.f32.mrb[19].mxu1  ;;  %v6763_v17 = vunpack.i.h.bf16 %v6761_v28  ;;  %v6762_v22 = vunpack.i.l.bf16 %v6761_v28 }
 0x31d   : > { %v6758_v14 = vunpack.i.h.bf16 %v6756_v15  ;;  %v6757_v18 = vunpack.i.l.bf16 %v6756_v15  ;;  %3383 = vmatprep.mubr.bf16.mxu0 %v3052_v31 }
 0x31e   : > { %v2946_v2 = vsel %vm337_vm0, %v9143_v3, %v6763_v17  ;;  %v2945_v35 = vsel %vm337_vm0, %v9141_v58, %v6762_v22 }
 0x31f   : > { %v2911_v62 = vsel %vm2886_vm12, %v2878_v30, %v6757_v18  ;;  %v2912_v57 = vsel %vm2886_vm12, %v2879_v26, %v6758_v14  ;;  %v6771_v45 = vpop.permute.xlu0 %6770 }
 0x320   : > { %v6766_v52 = vpop.permute.xlu1 %6765  ;;  %v3051_v29 = vpack.c.bf16 %v2912_v57, %v2911_v62  ;;  %v6773_v56 = vunpack.i.h.bf16 %v6771_v45  ;;  %v6772_v34 = vunpack.i.l.bf16 %v6771_v45 }
 0x321   : > { %v6768_v5 = vunpack.i.h.bf16 %v6766_v52  ;;  %v6767_v1 = vunpack.i.l.bf16 %v6766_v52 }
 0x322   : > { %3384 = vmatmul.mubr.bf16.gmra.mrb[48].mxu0 %v3051_v29  ;;  %v2977_v31 = vsel %vm2853_vm11, %v2945_v35, %v6772_v34  ;;  %v2978_v30 = vsel %vm2853_vm11, %v2946_v2, %v6773_v56 }
 0x323   : > { %v6781_v15 = vpop.permute.xlu0 %6780  ;;  %v2848_v0 = vsel %vm337_vm0, %v9069_v43, %v6768_v5  ;;  %v2847_v33 = vsel %vm337_vm0, %v9067_v59, %v6767_v1 }
 0x324   : > { %v6776_v54 = vpop.permute.xlu1 %6775  ;;  %v6783_v14 = vunpack.i.h.bf16 %v6781_v15  ;;  %v6782_v18 = vunpack.i.l.bf16 %v6781_v15 }
 0x325   : > { %v6778_v47 = vunpack.i.h.bf16 %v6776_v54  ;;  %v6777_v20 = vunpack.i.l.bf16 %v6776_v54 }
 0x326   : > { %v3009_v58 = vsel %vm2886_vm12, %v2977_v31, %v6782_v18  ;;  %v3010_v62 = vsel %vm2886_vm12, %v2978_v30, %v6783_v14 }
 0x327   : > { %v6791_v57 = vpop.permute.xlu0 %6790  ;;  %v3055_v52 = vpack.c.bf16 %v3010_v62, %v3009_v58  ;;  %v2880_v29 = vsel %vm2853_vm11, %v2847_v33, %v6777_v20  ;;  %v2881_v43 = vsel %vm2853_vm11, %v2848_v0, %v6778_v47 }
 0x328   : > { %v6786_v28 = vpop.permute.xlu1 %6785  ;;  %v6793_v56 = vunpack.i.h.bf16 %v6791_v57  ;;  %v6792_v34 = vunpack.i.l.bf16 %v6791_v57 }
 0x329   : > { %v6788_v3 = vunpack.i.h.bf16 %v6786_v28  ;;  %v6787_v26 = vunpack.i.l.bf16 %v6786_v28  ;;  %3391 = vmatprep.mubr.bf16.mxu0 %v3055_v52 }
 0x32a   : > { %v2948_v20 = vsel %vm337_vm0, %v9193_v55, %v6793_v56  ;;  %v2947_v47 = vsel %vm337_vm0, %v9191_v46, %v6792_v34 }
 0x32b   : > { %v2913_v17 = vsel %vm2886_vm12, %v2880_v29, %v6787_v26  ;;  %v2914_v59 = vsel %vm2886_vm12, %v2881_v43, %v6788_v3  ;;  %v6801_v5 = vpop.permute.xlu0 %6800 }
 0x32c   : > { %v6796_v22 = vpop.permute.xlu1 %6795  ;;  %v3054_v45 = vpack.c.bf16 %v2914_v59, %v2913_v17  ;;  %v6803_v1 = vunpack.i.h.bf16 %v6801_v5  ;;  %v6802_v54 = vunpack.i.l.bf16 %v6801_v5 }
 0x32d   : > { %v6798_v2 = vunpack.i.h.bf16 %v6796_v22  ;;  %v6797_v35 = vunpack.i.l.bf16 %v6796_v22 }
 0x32e   : > { %3392 = vmatmul.mubr.bf16.gmra.mrb[52].mxu0 %v3054_v45  ;;  %v2979_v26 = vsel %vm2853_vm11, %v2947_v47, %v6802_v54  ;;  %v2980_v58 = vsel %vm2853_vm11, %v2948_v20, %v6803_v1 }
 0x32f   : > { %v6811_v14 = vpop.permute.xlu0 %6810  ;;  %v2850_v31 = vsel %vm337_vm0, %v9127_v6, %v6798_v2  ;;  %v2849_v30 = vsel %vm337_vm0, %v9125_v51, %v6797_v35 }
 0x330   : > { %v6806_v15 = vpop.permute.xlu1 %6805  ;;  %v6813_v33 = vunpack.i.h.bf16 %v6811_v14  ;;  %v6812_v28 = vunpack.i.l.bf16 %v6811_v14 }
 0x331   : > { %v6808_v18 = vunpack.i.h.bf16 %v6806_v15  ;;  %v6807_v0 = vunpack.i.l.bf16 %v6806_v15 }
 0x332   : > { %v3011_v46 = vsel %vm2886_vm12, %v2979_v26, %v6812_v28  ;;  %v3012_v57 = vsel %vm2886_vm12, %v2980_v58, %v6813_v33 }
 0x333   : > { %v6821_v52 = vpop.permute.xlu0 %6820  ;;  %v3058_v29 = vpack.c.bf16 %v3012_v57, %v3011_v46  ;;  %v2882_v43 = vsel %vm2853_vm11, %v2849_v30, %v6807_v0  ;;  %v2883_v6 = vsel %vm2853_vm11, %v2850_v31, %v6808_v18 }
 0x334   : > { %v6816_v3 = vpop.permute.xlu1 %6815  ;;  %v6823_v45 = vunpack.i.h.bf16 %v6821_v52  ;;  %v6822_v56 = vunpack.i.l.bf16 %v6821_v52 }
 0x335   : > { %v6818_v55 = vunpack.i.h.bf16 %v6816_v3  ;;  %v6817_v62 = vunpack.i.l.bf16 %v6816_v3  ;;  %3399 = vmatprep.mubr.bf16.mxu0 %v3058_v29 }
 0x336   : > { %v2950_v15 = vsel %vm337_vm0, %v9231_v13, %v6823_v45  ;;  %v2949_v20 = vsel %vm337_vm0, %v9229_v60, %v6822_v56  ;;  %v7349_v60 = vld [vmem:[%s10470_s2 + $0x40] sm:$0xff]   ;;  %v7354_v45 = vld [vmem:[%s10470_s2 + $0x10] sm:$0xff]  }
 0x337   : > { %v2915_v17 = vsel %vm2886_vm12, %v2882_v43, %v6817_v62  ;;  %v2916_v51 = vsel %vm2886_vm12, %v2883_v6, %v6818_v55  ;;  %v6831_v34 = vpop.permute.xlu0 %6830  ;;  %v7350_v13 = vld [vmem:[%s10470_s2] sm:$0xff]   ;;  %6115 = vmatprep.subr.bf16.mxu1 %v7349_v60  ;;  %v7351_v6 = vld [vmem:[%s10470_s2 + $0x48] sm:$0xff]  }
 0x338   : > { %v6826_v59 = vpop.permute.xlu1 %6825  ;;  %v3057_v22 = vpack.c.bf16 %v2916_v51, %v2915_v17  ;;  %v6833_v5 = vunpack.i.h.bf16 %v6831_v34  ;;  %v6832_v1 = vunpack.i.l.bf16 %v6831_v34  ;;  %6116 = vmatpush3.bf16.msra.mxu1 %v7350_v13  ;;  %v7352_v17 = vld [vmem:[%s10470_s2 + $0x8] sm:$0xff]  }
 0x339   : > { %v6828_v54 = vunpack.i.h.bf16 %v6826_v59  ;;  %v6827_v2 = vunpack.i.l.bf16 %v6826_v59  ;;  %6117 = vmatprep.subr.bf16.mxu1 %v7351_v6  ;;  %v7362_v6 = vld [vmem:[%s10470_s2 + $0x30] sm:$0xff]  }
 0x33a   : > { %3400 = vmatmul.mubr.bf16.gmra.mrb[56].mxu0 %v3057_v22  ;;  %v2981_v3 = vsel %vm2853_vm11, %v2949_v20, %v6832_v1  ;;  %v2982_v26 = vsel %vm2853_vm11, %v2950_v15, %v6833_v5  ;;  %v7353_v22 = vld [vmem:[%s10470_s2 + $0x50] sm:$0xff]  }
 0x33b   : > { %v6841_v47 = vpop.permute.xlu0 %6840  ;;  %v2852_v28 = vsel %vm337_vm0, %v9174_v44, %v6828_v54  ;;  %v2851_v31 = vsel %vm337_vm0, %v9172_v21, %v6827_v2  ;;  %v7355_v2 = vld [vmem:[%s10470_s2 + $0x58] sm:$0xff]  }
 0x33c   : > { %v6836_v35 = vpop.permute.xlu1 %6835  ;;  %v6843_v0 = vunpack.i.h.bf16 %v6841_v47  ;;  %v6842_v33 = vunpack.i.l.bf16 %v6841_v47  ;;  %6118 = vmatpush3.bf16.msra.mxu1 %v7352_v17 }
 0x33d   : > { %v6838_v14 = vunpack.i.h.bf16 %v6836_v35  ;;  %v6837_v18 = vunpack.i.l.bf16 %v6836_v35  ;;  %6119 = vmatprep.subr.bf16.mxu1 %v7353_v22  ;;  %v7363_v22 = vld [vmem:[%s10470_s2 + $0x78] sm:$0xff]  }
 0x33e   : > { %v3013_v44 = vsel %vm2886_vm12, %v2981_v3, %v6842_v33  ;;  %v3014_v62 = vsel %vm2886_vm12, %v2982_v26, %v6843_v0  ;;  %v7359_v3 = vld [vmem:[%s10470_s2 + $0x68] sm:$0xff]  }
 0x33f   : > { %v3061_v21 = vpack.c.bf16 %v3014_v62, %v3013_v44  ;;  %v2884_v46 = vsel %vm2853_vm11, %v2851_v31, %v6837_v18  ;;  %v2885_v57 = vsel %vm2853_vm11, %v2852_v28, %v6838_v14  ;;  %v7357_v18 = vld [vmem:[%s10470_s2 + $0x60] sm:$0xff]  }
 0x340   : > { %v6846_v30 = vpop.permute.xlu1 %6845  ;;  %6120 = vmatpush3.bf16.msra.mxu1 %v7354_v45 }
 0x341   : > { %v6848_v58 = vunpack.i.h.bf16 %v6846_v30  ;;  %v6847_v55 = vunpack.i.l.bf16 %v6846_v30  ;;  %3407 = vmatprep.mubr.bf16.mxu0 %v3061_v21  ;;  %6121 = vmatprep.subr.bf16.mxu1 %v7355_v2  ;;  %v7358_v30 = vld [vmem:[%s10470_s2 + $0x20] sm:$0xff]  }
 0x343   : > { %v2917_v52 = vsel %vm2886_vm12, %v2884_v46, %v6847_v55  ;;  %v2918_v29 = vsel %vm2886_vm12, %v2885_v57, %v6848_v58  ;;  %v7360_v46 = vld [vmem:[%s10470_s2 + $0x28] sm:$0xff]  }
 0x344   : > { %v3060_v43 = vpack.c.bf16 %v2918_v29, %v2917_v52 }
 0x346   : > { %3408 = vmatmul.mubr.bf16.gmra.mrb[60].mxu0 %v3060_v43 }
 0x347   : > { %v6001_v51 = vpop.f32.mrb[0].mxu0 }
 0x348   : > { %v6002_v59 = vpop.f32.mrb[1].mxu0 }
 0x349   : > { %v6003_v56 = vadd.f32 %v6002_v59, %v6001_v51  ;;  %v6004_v34 = vpop.f32.mrb[2].mxu0 }
 0x34a   : > { %v6005_v5 = vpop.f32.mrb[3].mxu0 }
 0x34b   : > { %v6006_v1 = vadd.f32 %v6005_v5, %v6004_v34  ;;  %v3451_v54 = vadd.f32 %v6003_v56, %v9299_v49  ;;  %v7356_v49 = vld [vmem:[%s10470_s2 + $0x18] sm:$0xff]  }
 0x34c   : > { %6122 = vmatpush3.bf16.msra.mxu1 %v7356_v49 }
 0x34d   : > { %v3577_v35 = vmax.f32 %v3451_v54, 0.0  ;;  %v3454_v15 = vadd.f32 %v6006_v1, %v9303_v27  ;;  %6123 = vmatprep.subr.bf16.mxu1 %v7357_v18  ;;  %v7364_v1 = vld [vmem:[%s10470_s2 + $0x38] sm:$0xff]  }
 0x34f   : > { %3609 = vst.msk [vmem:[#allocation2 + $0x28] sm:$0xff] %vm337_vm0, %v3577_v35  ;;  %v3578_v20 = vmax.f32 %v3454_v15, 0.0 }
 0x350   : > { %v6007_v47 = vpop.f32.mrb[4].mxu0  ;;  %6124 = vmatpush3.bf16.msra.mxu1 %v7358_v30 }
 0x351   : > { %3610 = vst.msk [vmem:[#allocation2 + $0x30] sm:$0xff] %vm337_vm0, %v3578_v20  ;;  %v6008_v14 = vpop.f32.mrb[5].mxu0  ;;  %6125 = vmatprep.subr.bf16.mxu1 %v7359_v3 }
 0x352   : > { %v6009_v0 = vadd.f32 %v6008_v14, %v6007_v47  ;;  %v6010_v33 = vpop.f32.mrb[6].mxu0 }
 0x353   : > { %v6011_v28 = vpop.f32.mrb[7].mxu0 }
 0x354   : > { %v3459_v27 = vadd.f32 %v9297_v42, %v6009_v0  ;;  %v6012_v31 = vadd.f32 %v6011_v28, %v6010_v33  ;;  %6126 = vmatpush3.bf16.msra.mxu1 %v7360_v46 }
 0x356   : > { %v3579_v26 = vmax.f32 %v3459_v27, 0.0  ;;  %v3462_v60 = vadd.f32 %v9301_v41, %v6012_v31  ;;  %v9488_v13 = vld [vmem:[#allocation2 + $0x27] sm:$0xff]  ;;  %v7361_v41 = vld [vmem:[%s10470_s2 + $0x70] sm:$0xff]  }
 0x357   : > { %v9506_v43 = vld [vmem:[#allocation2 + $0x28] sm:$0xff]  ;;  %6127 = vmatprep.subr.bf16.mxu1 %v7361_v41 }
 0x358   : > { %3611 = vst.msk [vmem:[#allocation2 + $0x48] sm:$0xff] %vm337_vm0, %v3579_v26  ;;  %v3580_v58 = vmax.f32 %v3462_v60, 0.0  ;;  %v3802_v42 = vld [vmem:[#allocation2 + $0x29] sm:$0xff]  ;;  %v3803_v55 = vld [vmem:[#allocation2 + $0x31] sm:$0xff]  ;;  %6128 = vmatpush3.bf16.msra.mxu1 %v7362_v6 }
 0x359   : > { %v9491_v44 = vld [vmem:[#allocation2 + $0x2f] sm:$0xff]  ;;  %v6849_v62 = vpack.i.bf16 %v3803_v55, %v3802_v42  ;;  %6129 = vmatprep.subr.bf16.mxu1 %v7363_v22 }
 0x35a   : > { %v6874_v21 = vpack.i.bf16 %v9491_v44, %v9488_v13  ;;  %3612 = vst.msk [vmem:[#allocation2 + $0x50] sm:$0xff] %vm337_vm0, %v3580_v58  ;;  %v9502_v57 = vld [vmem:[#allocation2 + $0x30] sm:$0xff] }
 0x35b   : > { %6850 = vrot.lane.b32.xlu0 %v6849_v62, %s7575_s21  ;;  %v6013_v52 = vpop.f32.mrb[8].mxu0  ;;  %v6884_v59 = vpack.i.bf16 %v9502_v57, %v9506_v43 }
 0x35c   : > { %6875 = vrot.lane.b32.xlu1 %v6874_v21, %s7578_s23  ;;  %v6014_v29 = vpop.f32.mrb[9].mxu0  ;;  %6130 = vmatpush3.bf16.msra.mxu1 %v7364_v1 }
 0x35d   : > { %v6015_v17 = vadd.f32 %v6014_v29, %v6013_v52  ;;  %v6016_v51 = vpop.f32.mrb[10].mxu0  ;;  %6317 = vmatprep.subr.bf16.mxu1 %v9318_v37 }
 0x35e   : > { %v6017_v45 = vpop.f32.mrb[11].mxu0  ;;  %v9526_v47 = vpop.f32.mrb[20].mxu1 }
 0x35f   : > { %v6018_v56 = vadd.f32 %v6017_v45, %v6016_v51  ;;  %v3467_v34 = vadd.f32 %v6015_v17, %v9309_v24  ;;  %v9518_v5 = vld [vmem:[#allocation2 + $0x47] sm:$0xff]  ;;  %v9530_v49 = vpop.f32.mrb[21].mxu1 }
 0x360   : > { %6885 = vrot.lane.b32.xlu1 %v6884_v59, %s7575_s21  ;;  %v9541_v27 = vld [vmem:[#allocation2 + $0x48] sm:$0xff] }
 0x361   : > { %v3581_v54 = vmax.f32 %v3467_v34, 0.0  ;;  %v3470_v2 = vadd.f32 %v6018_v56, %v9313_v9  ;;  %v9524_v35 = vld [vmem:[#allocation2 + $0x4f] sm:$0xff]  ;;  %v9536_v9 = vpop.f32.mrb[22].mxu1 }
 0x362   : > { %v3898_v15 = vld [vmem:[#allocation2 + $0x49] sm:$0xff]  ;;  %v3899_v20 = vld [vmem:[#allocation2 + $0x51] sm:$0xff]  ;;  %v6859_v24 = vpack.i.bf16 %v9524_v35, %v9518_v5  ;;  %v9543_v31 = vpop.f32.mrb[23].mxu1 }
 0x363   : > { %v4892_v14 = vpack.c.bf16 %v3899_v20, %v3898_v15  ;;  %3613 = vst.msk [vmem:[#allocation2 + $0x68] sm:$0xff] %vm337_vm0, %v3581_v54  ;;  %v3582_v18 = vmax.f32 %v3470_v2, 0.0  ;;  %v9534_v0 = vld [vmem:[#allocation2 + $0x50] sm:$0xff]  ;;  %v6879_v21 = vpack.i.bf16 %v3899_v20, %v3898_v15 }
 0x364   : > { %6895 = vrot.lane.b32.xlu1 %v6849_v62, %s7577_s17  ;;  %6860 = vrot.lane.b32.xlu0 %v6859_v24, %s7577_s17  ;;  %v6019_v33 = vpop.f32.mrb[12].mxu0  ;;  %v6869_v26 = vpack.i.bf16 %v9534_v0, %v9541_v27 }
 0x365   : > { %6285 = vmatprep.mubr.msk.bf16.mxu0 %vm337_vm0, %v4892_v14  ;;  %3614 = vst.msk [vmem:[#allocation2 + $0x70] sm:$0xff] %vm337_vm0, %v3582_v18  ;;  %v6020_v28 = vpop.f32.mrb[13].mxu0 }
 0x366   : > { %v6021_v30 = vadd.f32 %v6020_v28, %v6019_v33  ;;  %v6022_v3 = vpop.f32.mrb[14].mxu0 }
 0x367   : > { %v6023_v60 = vpop.f32.mrb[15].mxu0 }
 0x368   : > { %6905 = vrot.lane.b32.xlu1 %v6859_v24, %s7578_s23  ;;  %v3475_v58 = vadd.f32 %v9307_v12, %v6021_v30  ;;  %v6024_v42 = vadd.f32 %v6023_v60, %v6022_v3  ;;  %6870 = vrot.lane.b32.xlu0 %v6869_v26, %s7578_s23 }
 0x36a   : > { %v3583_v55 = vmax.f32 %v3475_v58, 0.0  ;;  %v3478_v62 = vadd.f32 %v9311_v48, %v6024_v42  ;;  %v9553_v46 = vld [vmem:[#allocation2 + $0x67] sm:$0xff] }
 0x36b   : > { %v9567_v45 = vld [vmem:[#allocation2 + $0x68] sm:$0xff] }
 0x36c   : > { %6915 = vrot.lane.b32.xlu1 %v6869_v26, %s7575_s21  ;;  %3615 = vst.msk [vmem:[#allocation2 + $0x88] sm:$0xff] %vm337_vm0, %v3583_v55  ;;  %v3584_v41 = vmax.f32 %v3478_v62, 0.0  ;;  %6880 = vrot.lane.b32.xlu0 %v6879_v21, %s7575_s21  ;;  %v3900_v37 = vld [vmem:[#allocation2 + $0x69] sm:$0xff]  ;;  %v3901_v52 = vld [vmem:[#allocation2 + $0x71] sm:$0xff] }
 0x36d   : > { %v9557_v29 = vld [vmem:[#allocation2 + $0x6f] sm:$0xff]  ;;  %v4895_v12 = vpack.c.bf16 %v3901_v52, %v3900_v37  ;;  %v6909_v18 = vpack.i.bf16 %v3901_v52, %v3900_v37 }
 0x36e   : > { %v6889_v6 = vpack.i.bf16 %v9557_v29, %v9553_v46  ;;  %3616 = vst.msk [vmem:[#allocation2 + $0x90] sm:$0xff] %vm337_vm0, %v3584_v41  ;;  %v9564_v17 = vld [vmem:[#allocation2 + $0x70] sm:$0xff] }
 0x36f   : > { %v6025_v48 = vpop.f32.mrb[16].mxu0  ;;  %6286 = vmatmul.mubr.msk.bf16.vlgmr.msra.gmra.mrb[64].mxu0 %vm337_vm0, %v4895_v12  ;;  %v6899_v34 = vpack.i.bf16 %v9564_v17, %v9567_v45 }
 0x370   : > { %6925 = vrot.lane.b32.xlu1 %v6879_v21, %s7577_s17  ;;  %v6026_v51 = vpop.f32.mrb[17].mxu0  ;;  %6890 = vrot.lane.b32.xlu0 %v6889_v6, %s7577_s17 }
 0x371   : > { %v6027_v59 = vadd.f32 %v6026_v51, %v6025_v48  ;;  %v6028_v22 = vpop.f32.mrb[18].mxu0 }
 0x372   : > { %v6029_v56 = vpop.f32.mrb[19].mxu0 }
 0x373   : > { %v6030_v1 = vadd.f32 %v6029_v56, %v6028_v22  ;;  %v3483_v54 = vadd.f32 %v6027_v59, %v9331_v16  ;;  %v9595_v37 = vld [vmem:[#allocation2 + $0x88] sm:$0xff] }
 0x374   : > { %6935 = vrot.lane.b32.xlu1 %v6889_v6, %s7578_s23  ;;  %6900 = vrot.lane.b32.xlu0 %v6899_v34, %s7578_s23 }
 0x375   : > { %v3585_v2 = vmax.f32 %v3483_v54, 0.0  ;;  %v3486_v15 = vadd.f32 %v6030_v1, %v9335_v23  ;;  %v3902_v20 = vld [vmem:[#allocation2 + $0x89] sm:$0xff]  ;;  %v3903_v24 = vld [vmem:[#allocation2 + $0x91] sm:$0xff] }
 0x376   : > { %v4898_v14 = vpack.c.bf16 %v3903_v24, %v3902_v20  ;;  %v9577_v28 = vld [vmem:[#allocation2 + $0x8f] sm:$0xff]  ;;  %v9582_v23 = vld [vmem:[#allocation2 + $0x87] sm:$0xff]  ;;  %v9584_v3 = vpop.f32.mrb[24].mxu1 }
 0x377   : > { %3617 = vst.msk [vmem:[#allocation2 + $0xa8] sm:$0xff] %vm337_vm0, %v3585_v2  ;;  %v3586_v33 = vmax.f32 %v3486_v15, 0.0  ;;  %v6919_v58 = vpack.i.bf16 %v9577_v28, %v9582_v23  ;;  %v9588_v42 = vpop.f32.mrb[25].mxu1  ;;  %v9591_v62 = vld [vmem:[#allocation2 + $0x90] sm:$0xff] }
 0x378   : > { %6945 = vrot.lane.b32.xlu1 %v6899_v34, %s7575_s21  ;;  %v6031_v30 = vpop.f32.mrb[20].mxu0  ;;  %6289 = vmatprep.mubr.msk.bf16.mxu0 %vm337_vm0, %v4898_v14  ;;  %v9597_v52 = vpop.f32.mrb[26].mxu1  ;;  %v6929_v48 = vpack.i.bf16 %v9591_v62, %v9595_v37  ;;  %v6939_v34 = vpack.i.bf16 %v3903_v24, %v3902_v20 }
 0x379   : > { %6910 = vrot.lane.b32.xlu0 %v6909_v18, %s7575_s21  ;;  %3618 = vst.msk [vmem:[#allocation2 + $0xb0] sm:$0xff] %vm337_vm0, %v3586_v33  ;;  %v6032_v16 = vpop.f32.mrb[21].mxu0  ;;  %v9602_v51 = vpop.f32.mrb[27].mxu1 }
 0x37a   : > { %v6033_v26 = vadd.f32 %v6032_v16, %v6031_v30  ;;  %v6034_v60 = vpop.f32.mrb[22].mxu0 }
 0x37b   : > { %v6035_v55 = vpop.f32.mrb[23].mxu0 }
 0x37c   : > { %6955 = vrot.lane.b32.xlu1 %v6909_v18, %s7577_s17  ;;  %v3491_v21 = vadd.f32 %v9327_v38, %v6033_v26  ;;  %v6036_v41 = vadd.f32 %v6035_v55, %v6034_v60 }
 0x37d   : > { %6920 = vrot.lane.b32.xlu0 %v6919_v58, %s7577_s17 }
 0x37e   : > { %v3587_v12 = vmax.f32 %v3491_v21, 0.0  ;;  %v3494_v6 = vadd.f32 %v9333_v10, %v6036_v41  ;;  %v3840_v14 = vld [vmem:[#allocation2 + $0xa7] sm:$0xff] }
 0x37f   : > { %v3872_v55 = vld [vmem:[#allocation2 + $0xa8] sm:$0xff] }
 0x380   : > { %6965 = vrot.lane.b32.xlu1 %v6919_v58, %s7578_s23  ;;  %3619 = vst.msk [vmem:[#allocation2 + $0xc8] sm:$0xff] %vm337_vm0, %v3587_v12  ;;  %v3588_v38 = vmax.f32 %v3494_v6, 0.0  ;;  %v3904_v59 = vld [vmem:[#allocation2 + $0xa9] sm:$0xff]  ;;  %v3905_v22 = vld [vmem:[#allocation2 + $0xb1] sm:$0xff] }
 0x381   : > { %6930 = vrot.lane.b32.xlu0 %v6929_v48, %s7578_s23  ;;  %v4901_v56 = vpack.c.bf16 %v3905_v22, %v3904_v59  ;;  %v3841_v10 = vld [vmem:[#allocation2 + $0xaf] sm:$0xff] }
 0x382   : > { %3620 = vst.msk [vmem:[#allocation2 + $0xd0] sm:$0xff] %vm337_vm0, %v3588_v38  ;;  %v6949_v33 = vpack.i.bf16 %v3841_v10, %v3840_v14  ;;  %v3873_v20 = vld [vmem:[#allocation2 + $0xb0] sm:$0xff]  ;;  %v6969_v38 = vpack.i.bf16 %v3905_v22, %v3904_v59 }
 0x383   : > { %v6037_v1 = vpop.f32.mrb[24].mxu0  ;;  %6290 = vmatmul.mubr.msk.bf16.gmra.mrb[68].mxu0 %vm337_vm0, %v4901_v56  ;;  %v6959_v41 = vpack.i.bf16 %v3873_v20, %v3872_v55 }
 0x384   : > { %6975 = vrot.lane.b32.xlu1 %v6929_v48, %s7575_s21  ;;  %v6038_v54 = vpop.f32.mrb[25].mxu0 }
 0x385   : > { %6940 = vrot.lane.b32.xlu0 %v6939_v34, %s7575_s21  ;;  %v6039_v2 = vadd.f32 %v6038_v54, %v6037_v1  ;;  %v6040_v15 = vpop.f32.mrb[26].mxu0 }
 0x386   : > { %v6041_v18 = vpop.f32.mrb[27].mxu0 }
 0x387   : > { %v6042_v30 = vadd.f32 %v6041_v18, %v6040_v15  ;;  %v3499_v16 = vadd.f32 %v6039_v2, %v9357_v19  ;;  %v3842_v54 = vld [vmem:[#allocation2 + $0xc7] sm:$0xff] }
 0x388   : > { %6985 = vrot.lane.b32.xlu1 %v6939_v34, %s7577_s17  ;;  %v3874_v20 = vld [vmem:[#allocation2 + $0xc8] sm:$0xff] }
 0x389   : > { %6950 = vrot.lane.b32.xlu0 %v6949_v33, %s7577_s17  ;;  %v3589_v24 = vmax.f32 %v3499_v16, 0.0  ;;  %v3502_v26 = vadd.f32 %v6042_v30, %v9361_v63  ;;  %v3906_v60 = vld [vmem:[#allocation2 + $0xc9] sm:$0xff]  ;;  %v3907_v58 = vld [vmem:[#allocation2 + $0xd1] sm:$0xff] }
 0x38a   : > { %v4904_v21 = vpack.c.bf16 %v3907_v58, %v3906_v60  ;;  %v3843_v34 = vld [vmem:[#allocation2 + $0xcf] sm:$0xff]  ;;  %v9623_v2 = vpop.f32.mrb[28].mxu1 }
 0x38b   : > { %3621 = vst.msk [vmem:[#allocation2 + $0xe8] sm:$0xff] %vm337_vm0, %v3589_v24  ;;  %v3590_v12 = vmax.f32 %v3502_v26, 0.0  ;;  %v6979_v18 = vpack.i.bf16 %v3843_v34, %v3842_v54  ;;  %v3875_v59 = vld [vmem:[#allocation2 + $0xd0] sm:$0xff] }
 0x38c   : > { %6995 = vrot.lane.b32.xlu1 %v6949_v33, %s7578_s23  ;;  %v6043_v6 = vpop.f32.mrb[28].mxu0  ;;  %6293 = vmatprep.mubr.msk.bf16.mxu0 %vm337_vm0, %v4904_v21  ;;  %v9626_v33 = vpop.f32.mrb[29].mxu1 }
 0x38d   : > { %6960 = vrot.lane.b32.xlu0 %v6959_v41, %s7578_s23  ;;  %3622 = vst.msk [vmem:[#allocation2 + $0xf0] sm:$0xff] %vm337_vm0, %v3590_v12  ;;  %v6044_v19 = vpop.f32.mrb[29].mxu0  ;;  %v9631_v24 = vpop.f32.mrb[30].mxu1 }
 0x38e   : > { %v6045_v48 = vadd.f32 %v6044_v19, %v6043_v6  ;;  %v6046_v63 = vpop.f32.mrb[30].mxu0  ;;  %v9634_v26 = vpop.f32.mrb[31].mxu1  ;;  %v6999_v19 = vpack.i.bf16 %v3907_v58, %v3906_v60 }
 0x38f   : > { %v6047_v56 = vpop.f32.mrb[31].mxu0 }
 0x390   : > { %7005 = vrot.lane.b32.xlu1 %v6959_v41, %s7575_s21  ;;  %v3507_v1 = vadd.f32 %v9355_v25, %v6045_v48  ;;  %v6048_v10 = vadd.f32 %v6047_v56, %v6046_v63 }
 0x391   : > { %6970 = vrot.lane.b32.xlu0 %v6969_v38, %s7575_s21 }
 0x392   : > { %v3591_v15 = vmax.f32 %v3507_v1, 0.0  ;;  %v3510_v14 = vadd.f32 %v9359_v11, %v6048_v10  ;;  %v6989_v11 = vpack.i.bf16 %v3875_v59, %v3874_v20  ;;  %v3844_v54 = vld [vmem:[#allocation2 + $0xe7] sm:$0xff] }
 0x394   : > { %7015 = vrot.lane.b32.xlu1 %v6969_v38, %s7577_s17  ;;  %3623 = vst.msk [vmem:[#allocation2 + $0x108] sm:$0xff] %vm337_vm0, %v3591_v15  ;;  %v3592_v22 = vmax.f32 %v3510_v14, 0.0  ;;  %v3908_v25 = vld [vmem:[#allocation2 + $0xe9] sm:$0xff]  ;;  %v3909_v30 = vld [vmem:[#allocation2 + $0xf1] sm:$0xff] }
 0x395   : > { %6980 = vrot.lane.b32.xlu0 %v6979_v18, %s7577_s17  ;;  %v4907_v16 = vpack.c.bf16 %v3909_v30, %v3908_v25  ;;  %v3845_v38 = vld [vmem:[#allocation2 + $0xef] sm:$0xff] }
 0x396   : > { %3624 = vst.msk [vmem:[#allocation2 + $0x110] sm:$0xff] %vm337_vm0, %v3592_v22  ;;  %v7009_v14 = vpack.i.bf16 %v3845_v38, %v3844_v54  ;;  %v3877_v60 = vld [vmem:[#allocation2 + $0xf0] sm:$0xff] }
 0x397   : > { %v6049_v55 = vpop.f32.mrb[32].mxu0  ;;  %6294 = vmatmul.mubr.msk.bf16.gmra.mrb[72].mxu0 %vm337_vm0, %v4907_v16 }
 0x398   : > { %7025 = vrot.lane.b32.xlu1 %v6979_v18, %s7578_s23  ;;  %v6050_v21 = vpop.f32.mrb[33].mxu0 }
 0x399   : > { %6990 = vrot.lane.b32.xlu0 %v6989_v11, %s7578_s23  ;;  %v6051_v41 = vadd.f32 %v6050_v21, %v6049_v55  ;;  %v6052_v12 = vpop.f32.mrb[34].mxu0 }
 0x39a   : > { %v6053_v6 = vpop.f32.mrb[35].mxu0 }
 0x39b   : > { %v6054_v48 = vadd.f32 %v6053_v6, %v6052_v12  ;;  %v3515_v63 = vadd.f32 %v6051_v41, %v9393_v50  ;;  %v7029_v12 = vpack.i.bf16 %v3909_v30, %v3908_v25  ;;  %v3878_v25 = vld [vmem:[#allocation2 + $0x108] sm:$0xff] }
 0x39c   : > { %7035 = vrot.lane.b32.xlu1 %v6989_v11, %s7575_s21 }
 0x39d   : > { %7000 = vrot.lane.b32.xlu0 %v6999_v19, %s7575_s21  ;;  %v3593_v56 = vmax.f32 %v3515_v63, 0.0  ;;  %v3518_v34 = vadd.f32 %v6054_v48, %v9399_v4  ;;  %v3910_v1 = vld [vmem:[#allocation2 + $0x109] sm:$0xff]  ;;  %v3911_v10 = vld [vmem:[#allocation2 + $0x111] sm:$0xff] }
 0x39e   : > { %v4910_v15 = vpack.c.bf16 %v3911_v10, %v3910_v1  ;;  %v3876_v4 = vld [vmem:[#allocation2 + $0xe8] sm:$0xff] }
 0x39f   : > { %3625 = vst.msk [vmem:[#allocation2 + $0x128] sm:$0xff] %vm337_vm0, %v3593_v56  ;;  %v3594_v18 = vmax.f32 %v3518_v34, 0.0  ;;  %v7019_v16 = vpack.i.bf16 %v3877_v60, %v3876_v4  ;;  %v3847_v6 = vld [vmem:[#allocation2 + $0x10f] sm:$0xff]  ;;  %v3846_v56 = vld [vmem:[#allocation2 + $0x107] sm:$0xff] }
 0x3a0   : > { %7045 = vrot.lane.b32.xlu1 %v6999_v19, %s7577_s17  ;;  %v6055_v50 = vpop.f32.mrb[36].mxu0  ;;  %6297 = vmatprep.mubr.msk.bf16.mxu0 %vm337_vm0, %v4910_v15 }
 0x3a1   : > { %7010 = vrot.lane.b32.xlu0 %v7009_v14, %s7577_s17  ;;  %3626 = vst.msk [vmem:[#allocation2 + $0x130] sm:$0xff] %vm337_vm0, %v3594_v18  ;;  %v6056_v58 = vpop.f32.mrb[37].mxu0 }
 0x3a2   : > { %v6057_v59 = vadd.f32 %v6056_v58, %v6055_v50  ;;  %v6058_v22 = vpop.f32.mrb[38].mxu0 }
 0x3a3   : > { %v6059_v20 = vpop.f32.mrb[39].mxu0 }
 0x3a4   : > { %7055 = vrot.lane.b32.xlu1 %v7009_v14, %s7578_s23  ;;  %v3523_v11 = vadd.f32 %v9389_v61, %v6057_v59  ;;  %v6060_v55 = vadd.f32 %v6059_v20, %v6058_v22  ;;  %v7039_v61 = vpack.i.bf16 %v3847_v6, %v3846_v56  ;;  %v7059_v14 = vpack.i.bf16 %v3911_v10, %v3910_v1  ;;  %v3642_v56 = vld [vmem:[#allocation2 + $0x7] sm:$0xff] }
 0x3a5   : > { %7020 = vrot.lane.b32.xlu0 %v7019_v16, %s7578_s23 }
 0x3a6   : > { %v3595_v21 = vmax.f32 %v3523_v11, 0.0  ;;  %v3526_v41 = vadd.f32 %v9397_v36, %v6060_v55  ;;  %v3879_v36 = vld [vmem:[#allocation2 + $0x110] sm:$0xff]  ;;  %v3848_v60 = vld [vmem:[#allocation2 + $0x127] sm:$0xff] }
 0x3a7   : > { %v7049_v30 = vpack.i.bf16 %v3879_v36, %v3878_v25  ;;  %v3880_v4 = vld [vmem:[#allocation2 + $0x128] sm:$0xff] }
 0x3a8   : > { %7065 = vrot.lane.b32.xlu1 %v7019_v16, %s7575_s21  ;;  %3627 = vst.msk [vmem:[#allocation2 + $0x148] sm:$0xff] %vm337_vm0, %v3595_v21  ;;  %v3596_v19 = vmax.f32 %v3526_v41, 0.0  ;;  %v3912_v48 = vld [vmem:[#allocation2 + $0x129] sm:$0xff]  ;;  %v3913_v63 = vld [vmem:[#allocation2 + $0x131] sm:$0xff]  ;;  %v6856_v16 = vpop.permute.xlu1 %6855 }
 0x3a9   : > { %7030 = vrot.lane.b32.xlu0 %v7029_v12, %s7575_s21  ;;  %v4913_v38 = vpack.c.bf16 %v3913_v63, %v3912_v48  ;;  %v3849_v18 = vld [vmem:[#allocation2 + $0x12f] sm:$0xff]  ;;  %v7089_v1 = vpack.i.bf16 %v3913_v63, %v3912_v48  ;;  %v6858_v48 = vunpack.i.h.bf16 %v6856_v16  ;;  %v6857_v63 = vunpack.i.l.bf16 %v6856_v16 }
 0x3aa   : > { %3628 = vst.msk [vmem:[#allocation2 + $0x150] sm:$0xff] %vm337_vm0, %v3596_v19  ;;  %v7069_v50 = vpack.i.bf16 %v3849_v18, %v3848_v60  ;;  %v3881_v58 = vld [vmem:[#allocation2 + $0x130] sm:$0xff] }
 0x3ab   : > { %6298 = vmatmul.mubr.msk.bf16.gmra.mrb[76].mxu0 %vm337_vm0, %v4913_v38  ;;  %v7079_v59 = vpack.i.bf16 %v3881_v58, %v3880_v4 }
 0x3ac   : > { %7075 = vrot.lane.b32.xlu1 %v7029_v12, %s7577_s17  ;;  %v6866_v41 = vpop.permute.xlu1 %6865 }
 0x3ad   : > { %7040 = vrot.lane.b32.xlu0 %v7039_v61, %s7577_s17  ;;  %v6868_v36 = vunpack.i.h.bf16 %v6866_v41  ;;  %v6867_v25 = vunpack.i.l.bf16 %v6866_v41 }
 0x3af   : > { %v3850_v22 = vld [vmem:[#allocation2 + $0x147] sm:$0xff] }
 0x3b0   : > { %7085 = vrot.lane.b32.xlu1 %v7039_v61, %s7578_s23  ;;  %v3882_v55 = vld [vmem:[#allocation2 + $0x148] sm:$0xff] }
 0x3b1   : > { %7050 = vrot.lane.b32.xlu0 %v7049_v30, %s7578_s23  ;;  %v3914_v34 = vld [vmem:[#allocation2 + $0x149] sm:$0xff]  ;;  %v3915_v54 = vld [vmem:[#allocation2 + $0x151] sm:$0xff] }
 0x3b2   : > { %v4916_v15 = vpack.c.bf16 %v3915_v54, %v3914_v34  ;;  %v3851_v10 = vld [vmem:[#allocation2 + $0x14f] sm:$0xff]  ;;  %v7119_v12 = vpack.i.bf16 %v3915_v54, %v3914_v34  ;;  %v4698_v54 = vsel %vm337_vm0, %v3642_v56, %v6857_v63 }
 0x3b3   : > { %v7099_v20 = vpack.i.bf16 %v3851_v10, %v3850_v22  ;;  %v3883_v11 = vld [vmem:[#allocation2 + $0x150] sm:$0xff] }
 0x3b4   : > { %7095 = vrot.lane.b32.xlu1 %v7049_v30, %s7575_s21  ;;  %6301 = vmatprep.mubr.msk.bf16.mxu0 %vm337_vm0, %v4916_v15  ;;  %v7109_v21 = vpack.i.bf16 %v3883_v11, %v3882_v55  ;;  %v3643_v61 = vld [vmem:[#allocation2 + $0xf] sm:$0xff] }
 0x3b5   : > { %7060 = vrot.lane.b32.xlu0 %v7059_v14, %s7575_s21  ;;  %v4699_v34 = vsel %vm337_vm0, %v3643_v61, %v6858_v48 }
 0x3b8   : > { %7105 = vrot.lane.b32.xlu1 %v7059_v14, %s7577_s17 }
 0x3b9   : > { %7070 = vrot.lane.b32.xlu0 %v7069_v50, %s7577_s17 }
 0x3bc   : > { %7115 = vrot.lane.b32.xlu1 %v7069_v50, %s7578_s23 }
 0x3bd   : > { %7080 = vrot.lane.b32.xlu0 %v7079_v59, %s7578_s23 }
 0x3c0   : > { %7125 = vrot.lane.b32.xlu1 %v7079_v59, %s7575_s21  ;;  %v4730_v59 = vsel %vm2853_vm11, %v4698_v54, %v6867_v25 }
 0x3c1   : > { %7090 = vrot.lane.b32.xlu0 %v7089_v1, %s7575_s21 }
 0x3c4   : > { %7135 = vrot.lane.b32.xlu1 %v7089_v1, %s7577_s17  ;;  %v4731_v1 = vsel %vm2853_vm11, %v4699_v34, %v6868_v36 }
 0x3c5   : > { %7100 = vrot.lane.b32.xlu0 %v7099_v20, %s7577_s17 }
 0x3c8   : > { %7145 = vrot.lane.b32.xlu1 %v7099_v20, %s7578_s23 }
 0x3c9   : > { %7110 = vrot.lane.b32.xlu0 %v7109_v21, %s7578_s23 }
 0x3cc   : > { %7155 = vrot.lane.b32.xlu1 %v7109_v21, %s7575_s21 }
 0x3cd   : > { %7120 = vrot.lane.b32.xlu0 %v7119_v12, %s7575_s21  ;;  %v6851_v38 = vpop.permute.xlu0 %6850 }
 0x3ce   : > { %v6876_v6 = vpop.permute.xlu1 %6875  ;;  %v6853_v14 = vunpack.i.h.bf16 %v6851_v38  ;;  %v6852_v18 = vunpack.i.l.bf16 %v6851_v38 }
 0x3cf   : > { %v6878_v60 = vunpack.i.h.bf16 %v6876_v6  ;;  %v6877_v50 = vunpack.i.l.bf16 %v6876_v6 }
 0x3d0   : > { %7165 = vrot.lane.b32.xlu1 %v7119_v12, %s7577_s17  ;;  %v4795_v16 = vsel %vm337_vm0, %v9502_v57, %v6853_v14  ;;  %v4794_v20 = vsel %vm337_vm0, %v9506_v43, %v6852_v18 }
 0x3d1   : > { %v4763_v21 = vsel %vm2886_vm12, %v4731_v1, %v6878_v60  ;;  %v4762_v41 = vsel %vm2886_vm12, %v4730_v59, %v6877_v50  ;;  %v7507_v1 = vld [vmem:[%s10470_s2 + $0x80] sm:$0xff]  }
 0x3d2   : > { %v9677_v19 = vpop.permute.xlu1 %6885  ;;  %v4890_v36 = vpack.c.bf16 %v4763_v21, %v4762_v41 }
 0x3d3   : > { %v6887_v14 = vunpack.i.l.bf16 %v9677_v19 }
 0x3d5   : > { %v4700_v41 = vsel %vm337_vm0, %v9488_v13, %v6887_v14 }
 0x3d6   : > { %v9679_v30 = vpop.permute.xlu1 %6895  ;;  %v6861_v15 = vpop.permute.xlu0 %6860 }
 0x3d7   : > { %v6863_v58 = vunpack.i.h.bf16 %v6861_v15  ;;  %v6862_v4 = vunpack.i.l.bf16 %v6861_v15  ;;  %v6888_v15 = vunpack.i.h.bf16 %v9677_v19 }
 0x3d9   : > { %v4826_v12 = vsel %vm2853_vm11, %v4794_v20, %v6862_v4  ;;  %v4827_v6 = vsel %vm2853_vm11, %v4795_v16, %v6863_v58  ;;  %v6898_v58 = vunpack.i.h.bf16 %v9679_v30  ;;  %v6897_v4 = vunpack.i.l.bf16 %v9679_v30 }
 0x3da   : > { %v6906_v10 = vpop.permute.xlu1 %6905  ;;  %v6871_v22 = vpop.permute.xlu0 %6870 }
 0x3db   : > { %v6873_v11 = vunpack.i.h.bf16 %v6871_v22  ;;  %v6872_v55 = vunpack.i.l.bf16 %v6871_v22 }
 0x3dd   : > { %v6061_v63 = vpop.f32.mrb[40].mxu0  ;;  %v4858_v38 = vsel %vm2886_vm12, %v4826_v12, %v6872_v55  ;;  %v4859_v57 = vsel %vm2886_vm12, %v4827_v6, %v6873_v11  ;;  %v6908_v11 = vunpack.i.h.bf16 %v6906_v10  ;;  %v6907_v55 = vunpack.i.l.bf16 %v6906_v10 }
 0x3de   : > { %v9693_v48 = vpop.permute.xlu1 %6915  ;;  %v6881_v56 = vpop.permute.xlu0 %6880  ;;  %v4891_v43 = vpack.c.bf16 %v4859_v57, %v4858_v38  ;;  %v4701_v12 = vsel %vm337_vm0, %v9491_v44, %v6888_v15 }
 0x3df   : > { %v6062_v61 = vpop.f32.mrb[41].mxu0  ;;  %v6883_v22 = vunpack.i.h.bf16 %v6881_v56  ;;  %v6882_v16 = vunpack.i.l.bf16 %v6881_v56  ;;  %v4733_v38 = vsel %vm2853_vm11, %v4701_v12, %v6898_v58 }
 0x3e0   : > { %v6063_v25 = vadd.f32 %v6062_v61, %v6061_v63  ;;  %v6064_v34 = vpop.f32.mrb[42].mxu0  ;;  %5168 = vmatprep.mubr.bf16.mxu1 %v4891_v43 }
 0x3e1   : > { %v6065_v54 = vpop.f32.mrb[43].mxu0  ;;  %5169 = vmatmul.mubr.bf16.vlgmr.msra.gmra.mrb[32].mxu1 %v4890_v36  ;;  %v4797_v10 = vsel %vm337_vm0, %v9534_v0, %v6883_v22  ;;  %v4796_v13 = vsel %vm337_vm0, %v9541_v27, %v6882_v16  ;;  %v6917_v27 = vunpack.i.l.bf16 %v9693_v48  ;;  %v6918_v22 = vunpack.i.h.bf16 %v9693_v48 }
 0x3e2   : > { %v3531_v18 = vadd.f32 %v6063_v25, %v9530_v49  ;;  %v6066_v60 = vadd.f32 %v6065_v54, %v6064_v34  ;;  %v9700_v50 = vpop.permute.xlu1 %6925  ;;  %v6891_v59 = vpop.permute.xlu0 %6890  ;;  %6319 = vmatpush3.bf16.msra.mxu1 %v7507_v1  ;;  %v7508_v49 = vld [vmem:[%s10470_s2 + $0x88] sm:$0xff]   ;;  %v4765_v25 = vsel %vm2886_vm12, %v4733_v38, %v6908_v11 }
 0x3e3   : > { %6318 = vmatprep.subr.bf16.mxu1 %v7508_v49  ;;  %v6893_v21 = vunpack.i.h.bf16 %v6891_v59  ;;  %v6892_v30 = vunpack.i.l.bf16 %v6891_v59  ;;  %v6927_v16 = vunpack.i.l.bf16 %v9700_v50  ;;  %v4702_v11 = vsel %vm337_vm0, %v9518_v5, %v6917_v27 }
 0x3e4   : > { %v3597_v20 = vmax.f32 %v3531_v18, 0.0  ;;  %v3534_v19 = vadd.f32 %v6066_v60, %v9543_v31  ;;  %v4732_v31 = vsel %vm2853_vm11, %v4700_v41, %v6897_v4 }
 0x3e5   : > { %v4829_v61 = vsel %vm2853_vm11, %v4797_v10, %v6893_v21  ;;  %v4828_v43 = vsel %vm2853_vm11, %v4796_v13, %v6892_v30  ;;  %v4764_v36 = vsel %vm2886_vm12, %v4732_v31, %v6907_v55  ;;  %v6928_v55 = vunpack.i.h.bf16 %v9700_v50 }
 0x3e6   : > { %3629 = vst.msk [vmem:[#allocation2 + $0x168] sm:$0xff] %vm337_vm0, %v3597_v20  ;;  %v3598_v6 = vmax.f32 %v3534_v19, 0.0  ;;  %v9716_v63 = vpop.permute.xlu1 %6935  ;;  %v6901_v57 = vpop.permute.xlu0 %6900  ;;  %6320 = vmatpush3.bf16.msra.mxu1 %v7508_v49  ;;  %v4893_v59 = vpack.c.bf16 %v4765_v25, %v4764_v36 }
 0x3e7   : > { %v6903_v44 = vunpack.i.h.bf16 %v6901_v57  ;;  %v6902_v56 = vunpack.i.l.bf16 %v6901_v57  ;;  %v6938_v21 = vunpack.i.h.bf16 %v9716_v63  ;;  %v6937_v30 = vunpack.i.l.bf16 %v9716_v63 }
 0x3e8   : > { %3630 = vst.msk [vmem:[#allocation2 + $0x170] sm:$0xff] %vm337_vm0, %v3598_v6  ;;  %v4734_v63 = vsel %vm2853_vm11, %v4702_v11, %v6927_v16 }
 0x3e9   : > { %v6067_v34 = vpop.f32.mrb[44].mxu0  ;;  %v4860_v0 = vsel %vm2886_vm12, %v4828_v43, %v6902_v56  ;;  %v4861_v15 = vsel %vm2886_vm12, %v4829_v61, %v6903_v44  ;;  %v4703_v56 = vsel %vm337_vm0, %v9524_v35, %v6918_v22 }
 0x3ea   : > { %v9729_v54 = vpop.permute.xlu1 %6945  ;;  %v6068_v14 = vpop.f32.mrb[45].mxu0  ;;  %v4894_v60 = vpack.c.bf16 %v4861_v15, %v4860_v0 }
 0x3eb   : > { %v6911_v18 = vpop.permute.xlu0 %6910  ;;  %v6069_v58 = vadd.f32 %v6068_v14, %v6067_v34  ;;  %v6070_v4 = vpop.f32.mrb[46].mxu0  ;;  %v4766_v34 = vsel %vm2886_vm12, %v4734_v63, %v6937_v30  ;;  %v6947_v22 = vunpack.i.l.bf16 %v9729_v54 }
 0x3ec   : > { %v6071_v1 = vpop.f32.mrb[47].mxu0  ;;  %5176 = vmatprep.mubr.bf16.mxu1 %v4894_v60  ;;  %v6913_v38 = vunpack.i.h.bf16 %v6911_v18 }
 0x3ed   : > { %v3539_v20 = vadd.f32 %v9526_v47, %v6069_v58  ;;  %v6072_v19 = vadd.f32 %v6071_v1, %v6070_v4  ;;  %5177 = vmatmul.mubr.bf16.gmra.mrb[36].mxu1 %v4893_v59  ;;  %v6912_v47 = vunpack.i.l.bf16 %v6911_v18  ;;  %v9745_v10 = vld [vmem:[#allocation2 + $0x167] sm:$0xff] }
 0x3ee   : > { %v9737_v49 = vpop.permute.xlu1 %6955  ;;  %v4799_v35 = vsel %vm337_vm0, %v9564_v17, %v6913_v38  ;;  %v9766_v14 = vld [vmem:[#allocation2 + $0x168] sm:$0xff] }
 0x3ef   : > { %v6921_v41 = vpop.permute.xlu0 %6920  ;;  %v3916_v12 = vld [vmem:[#allocation2 + $0x169] sm:$0xff]  ;;  %v3917_v48 = vld [vmem:[#allocation2 + $0x171] sm:$0xff]  ;;  %v3599_v31 = vmax.f32 %v3539_v20, 0.0  ;;  %v3542_v57 = vadd.f32 %v9536_v9, %v6072_v19  ;;  %v4735_v9 = vsel %vm2853_vm11, %v4703_v56, %v6928_v55  ;;  %v4798_v0 = vsel %vm337_vm0, %v9567_v45, %v6912_v47 }
 0x3f0   : > { %v3853_v6 = vld [vmem:[#allocation2 + $0x16f] sm:$0xff]  ;;  %v6923_v13 = vunpack.i.h.bf16 %v6921_v41  ;;  %v6922_v44 = vunpack.i.l.bf16 %v6921_v41  ;;  %v4919_v5 = vpack.c.bf16 %v3917_v48, %v3916_v12  ;;  %v4767_v17 = vsel %vm2886_vm12, %v4735_v9, %v6938_v21 }
 0x3f1   : > { %v7129_v50 = vpack.i.bf16 %v3853_v6, %v9745_v10  ;;  %3631 = vst.msk [vmem:[#allocation2 + $0x188] sm:$0xff] %vm337_vm0, %v3599_v31  ;;  %v3600_v61 = vmax.f32 %v3542_v57, 0.0  ;;  %v9754_v36 = vld [vmem:[#allocation2 + $0x170] sm:$0xff]  ;;  %v4896_v30 = vpack.c.bf16 %v4767_v17, %v4766_v34  ;;  %v7149_v41 = vpack.i.bf16 %v3917_v48, %v3916_v12 }
 0x3f2   : > { %v9752_v43 = vpop.permute.xlu1 %6965  ;;  %6302 = vmatmul.mubr.msk.bf16.gmra.mrb[80].mxu0 %vm337_vm0, %v4919_v5  ;;  %v4830_v18 = vsel %vm2853_vm11, %v4798_v0, %v6922_v44  ;;  %v4831_v60 = vsel %vm2853_vm11, %v4799_v35, %v6923_v13  ;;  %v7139_v58 = vpack.i.bf16 %v9754_v36, %v9766_v14  ;;  %v6948_v6 = vunpack.i.h.bf16 %v9729_v54 }
 0x3f3   : > { %7130 = vrot.lane.b32.xlu0 %v7129_v50, %s7577_s17  ;;  %v6931_v25 = vpop.permute.xlu0 %6930  ;;  %3632 = vst.msk [vmem:[#allocation2 + $0x190] sm:$0xff] %vm337_vm0, %v3600_v61  ;;  %7175 = vrot.lane.b32.xlu1 %v7129_v50, %s7578_s23  ;;  %v6957_v31 = vunpack.i.l.bf16 %v9737_v49  ;;  %v4704_v13 = vsel %vm337_vm0, %v9553_v46, %v6947_v22  ;;  %v6958_v44 = vunpack.i.h.bf16 %v9737_v49  ;;  %v6968_v5 = vunpack.i.h.bf16 %v9752_v43 }
 0x3f4   : > { %v6933_v15 = vunpack.i.h.bf16 %v6931_v25  ;;  %v6932_v27 = vunpack.i.l.bf16 %v6931_v25  ;;  %v6967_v50 = vunpack.i.l.bf16 %v9752_v43  ;;  %v4705_v35 = vsel %vm337_vm0, %v9557_v29, %v6948_v6 }
 0x3f5   : > { %v6073_v4 = vpop.f32.mrb[48].mxu0  ;;  %v4736_v0 = vsel %vm2853_vm11, %v4704_v13, %v6957_v31 }
 0x3f6   : > { %v9773_v59 = vpop.permute.xlu1 %6975  ;;  %v4862_v45 = vsel %vm2886_vm12, %v4830_v18, %v6932_v27  ;;  %v4863_v1 = vsel %vm2886_vm12, %v4831_v60, %v6933_v15  ;;  %v6074_v16 = vpop.f32.mrb[49].mxu0  ;;  %v4737_v18 = vsel %vm2853_vm11, %v4705_v35, %v6958_v44 }
 0x3f7   : > { %7140 = vrot.lane.b32.xlu0 %v7139_v58, %s7578_s23  ;;  %v6941_v20 = vpop.permute.xlu0 %6940  ;;  %v4897_v19 = vpack.c.bf16 %v4863_v1, %v4862_v45  ;;  %7185 = vrot.lane.b32.xlu1 %v7139_v58, %s7575_s21  ;;  %v6075_v11 = vadd.f32 %v6074_v16, %v6073_v4  ;;  %v6076_v55 = vpop.f32.mrb[50].mxu0  ;;  %v4768_v58 = vsel %vm2886_vm12, %v4736_v0, %v6967_v50 }
 0x3f8   : > { %v6077_v21 = vpop.f32.mrb[51].mxu0  ;;  %v6943_v63 = vunpack.i.h.bf16 %v6941_v20  ;;  %v6942_v61 = vunpack.i.l.bf16 %v6941_v20  ;;  %v9795_v46 = vld [vmem:[#allocation2 + $0x187] sm:$0xff] }
 0x3f9   : > { %5184 = vmatprep.mubr.bf16.mxu1 %v4897_v19  ;;  %v3547_v38 = vadd.f32 %v6075_v11, %v9588_v42  ;;  %v6078_v47 = vadd.f32 %v6077_v21, %v6076_v55  ;;  %v9817_v1 = vld [vmem:[#allocation2 + $0x188] sm:$0xff] }
 0x3fa   : > { %5185 = vmatmul.mubr.bf16.gmra.mrb[40].mxu1 %v4896_v30  ;;  %v9783_v57 = vpop.permute.xlu1 %6985  ;;  %v3918_v12 = vld [vmem:[#allocation2 + $0x189] sm:$0xff]  ;;  %v3919_v48 = vld [vmem:[#allocation2 + $0x191] sm:$0xff]  ;;  %v4801_v29 = vsel %vm337_vm0, %v9591_v62, %v6943_v63  ;;  %v4800_v17 = vsel %vm337_vm0, %v9595_v37, %v6942_v61  ;;  %v4769_v62 = vsel %vm2886_vm12, %v4737_v18, %v6968_v5  ;;  %v6977_v30 = vunpack.i.l.bf16 %v9773_v59 }
 0x3fb   : > { %7150 = vrot.lane.b32.xlu0 %v7149_v41, %s7575_s21  ;;  %v6951_v54 = vpop.permute.xlu0 %6950  ;;  %v9791_v56 = vld [vmem:[#allocation2 + $0x18f] sm:$0xff]  ;;  %v3601_v42 = vmax.f32 %v3547_v38, 0.0  ;;  %v3550_v9 = vadd.f32 %v6078_v47, %v9602_v51  ;;  %7195 = vrot.lane.b32.xlu1 %v7149_v41, %s7577_s17  ;;  %v4922_v34 = vpack.c.bf16 %v3919_v48, %v3918_v12  ;;  %v4899_v47 = vpack.c.bf16 %v4769_v62, %v4768_v58 }
 0x3fc   : > { %v6953_v49 = vunpack.i.h.bf16 %v6951_v54  ;;  %v6952_v25 = vunpack.i.l.bf16 %v6951_v54  ;;  %v7159_v43 = vpack.i.bf16 %v9791_v56, %v9795_v46  ;;  %v9805_v51 = vld [vmem:[#allocation2 + $0x190] sm:$0xff]  ;;  %v7179_v44 = vpack.i.bf16 %v3919_v48, %v3918_v12 }
 0x3fd   : > { %3633 = vst.msk [vmem:[#allocation2 + $0x1a8] sm:$0xff] %vm337_vm0, %v3601_v42  ;;  %v3602_v15 = vmax.f32 %v3550_v9, 0.0  ;;  %6305 = vmatprep.mubr.msk.bf16.mxu0 %vm337_vm0, %v4922_v34  ;;  %v7169_v20 = vpack.i.bf16 %v9805_v51, %v9817_v1  ;;  %v6978_v5 = vunpack.i.h.bf16 %v9773_v59  ;;  %v6987_v50 = vunpack.i.l.bf16 %v9783_v57 }
 0x3fe   : > { %v9803_v27 = vpop.permute.xlu1 %6995  ;;  %v4832_v22 = vsel %vm2853_vm11, %v4800_v17, %v6952_v25  ;;  %v4833_v16 = vsel %vm2853_vm11, %v4801_v29, %v6953_v49  ;;  %v4706_v61 = vsel %vm337_vm0, %v9582_v23, %v6977_v30  ;;  %v6988_v9 = vunpack.i.h.bf16 %v9783_v57 }
 0x3ff   : > { %7160 = vrot.lane.b32.xlu0 %v7159_v43, %s7577_s17  ;;  %v6961_v60 = vpop.permute.xlu0 %6960  ;;  %3634 = vst.msk [vmem:[#allocation2 + $0x1b0] sm:$0xff] %vm337_vm0, %v3602_v15  ;;  %7205 = vrot.lane.b32.xlu1 %v7159_v43, %s7578_s23  ;;  %v6998_v49 = vunpack.i.h.bf16 %v9803_v27  ;;  %v6997_v25 = vunpack.i.l.bf16 %v9803_v27  ;;  %v4738_v58 = vsel %vm2853_vm11, %v4706_v61, %v6987_v50 }
 0x400   : > { %v6963_v4 = vunpack.i.h.bf16 %v6961_v60  ;;  %v6962_v45 = vunpack.i.l.bf16 %v6961_v60  ;;  %v4707_v60 = vsel %vm337_vm0, %v9577_v28, %v6978_v5 }
 0x401   : > { %v6079_v19 = vpop.f32.mrb[52].mxu0  ;;  %v4770_v28 = vsel %vm2886_vm12, %v4738_v58, %v6997_v25 }
 0x402   : > { %v9824_v11 = vpop.permute.xlu1 %7005  ;;  %v4864_v37 = vsel %vm2886_vm12, %v4832_v22, %v6962_v45  ;;  %v4865_v55 = vsel %vm2886_vm12, %v4833_v16, %v6963_v4  ;;  %v6080_v21 = vpop.f32.mrb[53].mxu0  ;;  %v4739_v4 = vsel %vm2853_vm11, %v4707_v60, %v6988_v9  ;;  %v3778_v45 = vld [vmem:[#allocation2 + $0xa8] sm:$0xff]  ;;  %v3779_v22 = vld [vmem:[#allocation2 + $0xb0] sm:$0xff] }
 0x403   : > { %7170 = vrot.lane.b32.xlu0 %v7169_v20, %s7578_s23  ;;  %v6971_v41 = vpop.permute.xlu0 %6970  ;;  %v4900_v6 = vpack.c.bf16 %v4865_v55, %v4864_v37  ;;  %7215 = vrot.lane.b32.xlu1 %v7169_v20, %s7575_s21  ;;  %v6081_v31 = vadd.f32 %v6080_v21, %v6079_v19  ;;  %v6082_v38 = vpop.f32.mrb[54].mxu0 }
 0x404   : > { %v6083_v13 = vpop.f32.mrb[55].mxu0  ;;  %v6973_v43 = vunpack.i.h.bf16 %v6971_v41  ;;  %v6972_v35 = vunpack.i.l.bf16 %v6971_v41  ;;  %v9846_v23 = vld [vmem:[#allocation2 + $0x1a7] sm:$0xff] }
 0x405   : > { %5192 = vmatprep.mubr.bf16.mxu1 %v4900_v6  ;;  %v3555_v54 = vadd.f32 %v9584_v3, %v6081_v31  ;;  %v6084_v42 = vadd.f32 %v6083_v13, %v6082_v38  ;;  %v9866_v55 = vld [vmem:[#allocation2 + $0x1a8] sm:$0xff]  ;;  %v4771_v6 = vsel %vm2886_vm12, %v4739_v4, %v6998_v49 }
 0x406   : > { %v9834_v63 = vpop.permute.xlu1 %7015  ;;  %5193 = vmatmul.mubr.bf16.gmra.mrb[44].mxu1 %v4899_v47  ;;  %v3920_v12 = vld [vmem:[#allocation2 + $0x1a9] sm:$0xff]  ;;  %v3921_v48 = vld [vmem:[#allocation2 + $0x1b1] sm:$0xff]  ;;  %v4803_v20 = vsel %vm337_vm0, %v3779_v22, %v6973_v43  ;;  %v4802_v62 = vsel %vm337_vm0, %v3778_v45, %v6972_v35  ;;  %v4902_v9 = vpack.c.bf16 %v4771_v6, %v4770_v28 }
 0x407   : > { %7180 = vrot.lane.b32.xlu0 %v7179_v44, %s7575_s21  ;;  %v6981_v59 = vpop.permute.xlu0 %6980  ;;  %v9842_v34 = vld [vmem:[#allocation2 + $0x1af] sm:$0xff]  ;;  %v3603_v3 = vmax.f32 %v3555_v54, 0.0  ;;  %v3558_v0 = vadd.f32 %v9597_v52, %v6084_v42  ;;  %7225 = vrot.lane.b32.xlu1 %v7179_v44, %s7577_s17  ;;  %v4925_v18 = vpack.c.bf16 %v3921_v48, %v3920_v12  ;;  %v7007_v44 = vunpack.i.l.bf16 %v9824_v11 }
 0x408   : > { %v6983_v57 = vunpack.i.h.bf16 %v6981_v59  ;;  %v6982_v15 = vunpack.i.l.bf16 %v6981_v59  ;;  %v7189_v27 = vpack.i.bf16 %v9842_v34, %v9846_v23  ;;  %v9856_v52 = vld [vmem:[#allocation2 + $0x1b0] sm:$0xff]  ;;  %v7209_v25 = vpack.i.bf16 %v3921_v48, %v3920_v12  ;;  %v3652_v59 = vld [vmem:[#allocation2 + $0xa7] sm:$0xff] }
 0x409   : > { %3635 = vst.msk [vmem:[#allocation2 + $0x1c8] sm:$0xff] %vm337_vm0, %v3603_v3  ;;  %v3604_v29 = vmax.f32 %v3558_v0, 0.0  ;;  %6306 = vmatmul.mubr.msk.bf16.gmra.mrb[84].mxu0 %vm337_vm0, %v4925_v18  ;;  %v7199_v41 = vpack.i.bf16 %v9856_v52, %v9866_v55  ;;  %v7008_v3 = vunpack.i.h.bf16 %v9824_v11  ;;  %v7017_v43 = vunpack.i.l.bf16 %v9834_v63  ;;  %v3781_v6 = vld [vmem:[#allocation2 + $0xd0] sm:$0xff] }
 0x40a   : > { %v9854_v17 = vpop.permute.xlu1 %7025  ;;  %v4834_v30 = vsel %vm2853_vm11, %v4802_v62, %v6982_v15  ;;  %v4835_v21 = vsel %vm2853_vm11, %v4803_v20, %v6983_v57  ;;  %v4708_v15 = vsel %vm337_vm0, %v3652_v59, %v7007_v44  ;;  %v7018_v18 = vunpack.i.h.bf16 %v9834_v63  ;;  %v3653_v63 = vld [vmem:[#allocation2 + $0xaf] sm:$0xff] }
 0x40b   : > { %7190 = vrot.lane.b32.xlu0 %v7189_v27, %s7577_s17  ;;  %v6991_v16 = vpop.permute.xlu0 %6990  ;;  %3636 = vst.msk [vmem:[#allocation2 + $0x1d0] sm:$0xff] %vm337_vm0, %v3604_v29  ;;  %7235 = vrot.lane.b32.xlu1 %v7189_v27, %s7578_s23  ;;  %v7028_v27 = vunpack.i.h.bf16 %v9854_v17  ;;  %v7027_v60 = vunpack.i.l.bf16 %v9854_v17  ;;  %v4709_v62 = vsel %vm337_vm0, %v3653_v63, %v7008_v3 }
 0x40c   : > { %v6993_v19 = vunpack.i.h.bf16 %v6991_v16  ;;  %v6992_v37 = vunpack.i.l.bf16 %v6991_v16 }
 0x40d   : > { %v6085_v31 = vpop.f32.mrb[56].mxu0 }
 0x40e   : > { %v9873_v38 = vpop.permute.xlu1 %7035  ;;  %v4866_v47 = vsel %vm2886_vm12, %v4834_v30, %v6992_v37  ;;  %v4867_v13 = vsel %vm2886_vm12, %v4835_v21, %v6993_v19  ;;  %v6086_v5 = vpop.f32.mrb[57].mxu0  ;;  %v4740_v19 = vsel %vm2853_vm11, %v4708_v15, %v7017_v43  ;;  %v4741_v21 = vsel %vm2853_vm11, %v4709_v62, %v7018_v18 }
 0x40f   : > { %7200 = vrot.lane.b32.xlu0 %v7199_v41, %s7578_s23  ;;  %v7001_v50 = vpop.permute.xlu0 %7000  ;;  %v4903_v54 = vpack.c.bf16 %v4867_v13, %v4866_v47  ;;  %7245 = vrot.lane.b32.xlu1 %v7199_v41, %s7575_s21  ;;  %v6087_v42 = vadd.f32 %v6086_v5, %v6085_v31  ;;  %v6088_v61 = vpop.f32.mrb[58].mxu0  ;;  %v3780_v41 = vld [vmem:[#allocation2 + $0xc8] sm:$0xff]  ;;  %v4772_v47 = vsel %vm2886_vm12, %v4740_v19, %v7027_v60 }
 0x410   : > { %v6089_v49 = vpop.f32.mrb[59].mxu0  ;;  %v7003_v29 = vunpack.i.h.bf16 %v7001_v50  ;;  %v7002_v4 = vunpack.i.l.bf16 %v7001_v50  ;;  %v9894_v22 = vld [vmem:[#allocation2 + $0x1c7] sm:$0xff] }
 0x411   : > { %5200 = vmatprep.mubr.bf16.mxu1 %v4903_v54  ;;  %v3563_v35 = vadd.f32 %v6087_v42, %v9626_v33  ;;  %v6090_v0 = vadd.f32 %v6089_v49, %v6088_v61  ;;  %v9913_v54 = vld [vmem:[#allocation2 + $0x1c8] sm:$0xff]  ;;  %v4773_v49 = vsel %vm2886_vm12, %v4741_v21, %v7028_v27 }
 0x412   : > { %v9883_v57 = vpop.permute.xlu1 %7045  ;;  %5201 = vmatmul.mubr.bf16.gmra.mrb[48].mxu1 %v4902_v9  ;;  %v3922_v11 = vld [vmem:[#allocation2 + $0x1c9] sm:$0xff]  ;;  %v3923_v48 = vld [vmem:[#allocation2 + $0x1d1] sm:$0xff]  ;;  %v4805_v13 = vsel %vm337_vm0, %v3781_v6, %v7003_v29  ;;  %v4804_v44 = vsel %vm337_vm0, %v3780_v41, %v7002_v4 }
 0x413   : > { %7210 = vrot.lane.b32.xlu0 %v7209_v25, %s7575_s21  ;;  %v7011_v12 = vpop.permute.xlu0 %7010  ;;  %v9890_v58 = vld [vmem:[#allocation2 + $0x1cf] sm:$0xff]  ;;  %v3605_v33 = vmax.f32 %v3563_v35, 0.0  ;;  %v3566_v45 = vadd.f32 %v6090_v0, %v9634_v26  ;;  %7255 = vrot.lane.b32.xlu1 %v7209_v25, %s7577_s17  ;;  %v4928_v17 = vpack.c.bf16 %v3923_v48, %v3922_v11  ;;  %v7037_v35 = vunpack.i.l.bf16 %v9873_v38  ;;  %v3654_v4 = vld [vmem:[#allocation2 + $0xc7] sm:$0xff] }
 0x414   : > { %v7013_v16 = vunpack.i.h.bf16 %v7011_v12  ;;  %v7012_v28 = vunpack.i.l.bf16 %v7011_v12  ;;  %v7219_v20 = vpack.i.bf16 %v9890_v58, %v9894_v22  ;;  %v9903_v26 = vld [vmem:[#allocation2 + $0x1d0] sm:$0xff]  ;;  %v7239_v29 = vpack.i.bf16 %v3923_v48, %v3922_v11 }
 0x415   : > { %3637 = vst.msk [vmem:[#allocation2 + $0x1e8] sm:$0xff] %vm337_vm0, %v3605_v33  ;;  %v3606_v37 = vmax.f32 %v3566_v45, 0.0  ;;  %6309 = vmatprep.mubr.msk.bf16.mxu0 %vm337_vm0, %v4928_v17  ;;  %v7229_v9 = vpack.i.bf16 %v9903_v26, %v9913_v54  ;;  %v4905_v33 = vpack.c.bf16 %v4773_v49, %v4772_v47  ;;  %v7038_v45 = vunpack.i.h.bf16 %v9873_v38  ;;  %v3782_v49 = vld [vmem:[#allocation2 + $0xe8] sm:$0xff] }
 0x416   : > { %v9901_v30 = vpop.permute.xlu1 %7055  ;;  %v4836_v42 = vsel %vm2853_vm11, %v4804_v44, %v7012_v28  ;;  %v4837_v61 = vsel %vm2853_vm11, %v4805_v13, %v7013_v16  ;;  %v7047_v63 = vunpack.i.l.bf16 %v9883_v57  ;;  %v7048_v62 = vunpack.i.h.bf16 %v9883_v57  ;;  %v3655_v57 = vld [vmem:[#allocation2 + $0xcf] sm:$0xff] }
 0x417   : > { %7220 = vrot.lane.b32.xlu0 %v7219_v20, %s7577_s17  ;;  %v7021_v31 = vpop.permute.xlu0 %7020  ;;  %3638 = vst.msk [vmem:[#allocation2 + $0x1f0] sm:$0xff] %vm337_vm0, %v3606_v37  ;;  %7265 = vrot.lane.b32.xlu1 %v7219_v20, %s7578_s23  ;;  %v4710_v20 = vsel %vm337_vm0, %v3654_v4, %v7037_v35  ;;  %v7058_v19 = vunpack.i.h.bf16 %v9901_v30  ;;  %v7057_v37 = vunpack.i.l.bf16 %v9901_v30 }
 0x418   : > { %v7023_v5 = vunpack.i.h.bf16 %v7021_v31  ;;  %v7022_v50 = vunpack.i.l.bf16 %v7021_v31 }
 0x419   : > { %v6091_v25 = vpop.f32.mrb[60].mxu0 }
 0x41a   : > { %v9920_v59 = vpop.permute.xlu1 %7065  ;;  %v4868_v3 = vsel %vm2886_vm12, %v4836_v42, %v7022_v50  ;;  %v4869_v43 = vsel %vm2886_vm12, %v4837_v61, %v7023_v5  ;;  %v6092_v0 = vpop.f32.mrb[61].mxu0  ;;  %v4711_v50 = vsel %vm337_vm0, %v3655_v57, %v7038_v45  ;;  %v4742_v42 = vsel %vm2853_vm11, %v4710_v20, %v7047_v63 }
 0x41b   : > { %7230 = vrot.lane.b32.xlu0 %v7229_v9, %s7578_s23  ;;  %v7031_v15 = vpop.permute.xlu0 %7030  ;;  %v4906_v18 = vpack.c.bf16 %v4869_v43, %v4868_v3  ;;  %7275 = vrot.lane.b32.xlu1 %v7229_v9, %s7575_s21  ;;  %v6093_v60 = vadd.f32 %v6092_v0, %v6091_v25  ;;  %v6094_v12 = vpop.f32.mrb[62].mxu0  ;;  %v3783_v25 = vld [vmem:[#allocation2 + $0xf0] sm:$0xff]  ;;  %v4774_v43 = vsel %vm2886_vm12, %v4742_v42, %v7057_v37  ;;  %v7067_v20 = vunpack.i.l.bf16 %v9920_v59 }
 0x41c   : > { %v6095_v27 = vpop.f32.mrb[63].mxu0  ;;  %v7033_v41 = vunpack.i.h.bf16 %v7031_v15  ;;  %v7032_v6 = vunpack.i.l.bf16 %v7031_v15  ;;  %v9941_v47 = vld [vmem:[#allocation2 + $0x1e7] sm:$0xff]  ;;  %v3657_v42 = vld [vmem:[#allocation2 + $0xef] sm:$0xff] }
 0x41d   : > { %5208 = vmatprep.mubr.bf16.mxu1 %v4906_v18  ;;  %v3571_v16 = vadd.f32 %v9623_v2, %v6093_v60  ;;  %v6096_v28 = vadd.f32 %v6095_v27, %v6094_v12  ;;  %v9958_v12 = vld [vmem:[#allocation2 + $0x1e8] sm:$0xff] }
 0x41e   : > { %v9930_v17 = vpop.permute.xlu1 %7075  ;;  %5209 = vmatmul.mubr.bf16.gmra.mrb[52].mxu1 %v4905_v33  ;;  %v3924_v38 = vld [vmem:[#allocation2 + $0x1e9] sm:$0xff]  ;;  %v3925_v48 = vld [vmem:[#allocation2 + $0x1f1] sm:$0xff]  ;;  %v4807_v35 = vsel %vm337_vm0, %v3783_v25, %v7033_v41  ;;  %v4806_v0 = vsel %vm337_vm0, %v3782_v49, %v7032_v6 }
 0x41f   : > { %7240 = vrot.lane.b32.xlu0 %v7239_v29, %s7575_s21  ;;  %v7041_v11 = vpop.permute.xlu0 %7040  ;;  %v9937_v21 = vld [vmem:[#allocation2 + $0x1ef] sm:$0xff]  ;;  %v3607_v2 = vmax.f32 %v3571_v16, 0.0  ;;  %v3574_v31 = vadd.f32 %v9631_v24, %v6096_v28  ;;  %7285 = vrot.lane.b32.xlu1 %v7239_v29, %s7577_s17  ;;  %v4931_v30 = vpack.c.bf16 %v3925_v48, %v3924_v38  ;;  %v4743_v24 = vsel %vm2853_vm11, %v4711_v50, %v7048_v62 }
 0x420   : > { %v7043_v13 = vunpack.i.h.bf16 %v7041_v11  ;;  %v7042_v44 = vunpack.i.l.bf16 %v7041_v11  ;;  %v7249_v5 = vpack.i.bf16 %v9937_v21, %v9941_v47  ;;  %v9948_v9 = vld [vmem:[#allocation2 + $0x1f0] sm:$0xff]  ;;  %v4775_v4 = vsel %vm2886_vm12, %v4743_v24, %v7058_v19  ;;  %v3656_v11 = vld [vmem:[#allocation2 + $0xe7] sm:$0xff] }
 0x421   : > { %3639 = vst.msk [vmem:[#allocation2 + $0x208] sm:$0xff] %vm337_vm0, %v3607_v2  ;;  %v3608_v61 = vmax.f32 %v3574_v31, 0.0  ;;  %6310 = vmatmul.mubr.msk.bf16.gmra.mrb[88].mxu0 %vm337_vm0, %v4931_v30  ;;  %v7259_v29 = vpack.i.bf16 %v9948_v9, %v9958_v12  ;;  %v4908_v62 = vpack.c.bf16 %v4775_v4, %v4774_v43  ;;  %v7269_v37 = vpack.i.bf16 %v3925_v48, %v3924_v38 }
 0x422   : > { %v7086_v15 = vpop.permute.xlu1 %7085  ;;  %v4838_v33 = vsel %vm2853_vm11, %v4806_v0, %v7042_v44  ;;  %v4839_v27 = vsel %vm2853_vm11, %v4807_v35, %v7043_v13  ;;  %v7068_v2 = vunpack.i.h.bf16 %v9920_v59  ;;  %v7077_v19 = vunpack.i.l.bf16 %v9930_v17  ;;  %v3784_v0 = vld [vmem:[#allocation2 + $0x108] sm:$0xff] }
 0x423   : > { %7250 = vrot.lane.b32.xlu0 %v7249_v5, %s7577_s17  ;;  %v7051_v3 = vpop.permute.xlu0 %7050  ;;  %3640 = vst.msk [vmem:[#allocation2 + $0x210] sm:$0xff] %vm337_vm0, %v3608_v61  ;;  %7295 = vrot.lane.b32.xlu1 %v7249_v5, %s7578_s23  ;;  %v7078_v6 = vunpack.i.h.bf16 %v9930_v17  ;;  %v7087_v31 = vunpack.i.l.bf16 %v7086_v15  ;;  %v4712_v38 = vsel %vm337_vm0, %v3656_v11, %v7067_v20  ;;  %v7088_v61 = vunpack.i.h.bf16 %v7086_v15 }
 0x424   : > { %v7053_v18 = vunpack.i.h.bf16 %v7051_v3  ;;  %v7052_v60 = vunpack.i.l.bf16 %v7051_v3  ;;  %v4713_v25 = vsel %vm337_vm0, %v3657_v42, %v7068_v2  ;;  %v4744_v3 = vsel %vm2853_vm11, %v4712_v38, %v7077_v19 }
 0x425   : > { %v4745_v35 = vsel %vm2853_vm11, %v4713_v25, %v7078_v6  ;;  %v4776_v15 = vsel %vm2886_vm12, %v4744_v3, %v7087_v31 }
 0x426   : > { %v4870_v45 = vsel %vm2886_vm12, %v4838_v33, %v7052_v60  ;;  %v4871_v63 = vsel %vm2886_vm12, %v4839_v27, %v7053_v18  ;;  %v9972_v41 = vpop.permute.xlu1 %7095  ;;  %v3785_v18 = vld [vmem:[#allocation2 + $0x110] sm:$0xff] }
 0x427   : > { %7260 = vrot.lane.b32.xlu0 %v7259_v29, %s7578_s23  ;;  %v7061_v16 = vpop.permute.xlu0 %7060  ;;  %v4909_v28 = vpack.c.bf16 %v4871_v63, %v4870_v45  ;;  %7305 = vrot.lane.b32.xlu1 %v7259_v29, %s7575_s21 }
 0x428   : > { %v3862_v13 = vld [vmem:[#allocation2 + $0x207] sm:$0xff]  ;;  %v7063_v48 = vunpack.i.h.bf16 %v7061_v16  ;;  %v7062_v5 = vunpack.i.l.bf16 %v7061_v16 }
 0x429   : > { %5216 = vmatprep.mubr.bf16.mxu1 %v4909_v28  ;;  %v9994_v63 = vld [vmem:[#allocation2 + $0x208] sm:$0xff] }
 0x42a   : > { %5217 = vmatmul.mubr.bf16.gmra.mrb[56].mxu1 %v4908_v62  ;;  %v3863_v44 = vld [vmem:[#allocation2 + $0x20f] sm:$0xff]  ;;  %v4809_v33 = vsel %vm337_vm0, %v3785_v18, %v7063_v48  ;;  %v4808_v27 = vsel %vm337_vm0, %v3784_v0, %v7062_v5  ;;  %v7106_v29 = vpop.permute.xlu1 %7105  ;;  %v4777_v62 = vsel %vm2886_vm12, %v4745_v35, %v7088_v61  ;;  %v10641_v48 = vld [vmem:[#allocation50_spill] sm:$0xff] }
 0x42b   : > { %7270 = vrot.lane.b32.xlu0 %v7269_v37, %s7575_s21  ;;  %v7071_v57 = vpop.permute.xlu0 %7070  ;;  %v9976_v30 = vld [vmem:[#allocation2 + $0x209] sm:$0xff]  ;;  %7315 = vrot.lane.b32.xlu1 %v7269_v37, %s7577_s17  ;;  %v7279_v59 = vpack.i.bf16 %v3863_v44, %v3862_v13  ;;  %v9980_v50 = vld [vmem:[#allocation2 + $0x211] sm:$0xff]  ;;  %v10640_v37 = vld [vmem:[#allocation46_spill] sm:$0xff]  ;;  %v1688_v5 = vadd.f32 %v10641_v48, %v9337_v53  ;;  %v7108_v61 = vunpack.i.h.bf16 %v7106_v29 }
 0x42c   : > { %v7073_v17 = vunpack.i.h.bf16 %v7071_v57  ;;  %v7072_v24 = vunpack.i.l.bf16 %v7071_v57  ;;  %v4934_v49 = vpack.c.bf16 %v9980_v50, %v9976_v30  ;;  %v9986_v43 = vld [vmem:[#allocation2 + $0x210] sm:$0xff]  ;;  %v1686_v11 = vadd.f32 %v10640_v37, %v9339_v40  ;;  %v3864_v13 = vld [vmem:[#allocation2 + $0x227] sm:$0xff] }
 0x42d   : > { %v7289_v20 = vpack.i.bf16 %v9986_v43, %v9994_v63  ;;  %v4911_v57 = vpack.c.bf16 %v4777_v62, %v4776_v15  ;;  %v3865_v44 = vld [vmem:[#allocation2 + $0x22f] sm:$0xff]  ;;  %v7299_v38 = vpack.i.bf16 %v9980_v50, %v9976_v30  ;;  %v7098_v40 = vunpack.i.h.bf16 %v9972_v41 }
 0x42e   : > { %v4840_v16 = vsel %vm2853_vm11, %v4808_v27, %v7072_v24  ;;  %v4841_v28 = vsel %vm2853_vm11, %v4809_v33, %v7073_v17  ;;  %v7116_v42 = vpop.permute.xlu1 %7115  ;;  %v7107_v17 = vunpack.i.l.bf16 %v7106_v29  ;;  %v7309_v25 = vpack.i.bf16 %v3865_v44, %v3864_v13  ;;  %v3896_v0 = vld [vmem:[#allocation2 + $0x228] sm:$0xff]  ;;  %v3897_v18 = vld [vmem:[#allocation2 + $0x230] sm:$0xff] }
 0x42f   : > { %7280 = vrot.lane.b32.xlu0 %v7279_v59, %s7577_s17  ;;  %v7081_v60 = vpop.permute.xlu0 %7080  ;;  %7325 = vrot.lane.b32.xlu1 %v7279_v59, %s7578_s23  ;;  %v7097_v59 = vunpack.i.l.bf16 %v9972_v41  ;;  %v3659_v15 = vld [vmem:[#allocation2 + $0x10f] sm:$0xff]  ;;  %v7118_v53 = vunpack.i.h.bf16 %v7116_v42  ;;  %v7117_v33 = vunpack.i.l.bf16 %v7116_v42  ;;  %v7319_v37 = vpack.i.bf16 %v3897_v18, %v3896_v0 }
 0x430   : > { %v7083_v4 = vunpack.i.h.bf16 %v7081_v60  ;;  %v7082_v45 = vunpack.i.l.bf16 %v7081_v60  ;;  %v3658_v60 = vld [vmem:[#allocation2 + $0x107] sm:$0xff]  ;;  %v4715_v41 = vsel %vm337_vm0, %v3659_v15, %v7098_v40 }
 0x432   : > { %v4872_v2 = vsel %vm2886_vm12, %v4840_v16, %v7082_v45  ;;  %v4873_v19 = vsel %vm2886_vm12, %v4841_v28, %v7083_v4  ;;  %v4714_v45 = vsel %vm337_vm0, %v3658_v60, %v7097_v59  ;;  %v4747_v16 = vsel %vm2853_vm11, %v4715_v41, %v7108_v61  ;;  %v3786_v28 = vld [vmem:[#allocation2 + $0x128] sm:$0xff]  ;;  %v10642_v59 = vld [vmem:[#allocation48_spill] sm:$0xff]  ;;  %v7126_v0 = vpop.permute.xlu1 %7125 }
 0x433   : > { %7290 = vrot.lane.b32.xlu0 %v7289_v20, %s7578_s23  ;;  %v7091_v6 = vpop.permute.xlu0 %7090  ;;  %v4912_v31 = vpack.c.bf16 %v4873_v19, %v4872_v2  ;;  %5466 = vperm.xlu1 %6422, %v1686_v11   ;;  %v4746_v29 = vsel %vm2853_vm11, %v4714_v45, %v7107_v17  ;;  %v3787_v20 = vld [vmem:[#allocation2 + $0x130] sm:$0xff]  ;;  %v4779_v44 = vsel %vm2886_vm12, %v4747_v16, %v7118_v53  ;;  %v7127_v45 = vunpack.i.l.bf16 %v7126_v0 }
 0x434   : > { %v7093_v3 = vunpack.i.h.bf16 %v7091_v6  ;;  %v7092_v35 = vunpack.i.l.bf16 %v7091_v6  ;;  %v4778_v13 = vsel %vm2886_vm12, %v4746_v29, %v7117_v33  ;;  %v1685_v42 = vadd.f32 %v10642_v59, %v9325_v8 }
 0x435   : > { %5224 = vmatprep.mubr.bf16.mxu1 %v4912_v31  ;;  %v4914_v40 = vpack.c.bf16 %v4779_v44, %v4778_v13 }
 0x436   : > { %5225 = vmatmul.mubr.bf16.gmra.mrb[60].mxu1 %v4911_v57  ;;  %v4811_v11 = vsel %vm337_vm0, %v3787_v20, %v7093_v3  ;;  %v4810_v2 = vsel %vm337_vm0, %v3786_v28, %v7092_v35  ;;  %v7136_v18 = vpop.permute.xlu1 %7135 }
 0x437   : > { %7300 = vrot.lane.b32.xlu0 %v7299_v38, %s7575_s21  ;;  %v7101_v24 = vpop.permute.xlu0 %7100  ;;  %5472 = vperm.xlu1 %6422, %v1688_v5   ;;  %v7138_v29 = vunpack.i.h.bf16 %v7136_v18  ;;  %v7137_v16 = vunpack.i.l.bf16 %v7136_v18  ;;  %s7516_s21 = scalar_lea.vmem %s7515_s13, 8192 }
 0x438   : > { %v7103_v27 = vunpack.i.h.bf16 %v7101_v24  ;;  %v7102_v4 = vunpack.i.l.bf16 %v7101_v24  ;;  %v10643_v24 = vld [vmem:[#allocation49_spill] sm:$0xff] }
 0x43a   : > { %v4842_v31 = vsel %vm2853_vm11, %v4810_v2, %v7102_v4  ;;  %v4843_v57 = vsel %vm2853_vm11, %v4811_v11, %v7103_v27  ;;  %v7146_v60 = vpop.permute.xlu1 %7145  ;;  %v3660_v11 = vld [vmem:[#allocation2 + $0x127] sm:$0xff]  ;;  %v3661_v2 = vld [vmem:[#allocation2 + $0x12f] sm:$0xff] }
 0x43b   : > { %7310 = vrot.lane.b32.xlu0 %v7309_v25, %s7577_s17  ;;  %v7111_v62 = vpop.permute.xlu0 %7110  ;;  %v1687_v25 = vadd.f32 %v10643_v24, %v9329_v7  ;;  %v7128_v7 = vunpack.i.h.bf16 %v7126_v0  ;;  %v4716_v44 = vsel %vm337_vm0, %v3660_v11, %v7127_v45 }
 0x43c   : > { %v7113_v19 = vunpack.i.h.bf16 %v7111_v62  ;;  %v7112_v6 = vunpack.i.l.bf16 %v7111_v62 }
 0x43d   : > { %v4717_v13 = vsel %vm337_vm0, %v3661_v2, %v7128_v7 }
 0x43e   : > { %v4874_v38 = vsel %vm2886_vm12, %v4842_v31, %v7112_v6  ;;  %v4875_v48 = vsel %vm2886_vm12, %v4843_v57, %v7113_v19  ;;  %v7156_v27 = vpop.permute.xlu1 %7155  ;;  %v7148_v19 = vunpack.i.h.bf16 %v7146_v60  ;;  %v7147_v6 = vunpack.i.l.bf16 %v7146_v60 }
 0x43f   : > { %7320 = vrot.lane.b32.xlu0 %v7319_v37, %s7578_s23  ;;  %v4915_v5 = vpack.c.bf16 %v4875_v48, %v4874_v38  ;;  %v7121_v4 = vpop.permute.xlu0 %7120  ;;  %v4748_v38 = vsel %vm2853_vm11, %v4716_v44, %v7137_v16  ;;  %v4749_v48 = vsel %vm2853_vm11, %v4717_v13, %v7138_v29  ;;  %v7158_v44 = vunpack.i.h.bf16 %v7156_v27  ;;  %s296_s23 = sand.u32 1, %s7564_s28  }
 0x440   : > { %v7123_v20 = vunpack.i.h.bf16 %v7121_v4  ;;  %v7122_v62 = vunpack.i.l.bf16 %v7121_v4  ;;  %v4780_v45 = vsel %vm2886_vm12, %v4748_v38, %v7147_v6  ;;  %v4781_v29 = vsel %vm2886_vm12, %v4749_v48, %v7148_v19  ;;  %s5872_s18 = sshll.u32 %s296_s23, 8  ;;  %s10427_s9 = scalar_lea.sflag [#allocation4], %s296_s23 }
 0x441   : > { %5232 = vmatprep.mubr.bf16.mxu1 %v4915_v5  ;;  %v3788_v5 = vld [vmem:[#allocation2 + $0x148] sm:$0xff]  ;;  %s10245_s19 = scalar_lea.vmem [#allocation3], %s5872_s18 }
 0x442   : > { %5233 = vmatmul.mubr.bf16.gmra.mrb[64].mxu1 %v4914_v40  ;;  %v10029_v61 = vpop.f32.mrb[64].mxu0  ;;  %v7166_v41 = vpop.permute.xlu1 %7165  ;;  %v3789_v40 = vld [vmem:[#allocation2 + $0x150] sm:$0xff]  ;;  %v4812_v24 = vsel %vm337_vm0, %v3788_v5, %v7122_v62  ;;  %v7157_v5 = vunpack.i.l.bf16 %v7156_v27  ;;  %s5806_s22 = sshll.u32 %s10245_s19, 4  ;;  %s10416_s22 = int_to_ptr.vmem [resolvable:$true] %s5806_s22 }
 0x443   : > { %5463 = vperm.xlu0 %6423, %v1685_v42   ;;  %v10031_v17 = vpop.f32.mrb[65].mxu0  ;;  %v4813_v42 = vsel %vm337_vm0, %v3789_v40, %v7123_v20  ;;  %v7168_v6 = vunpack.i.h.bf16 %v7166_v41  ;;  %v7167_v19 = vunpack.i.l.bf16 %v7166_v41  ;;  %s7510_s10 = scalar_lea.vmem %s10416_s22, 4096  ;;  %p7517_p0 = scmp.lt.s32.totalorder %s10416_s22, %s7515_s13 }
 0x444   : > { %v10035_v3 = vpop.f32.mrb[66].mxu0  ;;  %p7511_p11 = scmp.ne.s32.totalorder %s10416_s22, %s7510_s10  ;;  %p7518_p1 = scmp.lt.s32.totalorder %s7516_s21, %s7510_s10 }
 0x445   : > { %v10037_v35 = vpop.f32.mrb[67].mxu0 }
 0x446   : > { %p7512_p12 = pnand %p7511_p11, %p7665_p5  ;;  %p7519_p2 = por %p7518_p1, %p7517_p0 }
 0x447   : > { %5469 = vperm.xlu0 %6423, %v1687_v25  }
 0x448   : > { %p7513_p13 = pneg %p7512_p12 }
 0x44a   : > { %p7520_p3 = pnand %p7519_p2, %p7513_p13 }
 0x456   : > { %v10039_v15 = vpop.f32.mrb[68].mxu0 }
 0x457   : > { %v10041_v8 = vpop.f32.mrb[69].mxu0 }
 0x458   : > { %v10043_v53 = vpop.f32.mrb[70].mxu0 }
 0x459   : > { %v10045_v33 = vpop.f32.mrb[71].mxu0 }
 0x465   : > { %v7131_v28 = vpop.permute.xlu0 %7130  ;;  %v10047_v37 = vpop.permute.xlu1 %7175 }
 0x466   : > { %v7133_v31 = vunpack.i.h.bf16 %v7131_v28  ;;  %v7132_v57 = vunpack.i.l.bf16 %v7131_v28 }
 0x468   : > { %v4844_v60 = vsel %vm2853_vm11, %v4812_v24, %v7132_v57  ;;  %v4845_v4 = vsel %vm2853_vm11, %v4813_v42, %v7133_v31  ;;  %v4917_v31 = vpack.c.bf16 %v4781_v29, %v4780_v45  ;;  %v3662_v42 = vld [vmem:[#allocation2 + $0x147] sm:$0xff]  ;;  %v3663_v24 = vld [vmem:[#allocation2 + $0x14f] sm:$0xff] }
 0x469   : > { %v7141_v59 = vpop.permute.xlu0 %7140  ;;  %v10055_v18 = vpop.permute.xlu1 %7185  ;;  %v4719_v45 = vsel %vm337_vm0, %v3663_v24, %v7158_v44  ;;  %v4718_v29 = vsel %vm337_vm0, %v3662_v42, %v7157_v5 }
 0x46a   : > { %v7143_v25 = vunpack.i.h.bf16 %v7141_v59  ;;  %v7142_v0 = vunpack.i.l.bf16 %v7141_v59  ;;  %v10059_v7 = vpop.f32.mrb[72].mxu0  ;;  %v4750_v27 = vsel %vm2853_vm11, %v4718_v29, %v7167_v19  ;;  %v4751_v41 = vsel %vm2853_vm11, %v4719_v45, %v7168_v6 }
 0x46b   : > { %v10063_v16 = vpop.f32.mrb[73].mxu0  ;;  %v7187_v45 = vunpack.i.l.bf16 %v10055_v18 }
 0x46c   : > { %v4876_v28 = vsel %vm2886_vm12, %v4844_v60, %v7142_v0  ;;  %v4877_v20 = vsel %vm2886_vm12, %v4845_v4, %v7143_v25  ;;  %v10067_v11 = vpop.f32.mrb[74].mxu0  ;;  %v7178_v25 = vunpack.i.h.bf16 %v10047_v37  ;;  %v7177_v0 = vunpack.i.l.bf16 %v10047_v37 }
 0x46d   : > { %v7151_v62 = vpop.permute.xlu0 %7150  ;;  %v4918_v2 = vpack.c.bf16 %v4877_v20, %v4876_v28  ;;  %v7196_v13 = vpop.permute.xlu1 %7195 }
 0x46e   : > { %v10069_v57 = vpop.f32.mrb[75].mxu0  ;;  %v7153_v48 = vunpack.i.h.bf16 %v7151_v62  ;;  %v7152_v40 = vunpack.i.l.bf16 %v7151_v62  ;;  %v4782_v5 = vsel %vm2886_vm12, %v4750_v27, %v7177_v0  ;;  %v4783_v19 = vsel %vm2886_vm12, %v4751_v41, %v7178_v25 }
 0x46f   : > { %5240 = vmatprep.mubr.bf16.mxu1 %v4918_v2 }
 0x470   : > { %5241 = vmatmul.mubr.bf16.gmra.mrb[68].mxu1 %v4917_v31  ;;  %v4815_v20 = vsel %vm337_vm0, %v9754_v36, %v7153_v48  ;;  %v4814_v62 = vsel %vm337_vm0, %v9766_v14, %v7152_v40  ;;  %v4920_v14 = vpack.c.bf16 %v4783_v19, %v4782_v5  ;;  %v7188_v40 = vunpack.i.h.bf16 %v10055_v18 }
 0x471   : > { %v7161_v38 = vpop.permute.xlu0 %7160  ;;  %v7206_v59 = vpop.permute.xlu1 %7205 }
 0x472   : > { %v7163_v60 = vunpack.i.h.bf16 %v7161_v38  ;;  %v7162_v4 = vunpack.i.l.bf16 %v7161_v38  ;;  %v7208_v41 = vunpack.i.h.bf16 %v7206_v59 }
 0x474   : > { %v4846_v38 = vsel %vm2853_vm11, %v4814_v62, %v7162_v4  ;;  %v4847_v44 = vsel %vm2853_vm11, %v4815_v20, %v7163_v60  ;;  %v7198_v4 = vunpack.i.h.bf16 %v7196_v13  ;;  %v7197_v60 = vunpack.i.l.bf16 %v7196_v13 }
 0x475   : > { %v7171_v28 = vpop.permute.xlu0 %7170  ;;  %v10081_v37 = vpop.permute.xlu1 %7215 }
 0x476   : > { %v7173_v2 = vunpack.i.h.bf16 %v7171_v28  ;;  %v7172_v31 = vunpack.i.l.bf16 %v7171_v28  ;;  %v7207_v28 = vunpack.i.l.bf16 %v7206_v59 }
 0x478   : > { %v4878_v6 = vsel %vm2886_vm12, %v4846_v38, %v7172_v31  ;;  %v4879_v42 = vsel %vm2886_vm12, %v4847_v44, %v7173_v2  ;;  %v7509_v31 = vld [vmem:[#allocation2 + $0x16f] sm:$0xff]  ;;  %v4720_v44 = vsel %vm337_vm0, %v9745_v10, %v7187_v45 }
 0x479   : > { %v7181_v36 = vpop.permute.xlu0 %7180  ;;  %v4921_v48 = vpack.c.bf16 %v4879_v42, %v4878_v6  ;;  %v7226_v24 = vpop.permute.xlu1 %7225  ;;  %v4721_v38 = vsel %vm337_vm0, %v7509_v31, %v7188_v40  ;;  %v4752_v13 = vsel %vm2853_vm11, %v4720_v44, %v7197_v60  ;;  %v7217_v44 = vunpack.i.l.bf16 %v10081_v37 }
 0x47a   : > { %v7183_v0 = vunpack.i.h.bf16 %v7181_v36  ;;  %v7182_v27 = vunpack.i.l.bf16 %v7181_v36  ;;  %v4753_v5 = vsel %vm2853_vm11, %v4721_v38, %v7198_v4  ;;  %v4784_v4 = vsel %vm2886_vm12, %v4752_v13, %v7207_v28 }
 0x47b   : > { %5248 = vmatprep.mubr.bf16.mxu1 %v4921_v48  ;;  %v4785_v60 = vsel %vm2886_vm12, %v4753_v5, %v7208_v41  ;;  %v7218_v38 = vunpack.i.h.bf16 %v10081_v37 }
 0x47c   : > { %5249 = vmatmul.mubr.bf16.gmra.mrb[72].mxu1 %v4920_v14  ;;  %v4817_v59 = vsel %vm337_vm0, %v9805_v51, %v7183_v0  ;;  %v4816_v42 = vsel %vm337_vm0, %v9817_v1, %v7182_v27  ;;  %v4923_v27 = vpack.c.bf16 %v4785_v60, %v4784_v4 }
 0x47d   : > { %v7191_v29 = vpop.permute.xlu0 %7190  ;;  %v7236_v25 = vpop.permute.xlu1 %7235 }
 0x47e   : > { %v7193_v20 = vunpack.i.h.bf16 %v7191_v29  ;;  %v7192_v62 = vunpack.i.l.bf16 %v7191_v29  ;;  %v10091_v2 = vpop.f32.mrb[76].mxu0  ;;  %v7238_v5 = vunpack.i.h.bf16 %v7236_v25 }
 0x47f   : > { %v10096_v18 = vpop.f32.mrb[77].mxu0 }
 0x480   : > { %v10100_v6 = vpop.f32.mrb[78].mxu0  ;;  %v4848_v10 = vsel %vm2853_vm11, %v4816_v42, %v7192_v62  ;;  %v4849_v45 = vsel %vm2853_vm11, %v4817_v59, %v7193_v20  ;;  %v7228_v62 = vunpack.i.h.bf16 %v7226_v24  ;;  %v7227_v20 = vunpack.i.l.bf16 %v7226_v24 }
 0x481   : > { %v7201_v19 = vpop.permute.xlu0 %7200  ;;  %v7246_v14 = vpop.permute.xlu1 %7245  ;;  %v7237_v59 = vunpack.i.l.bf16 %v7236_v25 }
 0x482   : > { %v7203_v36 = vunpack.i.h.bf16 %v7201_v19  ;;  %v7202_v48 = vunpack.i.l.bf16 %v7201_v19  ;;  %v10106_v40 = vpop.f32.mrb[79].mxu0 }
 0x484   : > { %v4880_v29 = vsel %vm2886_vm12, %v4848_v10, %v7202_v48  ;;  %v4881_v51 = vsel %vm2886_vm12, %v4849_v45, %v7203_v36  ;;  %v4723_v48 = vsel %vm337_vm0, %v9791_v56, %v7218_v38  ;;  %v4722_v10 = vsel %vm337_vm0, %v9795_v46, %v7217_v44 }
 0x485   : > { %v7211_v0 = vpop.permute.xlu0 %7210  ;;  %v4924_v31 = vpack.c.bf16 %v4881_v51, %v4880_v29  ;;  %v7256_v1 = vpop.permute.xlu1 %7255  ;;  %v4754_v45 = vsel %vm2853_vm11, %v4722_v10, %v7227_v20  ;;  %v4755_v37 = vsel %vm2853_vm11, %v4723_v48, %v7228_v62  ;;  %v7247_v20 = vunpack.i.l.bf16 %v7246_v14 }
 0x486   : > { %v7213_v28 = vunpack.i.h.bf16 %v7211_v0  ;;  %v7212_v13 = vunpack.i.l.bf16 %v7211_v0  ;;  %v4786_v46 = vsel %vm2886_vm12, %v4754_v45, %v7237_v59 }
 0x487   : > { %5256 = vmatprep.mubr.bf16.mxu1 %v4924_v31  ;;  %v4787_v31 = vsel %vm2886_vm12, %v4755_v37, %v7238_v5 }
 0x488   : > { %5257 = vmatmul.mubr.bf16.gmra.mrb[76].mxu1 %v4923_v27  ;;  %v4819_v24 = vsel %vm337_vm0, %v9856_v52, %v7213_v28  ;;  %v4818_v60 = vsel %vm337_vm0, %v9866_v55, %v7212_v13  ;;  %v4926_v62 = vpack.c.bf16 %v4787_v31, %v4786_v46  ;;  %v7248_v55 = vunpack.i.h.bf16 %v7246_v14 }
 0x489   : > { %v7221_v19 = vpop.permute.xlu0 %7220  ;;  %v7266_v41 = vpop.permute.xlu1 %7265  ;;  %v7258_v28 = vunpack.i.h.bf16 %v7256_v1  ;;  %v7257_v13 = vunpack.i.l.bf16 %v7256_v1 }
 0x48a   : > { %v7223_v42 = vunpack.i.h.bf16 %v7221_v19  ;;  %v7222_v36 = vunpack.i.l.bf16 %v7221_v19  ;;  %v7268_v59 = vunpack.i.h.bf16 %v7266_v41  ;;  %v7267_v10 = vunpack.i.l.bf16 %v7266_v41 }
 0x48b   : > { %v4725_v37 = vsel %vm337_vm0, %v9842_v34, %v7248_v55 }
 0x48c   : > { %v4850_v0 = vsel %vm2853_vm11, %v4818_v60, %v7222_v36  ;;  %v4851_v56 = vsel %vm2853_vm11, %v4819_v24, %v7223_v42  ;;  %v4757_v14 = vsel %vm2853_vm11, %v4725_v37, %v7258_v28 }
 0x48d   : > { %v7231_v4 = vpop.permute.xlu0 %7230  ;;  %v7276_v51 = vpop.permute.xlu1 %7275  ;;  %v4789_v46 = vsel %vm2886_vm12, %v4757_v14, %v7268_v59 }
 0x48e   : > { %v7233_v25 = vunpack.i.h.bf16 %v7231_v4  ;;  %v7232_v29 = vunpack.i.l.bf16 %v7231_v4  ;;  %v4724_v4 = vsel %vm337_vm0, %v9846_v23, %v7247_v20 }
 0x48f   : > { %v4756_v24 = vsel %vm2853_vm11, %v4724_v4, %v7257_v13 }
 0x490   : > { %v4882_v27 = vsel %vm2886_vm12, %v4850_v0, %v7232_v29  ;;  %v4883_v38 = vsel %vm2886_vm12, %v4851_v56, %v7233_v25  ;;  %v4788_v23 = vsel %vm2886_vm12, %v4756_v24, %v7267_v10 }
 0x491   : > { %v7241_v44 = vpop.permute.xlu0 %7240  ;;  %v4927_v52 = vpack.c.bf16 %v4883_v38, %v4882_v27  ;;  %v7286_v19 = vpop.permute.xlu1 %7285 }
 0x492   : > { %v7243_v42 = vunpack.i.h.bf16 %v7241_v44  ;;  %v7242_v48 = vunpack.i.l.bf16 %v7241_v44  ;;  %v4929_v44 = vpack.c.bf16 %v4789_v46, %v4788_v23  ;;  %v7288_v55 = vunpack.i.h.bf16 %v7286_v19 }
 0x493   : > { %5264 = vmatprep.mubr.bf16.mxu1 %v4927_v52  ;;  %v7277_v52 = vunpack.i.l.bf16 %v7276_v51  ;;  %v7287_v20 = vunpack.i.l.bf16 %v7286_v19 }
 0x494   : > { %5265 = vmatmul.mubr.bf16.gmra.mrb[80].mxu1 %v4926_v62  ;;  %v4821_v1 = vsel %vm337_vm0, %v9903_v26, %v7243_v42  ;;  %v4820_v25 = vsel %vm337_vm0, %v9913_v54, %v7242_v48  ;;  %v7278_v54 = vunpack.i.h.bf16 %v7276_v51 }
 0x495   : > { %v7251_v36 = vpop.permute.xlu0 %7250  ;;  %v7296_v41 = vpop.permute.xlu1 %7295 }
 0x496   : > { %v7253_v5 = vunpack.i.h.bf16 %v7251_v36  ;;  %v7252_v45 = vunpack.i.l.bf16 %v7251_v36  ;;  %v7298_v42 = vunpack.i.h.bf16 %v7296_v41  ;;  %v7297_v48 = vunpack.i.l.bf16 %v7296_v41 }
 0x498   : > { %v4852_v56 = vsel %vm2853_vm11, %v4820_v25, %v7252_v45  ;;  %v4853_v34 = vsel %vm2853_vm11, %v4821_v1, %v7253_v5  ;;  %v4727_v5 = vsel %vm337_vm0, %v9890_v58, %v7278_v54  ;;  %v4726_v45 = vsel %vm337_vm0, %v9894_v22, %v7277_v52 }
 0x499   : > { %v7261_v60 = vpop.permute.xlu0 %7260  ;;  %v7306_v62 = vpop.permute.xlu1 %7305  ;;  %v4758_v37 = vsel %vm2853_vm11, %v4726_v45, %v7287_v20  ;;  %v4759_v51 = vsel %vm2853_vm11, %v4727_v5, %v7288_v55 }
 0x49a   : > { %v7263_v29 = vunpack.i.h.bf16 %v7261_v60  ;;  %v7262_v0 = vunpack.i.l.bf16 %v7261_v60  ;;  %v4790_v22 = vsel %vm2886_vm12, %v4758_v37, %v7297_v48  ;;  %v4791_v41 = vsel %vm2886_vm12, %v4759_v51, %v7298_v42 }
 0x49b   : > { %v7307_v23 = vunpack.i.l.bf16 %v7306_v62 }
 0x49c   : > { %v4884_v31 = vsel %vm2886_vm12, %v4852_v56, %v7262_v0  ;;  %v4885_v27 = vsel %vm2886_vm12, %v4853_v34, %v7263_v29  ;;  %v4932_v34 = vpack.c.bf16 %v4791_v41, %v4790_v22  ;;  %v3928_v41 = vld [vmem:[#allocation2 + $0x229] sm:$0xff] }
 0x49d   : > { %v7271_v38 = vpop.permute.xlu0 %7270  ;;  %v4930_v26 = vpack.c.bf16 %v4885_v27, %v4884_v31  ;;  %v7316_v14 = vpop.permute.xlu1 %7315 }
 0x49e   : > { %v7273_v13 = vunpack.i.h.bf16 %v7271_v38  ;;  %v7272_v36 = vunpack.i.l.bf16 %v7271_v38  ;;  %v7318_v31 = vunpack.i.h.bf16 %v7316_v14  ;;  %v7317_v27 = vunpack.i.l.bf16 %v7316_v14 }
 0x49f   : > { %5272 = vmatprep.mubr.bf16.mxu1 %v4930_v26 }
 0x4a0   : > { %5273 = vmatmul.mubr.bf16.gmra.mrb[84].mxu1 %v4929_v44  ;;  %v4823_v19 = vsel %vm337_vm0, %v9948_v9, %v7273_v13  ;;  %v4822_v24 = vsel %vm337_vm0, %v9958_v12, %v7272_v36  ;;  %v7308_v12 = vunpack.i.h.bf16 %v7306_v62  ;;  %v4728_v13 = vsel %vm337_vm0, %v9941_v47, %v7307_v23  ;;  %v10644_v23 = vld [vmem:[#allocation43_spill] sm:$0xff] }
 0x4a1   : > { %v7281_v28 = vpop.permute.xlu0 %7280  ;;  %v7326_v46 = vpop.permute.xlu1 %7325  ;;  %v4760_v36 = vsel %vm2853_vm11, %v4728_v13, %v7317_v27 }
 0x4a2   : > { %v7283_v59 = vunpack.i.h.bf16 %v7281_v28  ;;  %v7282_v10 = vunpack.i.l.bf16 %v7281_v28  ;;  %v7328_v54 = vunpack.i.h.bf16 %v7326_v46  ;;  %v7327_v52 = vunpack.i.l.bf16 %v7326_v46 }
 0x4a3   : > { %v4729_v28 = vsel %vm337_vm0, %v9937_v21, %v7308_v12  ;;  %v5483_v46 = vadd.s32 4294967280, %v10644_v23 }
 0x4a4   : > { %v4854_v25 = vsel %vm2853_vm11, %v4822_v24, %v7282_v10  ;;  %v4855_v58 = vsel %vm2853_vm11, %v4823_v19, %v7283_v59  ;;  %v4761_v62 = vsel %vm2853_vm11, %v4729_v28, %v7318_v31  ;;  %v4792_v37 = vsel %vm2886_vm12, %v4760_v36, %v7327_v52 }
 0x4a5   : > { %v7291_v4 = vpop.permute.xlu0 %7290  ;;  %v4793_v47 = vsel %vm2886_vm12, %v4761_v62, %v7328_v54  ;;  %v5490_v31 = vadd.s32 4294967272, %v10644_v23 }
 0x4a6   : > { %v7293_v60 = vunpack.i.h.bf16 %v7291_v4  ;;  %v7292_v1 = vunpack.i.l.bf16 %v7291_v4  ;;  %v4935_v14 = vpack.c.bf16 %v4793_v47, %v4792_v37 }
 0x4a8   : > { %v4886_v29 = vsel %vm2886_vm12, %v4854_v25, %v7292_v1  ;;  %v4887_v0 = vsel %vm2886_vm12, %v4855_v58, %v7293_v60 }
 0x4a9   : > { %v7301_v56 = vpop.permute.xlu0 %7300  ;;  %v4933_v9 = vpack.c.bf16 %v4887_v0, %v4886_v29  ;;  %v3929_v29 = vld [vmem:[#allocation2 + $0x231] sm:$0xff] }
 0x4aa   : > { %v7303_v26 = vunpack.i.h.bf16 %v7301_v56  ;;  %v7302_v44 = vunpack.i.l.bf16 %v7301_v56 }
 0x4ab   : > { %5280 = vmatprep.mubr.bf16.mxu1 %v4933_v9  ;;  %v4937_v9 = vpack.c.bf16 %v3929_v29, %v3928_v41 }
 0x4ac   : > { %5281 = vmatmul.mubr.bf16.gmra.mrb[88].mxu1 %v4932_v34  ;;  %v4825_v48 = vsel %vm337_vm0, %v9986_v43, %v7303_v26  ;;  %v4824_v59 = vsel %vm337_vm0, %v9994_v63, %v7302_v44  ;;  %v10183_v43 = vld [vmem:[%s10471_s3] ss:$0 sm:$0xff] }
 0x4ad   : > { %v7311_v38 = vpop.permute.xlu0 %7310  ;;  %v10645_v26 = vld [vmem:[#allocation6_spill] sm:$0xff] }
 0x4ae   : > { %v7313_v55 = vunpack.i.h.bf16 %v7311_v38  ;;  %v7312_v20 = vunpack.i.l.bf16 %v7311_v38  ;;  %v5486_v44 = vsub.s32 %v5483_v46, %v10645_v26 }
 0x4b0   : > { %v4856_v45 = vsel %vm2853_vm11, %v4824_v59, %v7312_v20  ;;  %v4857_v21 = vsel %vm2853_vm11, %v4825_v48, %v7313_v55 }
 0x4b1   : > { %v7321_v42 = vpop.permute.xlu0 %7320 }
 0x4b2   : > { %v7323_v10 = vunpack.i.h.bf16 %v7321_v42  ;;  %v7322_v5 = vunpack.i.l.bf16 %v7321_v42  ;;  %v5467_v12 = vpop.permute.xlu1 %5466 }
 0x4b3   : > { %v5481_v28 = vrot.slane %v5467_v12, %v8778_v39 }
 0x4b4   : > { %v4888_v51 = vsel %vm2886_vm12, %v4856_v45, %v7322_v5  ;;  %v4889_v4 = vsel %vm2886_vm12, %v4857_v21, %v7323_v10  ;;  %v6131_v19 = vpop.f32.mrb[32].mxu1 }
 0x4b5   : > { %v4936_v24 = vpack.c.bf16 %v4889_v4, %v4888_v51  ;;  %v6132_v63 = vpop.f32.mrb[33].mxu1 }
 0x4b6   : > { %v6133_v60 = vadd.f32 %v6132_v63, %v6131_v19  ;;  %v6134_v1 = vpop.f32.mrb[34].mxu1 }
 0x4b7   : > { %5288 = vmatprep.mubr.bf16.mxu1 %v4936_v24  ;;  %v6135_v25 = vpop.f32.mrb[35].mxu1 }
 0x4b8   : > { %5289 = vmatmul.mubr.bf16.gmra.mrb[92].mxu1 %v4935_v14  ;;  %v5171_v58 = vadd.f32 %v6133_v60, %v10183_v43  ;;  %v6136_v22 = vadd.f32 %v6135_v25, %v6134_v1 }
 0x4b9   : > { %6313 = vmatprep.mubr.msk.bf16.mxu1 %vm337_vm0, %v4934_v49 }
 0x4ba   : > { %v5332_v0 = vadd.f32 %v10031_v17, %v5171_v58  ;;  %v5174_v56 = vadd.f32 %v6136_v22, %v10183_v43  ;;  %v5493_v17 = vsub.s32 %v5490_v31, %v10645_v26 }
 0x4bc   : > { %v5335_v34 = vadd.f32 %v10037_v35, %v5174_v56  ;;  %v5473_v35 = vpop.permute.xlu1 %5472 }
 0x4c0   : > { %6314 = vmatmul.mubr.msk.bf16.vlgmr.msra.gmra.mrb[96].mxu1 %vm337_vm0, %v4937_v9  ;;  %v6137_v27 = vpop.f32.mrb[36].mxu1 }
 0x4c1   : > { %v6138_v50 = vpop.f32.mrb[37].mxu1 }
 0x4c2   : > { %v5464_v30 = vpop.permute.xlu0 %5463  ;;  %v6139_v49 = vadd.f32 %v6138_v50, %v6137_v27  ;;  %v6140_v38 = vpop.f32.mrb[38].mxu1 }
 0x4c3   : > { %v5477_v54 = vrot.slane %v5464_v30, %v8786_v32  ;;  %v6141_v52 = vpop.f32.mrb[39].mxu1  ;;  %v5494_v32 = vrot.slane %v5473_v35, %v5493_v17 }
 0x4c4   : > { %v5179_v55 = vadd.f32 %v6139_v49, %v10183_v43  ;;  %v6142_v20 = vadd.f32 %v6141_v52, %v6140_v38 }
 0x4c5   : > { %v10201_v13 = vpop.f32.mrb[80].mxu0  ;;  %v5482_v10 = vsel %vm1327_vm2, %v5481_v28, %v5477_v54 }
 0x4c6   : > { %v5470_v36 = vpop.permute.xlu0 %5469  ;;  %v5340_v62 = vadd.f32 %v10029_v61, %v5179_v55  ;;  %v5182_v42 = vadd.f32 %v6142_v20, %v10183_v43  ;;  %v10205_v59 = vpop.f32.mrb[81].mxu0 }
 0x4c7   : > { %v5487_v48 = vrot.slane %v5470_v36, %v5486_v44  ;;  %v10208_v5 = vpop.f32.mrb[82].mxu0 }
 0x4c8   : > { %v5343_v45 = vadd.f32 %v10035_v3, %v5182_v42  ;;  %v10211_v21 = vpop.f32.mrb[83].mxu0 }
 0x4c9   : > { %v5489_v39 = vsel %vm5488_vm13, %v5487_v48, %v5482_v10 }
 0x4ca   : > { %v10213_v37 = vsel %vm5495_vm14, %v5494_v32, %v5489_v39 }
 0x4cb   : > { %v5504_v61 = vadd.f32 %v10213_v37, %v5332_v0  ;;  %v5505_v47 = vadd.f32 %v10213_v37, %v5335_v34  ;;  %v5506_v51 = vadd.f32 %v10213_v37, %v5340_v62  ;;  %v5507_v4 = vadd.f32 %v10213_v37, %v5343_v45 }
 0x4cd   : > { %v5946_v19 = vmul.f32 -1.442695, %v5504_v61  ;;  %v5947_v24 = vmul.f32 -1.442695, %v5505_v47  ;;  %v5948_v63 = vmul.f32 -1.442695, %v5506_v51 }
 0x4ce   : > { %v5949_v14 = vmul.f32 -1.442695, %v5507_v4  ;;  %v6143_v60 = vpop.f32.mrb[40].mxu1 }
 0x4cf   : > { %7365 = vpow2.f32 %v5946_v19  ;;  %v6144_v3 = vpop.f32.mrb[41].mxu1 }
 0x4d0   : > { %7367 = vpow2.f32 %v5947_v24  ;;  %v6145_v1 = vadd.f32 %v6144_v3, %v6143_v60  ;;  %v6146_v25 = vpop.f32.mrb[42].mxu1  ;;  %v10646_v24 = vld [vmem:[#allocation7_spill] sm:$0xff]  ;;  %v10647_v3 = vld [vmem:[#allocation8_spill] sm:$0xff] }
 0x4d1   : > { %7369 = vpow2.f32 %v5948_v63  ;;  %v6147_v58 = vpop.f32.mrb[43].mxu1 }
 0x4d2   : > { %7371 = vpow2.f32 %v5949_v14  ;;  %v5187_v22 = vadd.f32 %v6145_v1, %v10183_v43  ;;  %v6148_v41 = vadd.f32 %v6147_v58, %v6146_v25 }
 0x4d4   : > { %v5348_v29 = vadd.f32 %v10041_v8, %v5187_v22  ;;  %v5190_v0 = vadd.f32 %v6148_v41, %v10183_v43  ;;  %v10648_v22 = vld [vmem:[#allocation9_spill] sm:$0xff] }
 0x4d6   : > { %v5508_v56 = vadd.f32 %v10213_v37, %v5348_v29  ;;  %v5351_v9 = vadd.f32 %v10045_v33, %v5190_v0 }
 0x4d8   : > { %v5950_v34 = vmul.f32 -1.442695, %v5508_v56  ;;  %v5509_v12 = vadd.f32 %v10213_v37, %v5351_v9  ;;  %v10649_v9 = vld [vmem:[#allocation10_spill] sm:$0xff] }
 0x4d9   : > { %v7366_v23 = vpop.eup %7365  ;;  %v6149_v46 = vpop.f32.mrb[44].mxu1 }
 0x4da   : > { %v7368_v31 = vpop.eup %7367  ;;  %v5632_v27 = vadd.f32 1.0, %v7366_v23  ;;  %7373 = vpow2.f32 %v5950_v34  ;;  %v6150_v30 = vpop.f32.mrb[45].mxu1  ;;  %v5951_v17 = vmul.f32 -1.442695, %v5509_v12 }
 0x4db   : > { %v7370_v50 = vpop.eup %7369  ;;  %v5633_v49 = vadd.f32 1.0, %v7368_v31  ;;  %v6151_v38 = vadd.f32 %v6150_v30, %v6149_v46  ;;  %v6152_v26 = vpop.f32.mrb[46].mxu1 }
 0x4dc   : > { %v7372_v8 = vpop.eup %7371  ;;  %v5634_v44 = vadd.f32 1.0, %v7370_v50  ;;  %7375 = vrcp.f32 %v5632_v27  ;;  %v6153_v54 = vpop.f32.mrb[47].mxu1 }
 0x4dd   : > { %v5635_v33 = vadd.f32 1.0, %v7372_v8  ;;  %7377 = vrcp.f32 %v5633_v49  ;;  %v5195_v52 = vadd.f32 %v6151_v38, %v10183_v43  ;;  %v6154_v35 = vadd.f32 %v6153_v54, %v6152_v26  ;;  %v10226_v55 = vpop.f32.mrb[84].mxu0 }
 0x4de   : > { %7379 = vrcp.f32 %v5634_v44  ;;  %v10230_v36 = vpop.f32.mrb[85].mxu0 }
 0x4df   : > { %7381 = vrcp.f32 %v5635_v33  ;;  %v5356_v20 = vadd.f32 %v10039_v15, %v5195_v52  ;;  %v5198_v28 = vadd.f32 %v6154_v35, %v10183_v43  ;;  %v10233_v62 = vpop.f32.mrb[86].mxu0 }
 0x4e0   : > { %7383 = vpow2.f32 %v5951_v17  ;;  %v10237_v32 = vpop.f32.mrb[87].mxu0  ;;  %v10650_v17 = vld [vmem:[#allocation11_spill] sm:$0xff] }
 0x4e1   : > { %v5510_v42 = vadd.f32 %v10213_v37, %v5356_v20  ;;  %v5359_v48 = vadd.f32 %v10043_v53, %v5198_v28 }
 0x4e3   : > { %v5952_v10 = vmul.f32 -1.442695, %v5510_v42  ;;  %v5511_v45 = vadd.f32 %v10213_v37, %v5359_v48 }
 0x4e4   : > { %v7374_v15 = vpop.eup %7373 }
 0x4e5   : > { %v5636_v39 = vadd.f32 1.0, %v7374_v15  ;;  %7385 = vpow2.f32 %v5952_v10  ;;  %v5953_v61 = vmul.f32 -1.442695, %v5511_v45  ;;  %v6155_v47 = vpop.f32.mrb[48].mxu1 }
 0x4e6   : > { %v7376_v51 = vpop.eup %7375  ;;  %v6156_v4 = vpop.f32.mrb[49].mxu1 }
 0x4e7   : > { %v7378_v19 = vpop.eup %7377  ;;  %7387 = vrcp.f32 %v5636_v39  ;;  %v5728_v63 = vmul.f32 %v7376_v51, %v10646_v24  ;;  %v6157_v14 = vadd.f32 %v6156_v4, %v6155_v47  ;;  %v6158_v53 = vpop.f32.mrb[50].mxu1 }
 0x4e8   : > { %v7380_v60 = vpop.eup %7379  ;;  %v5729_v1 = vmul.f32 %v7378_v19, %v10647_v3  ;;  %7389 = vpow2.f32 %v5953_v61  ;;  %v6159_v25 = vpop.f32.mrb[51].mxu1  ;;  %v10651_v61 = vld [vmem:[#allocation12_spill] sm:$0xff] }
 0x4e9   : > { %v7382_v58 = vpop.eup %7381  ;;  %v5730_v41 = vmul.f32 %v7380_v60, %v10648_v22  ;;  %5760 = vst.msk [vmem:[%s10245_s19] sm:$0xff] %vm337_vm0, %v5728_v63  ;;  %v5203_v29 = vadd.f32 %v6157_v14, %v10183_v43  ;;  %v6160_v0 = vadd.f32 %v6159_v25, %v6158_v53 }
 0x4ea   : > { %v7384_v56 = vpop.eup %7383  ;;  %v5731_v34 = vmul.f32 %v7382_v58, %v10649_v9  ;;  %5761 = vst.msk [vmem:[%s10245_s19 + $0x8] sm:$0xff] %vm337_vm0, %v5729_v1  ;;  %v10652_v1 = vld [vmem:[#allocation13_spill] sm:$0xff]  ;;  %v10653_v9 = vld [vmem:[#allocation14_spill] sm:$0xff] }
 0x4eb   : > { %5762 = vst.msk [vmem:[%s10245_s19 + $0x10] sm:$0xff] %vm337_vm0, %v5730_v41  ;;  %v5637_v12 = vadd.f32 1.0, %v7384_v56  ;;  %v5364_v23 = vadd.f32 %v10063_v16, %v5203_v29  ;;  %v5206_v46 = vadd.f32 %v6160_v0, %v10183_v43 }
 0x4ec   : > { %5763 = vst.msk [vmem:[%s10245_s19 + $0x18] sm:$0xff] %vm337_vm0, %v5731_v34 }
 0x4ed   : > { %7391 = vrcp.f32 %v5637_v12  ;;  %v5512_v31 = vadd.f32 %v10213_v37, %v5364_v23  ;;  %v5367_v27 = vadd.f32 %v10069_v57, %v5206_v46 }
 0x4ef   : > { %v7386_v30 = vpop.eup %7385  ;;  %v5954_v50 = vmul.f32 -1.442695, %v5512_v31  ;;  %v5513_v49 = vadd.f32 %v10213_v37, %v5367_v27 }
 0x4f0   : > { %v5638_v38 = vadd.f32 1.0, %v7386_v30 }
 0x4f1   : > { %v7388_v26 = vpop.eup %7387  ;;  %7393 = vpow2.f32 %v5954_v50  ;;  %v5955_v8 = vmul.f32 -1.442695, %v5513_v49  ;;  %v6161_v44 = vpop.f32.mrb[52].mxu1 }
 0x4f2   : > { %v7390_v16 = vpop.eup %7389  ;;  %v5732_v54 = vmul.f32 %v7388_v26, %v10650_v17  ;;  %7395 = vrcp.f32 %v5638_v38  ;;  %v6162_v33 = vpop.f32.mrb[53].mxu1  ;;  %v10654_v17 = vld [vmem:[#allocation15_spill] sm:$0xff] }
 0x4f3   : > { %v5639_v52 = vadd.f32 1.0, %v7390_v16  ;;  %7397 = vpow2.f32 %v5955_v8  ;;  %v6163_v35 = vadd.f32 %v6162_v33, %v6161_v44  ;;  %v6164_v20 = vpop.f32.mrb[54].mxu1 }
 0x4f4   : > { %5764 = vst.msk [vmem:[%s10245_s19 + $0x20] sm:$0xff] %vm337_vm0, %v5732_v54  ;;  %v6165_v57 = vpop.f32.mrb[55].mxu1  ;;  %v10266_v48 = vpop.f32.mrb[88].mxu0 }
 0x4f5   : > { %7399 = vrcp.f32 %v5639_v52  ;;  %v5211_v28 = vadd.f32 %v6163_v35, %v10183_v43  ;;  %v6166_v42 = vadd.f32 %v6165_v57, %v6164_v20  ;;  %v10270_v39 = vpop.f32.mrb[89].mxu0 }
 0x4f6   : > { %v10273_v51 = vpop.f32.mrb[90].mxu0 }
 0x4f7   : > { %v7392_v10 = vpop.eup %7391  ;;  %v5372_v45 = vadd.f32 %v10059_v7, %v5211_v28  ;;  %v5214_v15 = vadd.f32 %v6166_v42, %v10183_v43  ;;  %v10277_v24 = vpop.f32.mrb[91].mxu0 }
 0x4f8   : > { %v5733_v47 = vmul.f32 %v7392_v10, %v10651_v61 }
 0x4f9   : > { %v5514_v4 = vadd.f32 %v10213_v37, %v5372_v45  ;;  %v5375_v19 = vadd.f32 %v10067_v11, %v5214_v15 }
 0x4fa   : > { %5765 = vst.msk [vmem:[%s10245_s19 + $0x28] sm:$0xff] %vm337_vm0, %v5733_v47 }
 0x4fb   : > { %v7394_v63 = vpop.eup %7393  ;;  %v5956_v14 = vmul.f32 -1.442695, %v5514_v4  ;;  %v5515_v7 = vadd.f32 %v10213_v37, %v5375_v19 }
 0x4fc   : > { %v7396_v53 = vpop.eup %7395  ;;  %v5640_v60 = vadd.f32 1.0, %v7394_v63 }
 0x4fd   : > { %v7398_v3 = vpop.eup %7397  ;;  %v5734_v25 = vmul.f32 %v7396_v53, %v10652_v1  ;;  %7401 = vpow2.f32 %v5956_v14  ;;  %v5957_v58 = vmul.f32 -1.442695, %v5515_v7  ;;  %v6167_v22 = vpop.f32.mrb[56].mxu1  ;;  %v10656_v1 = vld [vmem:[#allocation17_spill] sm:$0xff] }
 0x4fe   : > { %7403 = vrcp.f32 %v5640_v60  ;;  %v5641_v11 = vadd.f32 1.0, %v7398_v3  ;;  %v6168_v41 = vpop.f32.mrb[57].mxu1 }
 0x4ff   : > { %v7400_v29 = vpop.eup %7399  ;;  %5766 = vst.msk [vmem:[%s10245_s19 + $0x30] sm:$0xff] %vm337_vm0, %v5734_v25  ;;  %7405 = vpow2.f32 %v5957_v58  ;;  %v6169_v0 = vadd.f32 %v6168_v41, %v6167_v22  ;;  %v6170_v56 = vpop.f32.mrb[58].mxu1 }
 0x500   : > { %v5735_v34 = vmul.f32 %v7400_v29, %v10653_v9  ;;  %7407 = vrcp.f32 %v5641_v11  ;;  %v6171_v12 = vpop.f32.mrb[59].mxu1 }
 0x501   : > { %v5219_v23 = vadd.f32 %v6169_v0, %v10183_v43  ;;  %v6172_v46 = vadd.f32 %v6171_v12, %v6170_v56 }
 0x502   : > { %5767 = vst.msk [vmem:[%s10245_s19 + $0x38] sm:$0xff] %vm337_vm0, %v5735_v34 }
 0x503   : > { %v5380_v31 = vadd.f32 %v10096_v18, %v5219_v23  ;;  %v5222_v27 = vadd.f32 %v6172_v46, %v10183_v43 }
 0x505   : > { %v5516_v30 = vadd.f32 %v10213_v37, %v5380_v31  ;;  %v5383_v50 = vadd.f32 %v10106_v40, %v5222_v27  ;;  %v10655_v40 = vld [vmem:[#allocation16_spill] sm:$0xff] }
 0x507   : > { %v7402_v49 = vpop.eup %7401  ;;  %v5958_v38 = vmul.f32 -1.442695, %v5516_v30  ;;  %v5517_v26 = vadd.f32 %v10213_v37, %v5383_v50 }
 0x508   : > { %v7404_v8 = vpop.eup %7403  ;;  %v5642_v44 = vadd.f32 1.0, %v7402_v49 }
 0x509   : > { %v7406_v16 = vpop.eup %7405  ;;  %v5736_v54 = vmul.f32 %v7404_v8, %v10654_v17  ;;  %7409 = vpow2.f32 %v5958_v38  ;;  %v5959_v33 = vmul.f32 -1.442695, %v5517_v26  ;;  %v6173_v18 = vpop.f32.mrb[60].mxu1 }
 0x50a   : > { %v7408_v52 = vpop.eup %7407  ;;  %7411 = vrcp.f32 %v5642_v44  ;;  %v5643_v35 = vadd.f32 1.0, %v7406_v16  ;;  %v6174_v20 = vpop.f32.mrb[61].mxu1  ;;  %v10658_v44 = vld [vmem:[#allocation19_spill] sm:$0xff] }
 0x50b   : > { %5768 = vst.msk [vmem:[%s10245_s19 + $0x40] sm:$0xff] %vm337_vm0, %v5736_v54  ;;  %v5737_v57 = vmul.f32 %v7408_v52, %v10655_v40  ;;  %7413 = vpow2.f32 %v5959_v33  ;;  %v6175_v28 = vadd.f32 %v6174_v20, %v6173_v18  ;;  %v6176_v42 = vpop.f32.mrb[62].mxu1  ;;  %v10659_v33 = vld [vmem:[#allocation20_spill] sm:$0xff]  ;;  %v10660_v40 = vld [vmem:[#allocation21_spill] sm:$0xff] }
 0x50c   : > { %7415 = vrcp.f32 %v5643_v35  ;;  %v6177_v10 = vpop.f32.mrb[63].mxu1 }
 0x50d   : > { %5769 = vst.msk [vmem:[%s10245_s19 + $0x48] sm:$0xff] %vm337_vm0, %v5737_v57  ;;  %v5227_v45 = vadd.f32 %v6175_v28, %v10183_v43  ;;  %v6178_v15 = vadd.f32 %v6177_v10, %v6176_v42  ;;  %v10661_v10 = vld [vmem:[#allocation22_spill] sm:$0xff] }
 0x50f   : > { %v5388_v61 = vadd.f32 %v10091_v2, %v5227_v45  ;;  %v5230_v47 = vadd.f32 %v6178_v15, %v10183_v43 }
 0x511   : > { %v5518_v4 = vadd.f32 %v10213_v37, %v5388_v61  ;;  %v5391_v19 = vadd.f32 %v10100_v6, %v5230_v47  ;;  %v10657_v6 = vld [vmem:[#allocation18_spill] sm:$0xff]  ;;  %v10662_v61 = vld [vmem:[#allocation23_spill] sm:$0xff] }
 0x513   : > { %v7410_v63 = vpop.eup %7409  ;;  %v5960_v14 = vmul.f32 -1.442695, %v5518_v4  ;;  %v5519_v7 = vadd.f32 %v10213_v37, %v5391_v19  ;;  %v10663_v19 = vld [vmem:[#allocation24_spill] sm:$0xff] }
 0x514   : > { %v7412_v53 = vpop.eup %7411  ;;  %v5644_v60 = vadd.f32 1.0, %v7410_v63 }
 0x515   : > { %v7414_v3 = vpop.eup %7413  ;;  %v5738_v25 = vmul.f32 %v7412_v53, %v10656_v1  ;;  %7417 = vpow2.f32 %v5960_v14  ;;  %v5961_v58 = vmul.f32 -1.442695, %v5519_v7  ;;  %v6179_v2 = vpop.f32.mrb[64].mxu1 }
 0x516   : > { %v7416_v22 = vpop.eup %7415  ;;  %7419 = vrcp.f32 %v5644_v60  ;;  %v5645_v11 = vadd.f32 1.0, %v7414_v3  ;;  %v6180_v41 = vpop.f32.mrb[65].mxu1 }
 0x517   : > { %5770 = vst.msk [vmem:[%s10245_s19 + $0x50] sm:$0xff] %vm337_vm0, %v5738_v25  ;;  %v5739_v29 = vmul.f32 %v7416_v22, %v10657_v6  ;;  %7421 = vpow2.f32 %v5961_v58  ;;  %v6181_v0 = vadd.f32 %v6180_v41, %v6179_v2  ;;  %v6182_v56 = vpop.f32.mrb[66].mxu1 }
 0x518   : > { %7423 = vrcp.f32 %v5645_v11  ;;  %v6183_v9 = vpop.f32.mrb[67].mxu1 }
 0x519   : > { %5771 = vst.msk [vmem:[%s10245_s19 + $0x58] sm:$0xff] %vm337_vm0, %v5739_v29  ;;  %v5235_v34 = vadd.f32 %v6181_v0, %v10183_v43  ;;  %v6184_v12 = vadd.f32 %v6183_v9, %v6182_v56 }
 0x51b   : > { %v5396_v23 = vadd.f32 %v10205_v59, %v5235_v34  ;;  %v5238_v46 = vadd.f32 %v6184_v12, %v10183_v43 }
 0x51d   : > { %v5520_v31 = vadd.f32 %v10213_v37, %v5396_v23  ;;  %v5399_v27 = vadd.f32 %v10211_v21, %v5238_v46 }
 0x51f   : > { %v7418_v30 = vpop.eup %7417  ;;  %v5962_v50 = vmul.f32 -1.442695, %v5520_v31  ;;  %v5521_v49 = vadd.f32 %v10213_v37, %v5399_v27 }
 0x520   : > { %v7420_v38 = vpop.eup %7419  ;;  %v5646_v26 = vadd.f32 1.0, %v7418_v30 }
 0x521   : > { %v7422_v8 = vpop.eup %7421  ;;  %v5740_v16 = vmul.f32 %v7420_v38, %v10658_v44  ;;  %7425 = vpow2.f32 %v5962_v50  ;;  %v5963_v17 = vmul.f32 -1.442695, %v5521_v49 }
 0x522   : > { %v7424_v59 = vpop.eup %7423  ;;  %7427 = vrcp.f32 %v5646_v26  ;;  %v5647_v54 = vadd.f32 1.0, %v7422_v8 }
 0x523   : > { %5772 = vst.msk [vmem:[%s10245_s19 + $0x60] sm:$0xff] %vm337_vm0, %v5740_v16  ;;  %v5741_v21 = vmul.f32 %v7424_v59, %v10659_v33  ;;  %7429 = vpow2.f32 %v5963_v17 }
 0x524   : > { %7431 = vrcp.f32 %v5647_v54 }
 0x525   : > { %5773 = vst.msk [vmem:[%s10245_s19 + $0x68] sm:$0xff] %vm337_vm0, %v5741_v21 }
 0x52b   : > { %v7426_v18 = vpop.eup %7425 }
 0x52c   : > { %v7428_v52 = vpop.eup %7427  ;;  %v5648_v35 = vadd.f32 1.0, %v7426_v18 }
 0x52d   : > { %v7430_v20 = vpop.eup %7429  ;;  %v5742_v57 = vmul.f32 %v7428_v52, %v10660_v40 }
 0x52e   : > { %v7432_v28 = vpop.eup %7431  ;;  %7433 = vrcp.f32 %v5648_v35  ;;  %v5649_v42 = vadd.f32 1.0, %v7430_v20 }
 0x52f   : > { %5774 = vst.msk [vmem:[%s10245_s19 + $0x70] sm:$0xff] %vm337_vm0, %v5742_v57  ;;  %v5743_v45 = vmul.f32 %v7432_v28, %v10661_v10 }
 0x530   : > { %7435 = vrcp.f32 %v5649_v42 }
 0x531   : > { %5775 = vst.msk [vmem:[%s10245_s19 + $0x78] sm:$0xff] %vm337_vm0, %v5743_v45  ;;  %v10664_v45 = vld [vmem:[#allocation25_spill] sm:$0xff] }
 0x538   : > { %v7434_v15 = vpop.eup %7433 }
 0x539   : > { %v5744_v47 = vmul.f32 %v7434_v15, %v10662_v61 }
 0x53a   : > { %v7436_v4 = vpop.eup %7435 }
 0x53b   : > { %5776 = vst.msk [vmem:[%s10245_s19 + $0x80] sm:$0xff] %vm337_vm0, %v5744_v47  ;;  %v5745_v63 = vmul.f32 %v7436_v4, %v10663_v19 }
 0x53d   : > { %5777 = vst.msk [vmem:[%s10245_s19 + $0x88] sm:$0xff] %vm337_vm0, %v5745_v63 }
 0x543   : > { %v6185_v14 = vpop.f32.mrb[68].mxu1 }
 0x544   : > { %v6186_v7 = vpop.f32.mrb[69].mxu1 }
 0x545   : > { %v6187_v53 = vadd.f32 %v6186_v7, %v6185_v14  ;;  %v6188_v60 = vpop.f32.mrb[70].mxu1 }
 0x546   : > { %v6189_v3 = vpop.f32.mrb[71].mxu1 }
 0x547   : > { %v5243_v1 = vadd.f32 %v6187_v53, %v10183_v43  ;;  %v6190_v25 = vadd.f32 %v6189_v3, %v6188_v60 }
 0x549   : > { %v5404_v58 = vadd.f32 %v10201_v13, %v5243_v1  ;;  %v5246_v2 = vadd.f32 %v6190_v25, %v10183_v43 }
 0x54b   : > { %v5522_v22 = vadd.f32 %v10213_v37, %v5404_v58  ;;  %v5407_v11 = vadd.f32 %v10208_v5, %v5246_v2 }
 0x54d   : > { %v5964_v41 = vmul.f32 -1.442695, %v5522_v22  ;;  %v5523_v6 = vadd.f32 %v10213_v37, %v5407_v11 }
 0x54f   : > { %7437 = vpow2.f32 %v5964_v41  ;;  %v5965_v29 = vmul.f32 -1.442695, %v5523_v6  ;;  %v6191_v0 = vpop.f32.mrb[72].mxu1 }
 0x550   : > { %v6192_v56 = vpop.f32.mrb[73].mxu1 }
 0x551   : > { %7439 = vpow2.f32 %v5965_v29  ;;  %v6193_v9 = vadd.f32 %v6192_v56, %v6191_v0  ;;  %v6194_v34 = vpop.f32.mrb[74].mxu1  ;;  %v10666_v56 = vld [vmem:[#allocation27_spill] sm:$0xff] }
 0x552   : > { %v6195_v12 = vpop.f32.mrb[75].mxu1 }
 0x553   : > { %v5251_v23 = vadd.f32 %v6193_v9, %v10183_v43  ;;  %v6196_v13 = vadd.f32 %v6195_v12, %v6194_v34 }
 0x555   : > { %v5412_v46 = vadd.f32 %v10230_v36, %v5251_v23  ;;  %v5254_v31 = vadd.f32 %v6196_v13, %v10183_v43 }
 0x557   : > { %v5524_v5 = vadd.f32 %v10213_v37, %v5412_v46  ;;  %v5415_v27 = vadd.f32 %v10237_v32, %v5254_v31 }
 0x559   : > { %v7438_v30 = vpop.eup %7437  ;;  %v5966_v50 = vmul.f32 -1.442695, %v5524_v5  ;;  %v5525_v49 = vadd.f32 %v10213_v37, %v5415_v27 }
 0x55a   : > { %v5650_v38 = vadd.f32 1.0, %v7438_v30 }
 0x55b   : > { %v7440_v26 = vpop.eup %7439  ;;  %7441 = vpow2.f32 %v5966_v50  ;;  %v5967_v8 = vmul.f32 -1.442695, %v5525_v49  ;;  %v6197_v44 = vpop.f32.mrb[76].mxu1 }
 0x55c   : > { %7443 = vrcp.f32 %v5650_v38  ;;  %v5651_v16 = vadd.f32 1.0, %v7440_v26  ;;  %v6198_v17 = vpop.f32.mrb[77].mxu1 }
 0x55d   : > { %7445 = vpow2.f32 %v5967_v8  ;;  %v6199_v36 = vadd.f32 %v6198_v17, %v6197_v44  ;;  %v6200_v59 = vpop.f32.mrb[78].mxu1 }
 0x55e   : > { %7447 = vrcp.f32 %v5651_v16  ;;  %v6201_v54 = vpop.f32.mrb[79].mxu1 }
 0x55f   : > { %v5259_v33 = vadd.f32 %v6199_v36, %v10183_v43  ;;  %v6202_v32 = vadd.f32 %v6201_v54, %v6200_v59 }
 0x561   : > { %v5420_v21 = vadd.f32 %v10226_v55, %v5259_v33  ;;  %v5262_v18 = vadd.f32 %v6202_v32, %v10183_v43  ;;  %v10668_v33 = vld [vmem:[#allocation29_spill] sm:$0xff] }
 0x563   : > { %v5526_v52 = vadd.f32 %v10213_v37, %v5420_v21  ;;  %v5423_v35 = vadd.f32 %v10233_v62, %v5262_v18  ;;  %v10665_v62 = vld [vmem:[#allocation26_spill] sm:$0xff] }
 0x565   : > { %v7442_v20 = vpop.eup %7441  ;;  %v5968_v40 = vmul.f32 -1.442695, %v5526_v52  ;;  %v5527_v57 = vadd.f32 %v10213_v37, %v5423_v35 }
 0x566   : > { %v7444_v28 = vpop.eup %7443  ;;  %v5652_v42 = vadd.f32 1.0, %v7442_v20 }
 0x567   : > { %v7446_v10 = vpop.eup %7445  ;;  %v5746_v15 = vmul.f32 %v7444_v28, %v10664_v45  ;;  %7449 = vpow2.f32 %v5968_v40  ;;  %v5969_v61 = vmul.f32 -1.442695, %v5527_v57  ;;  %v6203_v55 = vpop.f32.mrb[80].mxu1 }
 0x568   : > { %v7448_v47 = vpop.eup %7447  ;;  %7451 = vrcp.f32 %v5652_v42  ;;  %v5653_v4 = vadd.f32 1.0, %v7446_v10  ;;  %v6204_v19 = vpop.f32.mrb[81].mxu1 }
 0x569   : > { %5778 = vst.msk [vmem:[%s10245_s19 + $0x90] sm:$0xff] %vm337_vm0, %v5746_v15  ;;  %v5747_v63 = vmul.f32 %v7448_v47, %v10665_v62  ;;  %7453 = vpow2.f32 %v5969_v61  ;;  %v6205_v14 = vadd.f32 %v6204_v19, %v6203_v55  ;;  %v6206_v7 = vpop.f32.mrb[82].mxu1  ;;  %v10670_v55 = vld [vmem:[#allocation31_spill] sm:$0xff] }
 0x56a   : > { %7455 = vrcp.f32 %v5653_v4  ;;  %v6207_v53 = vpop.f32.mrb[83].mxu1 }
 0x56b   : > { %5779 = vst.msk [vmem:[%s10245_s19 + $0x98] sm:$0xff] %vm337_vm0, %v5747_v63  ;;  %v5267_v60 = vadd.f32 %v6205_v14, %v10183_v43  ;;  %v6208_v3 = vadd.f32 %v6207_v53, %v6206_v7  ;;  %v10671_v14 = vld [vmem:[#allocation32_spill] sm:$0xff] }
 0x56d   : > { %v5428_v1 = vadd.f32 %v10270_v39, %v5267_v60  ;;  %v5270_v25 = vadd.f32 %v6208_v3, %v10183_v43 }
 0x56f   : > { %v5528_v58 = vadd.f32 %v10213_v37, %v5428_v1  ;;  %v5431_v2 = vadd.f32 %v10277_v24, %v5270_v25  ;;  %v10667_v24 = vld [vmem:[#allocation28_spill] sm:$0xff] }
 0x571   : > { %v7450_v22 = vpop.eup %7449  ;;  %v5970_v11 = vmul.f32 -1.442695, %v5528_v58  ;;  %v5529_v41 = vadd.f32 %v10213_v37, %v5431_v2 }
 0x572   : > { %v7452_v6 = vpop.eup %7451  ;;  %v5654_v29 = vadd.f32 1.0, %v7450_v22 }
 0x573   : > { %v7454_v0 = vpop.eup %7453  ;;  %v5748_v9 = vmul.f32 %v7452_v6, %v10666_v56  ;;  %7457 = vpow2.f32 %v5970_v11  ;;  %v5971_v34 = vmul.f32 -1.442695, %v5529_v41  ;;  %v6209_v39 = vpop.f32.mrb[84].mxu1 }
 0x574   : > { %v7456_v12 = vpop.eup %7455  ;;  %7459 = vrcp.f32 %v5654_v29  ;;  %v5655_v23 = vadd.f32 1.0, %v7454_v0  ;;  %v6210_v13 = vpop.f32.mrb[85].mxu1 }
 0x575   : > { %5780 = vst.msk [vmem:[%s10245_s19 + $0xa0] sm:$0xff] %vm337_vm0, %v5748_v9  ;;  %v5749_v46 = vmul.f32 %v7456_v12, %v10667_v24  ;;  %7461 = vpow2.f32 %v5971_v34  ;;  %v6211_v31 = vadd.f32 %v6210_v13, %v6209_v39  ;;  %v6212_v5 = vpop.f32.mrb[86].mxu1  ;;  %v10672_v12 = vld [vmem:[#allocation33_spill] sm:$0xff] }
 0x576   : > { %7463 = vrcp.f32 %v5655_v23  ;;  %v6213_v27 = vpop.f32.mrb[87].mxu1 }
 0x577   : > { %5781 = vst.msk [vmem:[%s10245_s19 + $0xa8] sm:$0xff] %vm337_vm0, %v5749_v46  ;;  %v5275_v30 = vadd.f32 %v6211_v31, %v10183_v43  ;;  %v6214_v50 = vadd.f32 %v6213_v27, %v6212_v5  ;;  %v10673_v27 = vld [vmem:[#allocation34_spill] sm:$0xff] }
 0x579   : > { %v5436_v49 = vadd.f32 %v10266_v48, %v5275_v30  ;;  %v5278_v38 = vadd.f32 %v6214_v50, %v10183_v43 }
 0x57b   : > { %v5530_v26 = vadd.f32 %v10213_v37, %v5436_v49  ;;  %v5439_v8 = vadd.f32 %v10273_v51, %v5278_v38  ;;  %v10669_v51 = vld [vmem:[#allocation30_spill] sm:$0xff] }
 0x57d   : > { %v7458_v44 = vpop.eup %7457  ;;  %v5972_v16 = vmul.f32 -1.442695, %v5530_v26  ;;  %v5531_v17 = vadd.f32 %v10213_v37, %v5439_v8 }
 0x57e   : > { %v7460_v36 = vpop.eup %7459  ;;  %v5656_v59 = vadd.f32 1.0, %v7458_v44 }
 0x57f   : > { %v7462_v54 = vpop.eup %7461  ;;  %v5750_v32 = vmul.f32 %v7460_v36, %v10668_v33  ;;  %7465 = vpow2.f32 %v5972_v16  ;;  %v5973_v21 = vmul.f32 -1.442695, %v5531_v17  ;;  %v6215_v48 = vpop.f32.mrb[88].mxu1 }
 0x580   : > { %v7464_v18 = vpop.eup %7463  ;;  %7467 = vrcp.f32 %v5656_v59  ;;  %v5657_v52 = vadd.f32 1.0, %v7462_v54  ;;  %v6216_v35 = vpop.f32.mrb[89].mxu1 }
 0x581   : > { %5782 = vst.msk [vmem:[%s10245_s19 + $0xb0] sm:$0xff] %vm337_vm0, %v5750_v32  ;;  %v5751_v20 = vmul.f32 %v7464_v18, %v10669_v51  ;;  %7469 = vpow2.f32 %v5973_v21  ;;  %v6217_v40 = vadd.f32 %v6216_v35, %v6215_v48  ;;  %v6218_v57 = vpop.f32.mrb[90].mxu1  ;;  %v10674_v32 = vld [vmem:[#allocation37_spill] sm:$0xff]  ;;  %v10675_v18 = vld [vmem:[#allocation35_spill] sm:$0xff]  ;;  %v10676_v51 = vld [vmem:[#allocation38_spill] sm:$0xff] }
 0x582   : > { %7471 = vrcp.f32 %v5657_v52  ;;  %v6219_v28 = vpop.f32.mrb[91].mxu1 }
 0x583   : > { %5783 = vst.msk [vmem:[%s10245_s19 + $0xb8] sm:$0xff] %vm337_vm0, %v5751_v20  ;;  %v6220_v42 = vadd.f32 %v6219_v28, %v6218_v57  ;;  %v5283_v2 = vadd.f32 %v6217_v40, %v10183_v43  ;;  %v10677_v40 = vld [vmem:[#allocation36_spill] sm:$0xff] }
 0x585   : > { %v5286_v0 = vadd.f32 %v6220_v42, %v10183_v43 }
 0x589   : > { %v7466_v10 = vpop.eup %7465 }
 0x58a   : > { %v7468_v45 = vpop.eup %7467  ;;  %v5658_v15 = vadd.f32 1.0, %v7466_v10 }
 0x58b   : > { %v7470_v61 = vpop.eup %7469  ;;  %v5752_v47 = vmul.f32 %v7468_v45, %v10670_v55  ;;  %v6221_v4 = vpop.f32.mrb[92].mxu1 }
 0x58c   : > { %v7472_v19 = vpop.eup %7471  ;;  %7473 = vrcp.f32 %v5658_v15  ;;  %v5659_v62 = vadd.f32 1.0, %v7470_v61  ;;  %v6222_v63 = vpop.f32.mrb[93].mxu1 }
 0x58d   : > { %5784 = vst.msk [vmem:[%s10245_s19 + $0xc0] sm:$0xff] %vm337_vm0, %v5752_v47  ;;  %v5753_v7 = vmul.f32 %v7472_v19, %v10671_v14  ;;  %v6223_v53 = vadd.f32 %v6222_v63, %v6221_v4  ;;  %v6224_v60 = vpop.f32.mrb[94].mxu1 }
 0x58e   : > { %7475 = vrcp.f32 %v5659_v62  ;;  %v6225_v3 = vpop.f32.mrb[95].mxu1 }
 0x58f   : > { %5785 = vst.msk [vmem:[%s10245_s19 + $0xc8] sm:$0xff] %vm337_vm0, %v5753_v7  ;;  %v6226_v1 = vadd.f32 %v6225_v3, %v6224_v60  ;;  %v5291_v25 = vadd.f32 %v6223_v53, %v10183_v43 }
 0x591   : > { %v5294_v41 = vadd.f32 %v6226_v1, %v10183_v43 }
 0x593   : > { %v6315_v58 = vpop.f32.mrb[96].mxu1 }
 0x594   : > { %v5452_v22 = vadd.f32 %v6315_v58, %v5291_v25  ;;  %v5443_v11 = vpop.f32.mrb[97].mxu1 }
 0x595   : > { %v5444_v6 = vadd.f32 %v5443_v11, %v5283_v2  ;;  %v6316_v29 = vpop.f32.mrb[98].mxu1 }
 0x596   : > { %v7474_v56 = vpop.eup %7473  ;;  %v5534_v9 = vadd.f32 %v10213_v37, %v5452_v22  ;;  %v5455_v34 = vadd.f32 %v6316_v29, %v5294_v41  ;;  %v5446_v39 = vpop.f32.mrb[99].mxu1 }
 0x597   : > { %v5754_v23 = vmul.f32 %v7474_v56, %v10672_v12  ;;  %v5532_v13 = vadd.f32 %v10213_v37, %v5444_v6  ;;  %v5447_v24 = vadd.f32 %v5446_v39, %v5286_v0 }
 0x598   : > { %v7476_v46 = vpop.eup %7475  ;;  %v5976_v31 = vmul.f32 -1.442695, %v5534_v9  ;;  %v5535_v5 = vadd.f32 %v10213_v37, %v5455_v34 }
 0x599   : > { %5786 = vst.msk [vmem:[%s10245_s19 + $0xd0] sm:$0xff] %vm337_vm0, %v5754_v23  ;;  %v5755_v30 = vmul.f32 %v7476_v46, %v10673_v27  ;;  %v5974_v43 = vmul.f32 -1.442695, %v5532_v13  ;;  %v5533_v50 = vadd.f32 %v10213_v37, %v5447_v24 }
 0x59a   : > { %7477 = vpow2.f32 %v5976_v31  ;;  %v5977_v49 = vmul.f32 -1.442695, %v5535_v5 }
 0x59b   : > { %5787 = vst.msk [vmem:[%s10245_s19 + $0xd8] sm:$0xff] %vm337_vm0, %v5755_v30  ;;  %7479 = vpow2.f32 %v5974_v43  ;;  %v5975_v38 = vmul.f32 -1.442695, %v5533_v50 }
 0x59c   : > { %7481 = vpow2.f32 %v5977_v49 }
 0x59d   : > { %7483 = vpow2.f32 %v5975_v38 }
 0x5a4   : > { %v7478_v26 = vpop.eup %7477 }
 0x5a5   : > { %v7480_v8 = vpop.eup %7479  ;;  %v5662_v44 = vadd.f32 1.0, %v7478_v26 }
 0x5a6   : > { %v7482_v16 = vpop.eup %7481  ;;  %v5660_v17 = vadd.f32 1.0, %v7480_v8 }
 0x5a7   : > { %v7484_v36 = vpop.eup %7483  ;;  %7485 = vrcp.f32 %v5662_v44  ;;  %v5663_v59 = vadd.f32 1.0, %v7482_v16 }
 0x5a8   : > { %7487 = vrcp.f32 %v5660_v17  ;;  %v5661_v37 = vadd.f32 1.0, %v7484_v36 }
 0x5a9   : > { %7489 = vrcp.f32 %v5663_v59 }
 0x5aa   : > { %7491 = vrcp.f32 %v5661_v37 }
 0x5b1   : > { %v7486_v54 = vpop.eup %7485 }
 0x5b2   : > { %v7488_v33 = vpop.eup %7487  ;;  %v5758_v21 = vmul.f32 %v7486_v54, %v10674_v32 }
 0x5b3   : > { %v7490_v48 = vpop.eup %7489  ;;  %v5756_v52 = vmul.f32 %v7488_v33, %v10675_v18 }
 0x5b4   : > { %v7492_v35 = vpop.eup %7491  ;;  %5790 = vst.msk [vmem:[%s10245_s19 + $0xf0] sm:$0xff] %vm337_vm0, %v5758_v21  ;;  %v5759_v20 = vmul.f32 %v7490_v48, %v10676_v51 }
 0x5b5   : > { %5788 = vst.msk [vmem:[%s10245_s19 + $0xe0] sm:$0xff] %vm337_vm0, %v5756_v52  ;;  %v5757_v57 = vmul.f32 %v7492_v35, %v10677_v40 }
 0x5b6   : > { %5791 = vst.msk [vmem:[%s10245_s19 + $0xf8] sm:$0xff] %vm337_vm0, %v5759_v20 }
 0x5b7   : > { %5789 = vst.msk [vmem:[%s10245_s19 + $0xe8] sm:$0xff] %vm337_vm0, %v5757_v57 }
 0x5b8   : > { %7523 = shalt.err (!%p7520_p3)
}
 0x5b9   : > { %s7524_s17 = scalar_lea.hbm %s10414_s26, 4096  ;;  %s7528_s19 = scalar_lea.hbm %s10476_s8, 8192 }
 0x5ba   : > { %p7525_p4 = scmp.ne.s32.totalorder %s10414_s26, %s7524_s17  ;;  %p7529_p9 = scmp.lt.u32.totalorder %s10414_s26, %s10476_s8 }
 0x5bb   : > { %p7530_p10 = scmp.lt.u32.totalorder %s7528_s19, %s7524_s17  ;;  %p7532_p12 = scmp.lt.u32.totalorder %s7524_s17, %s10414_s26 }
 0x5bc   : > { %p7526_p7 = pnand %p7525_p4, %p7665_p5 }
 0x5bd   : > { %p7531_p11 = por %p7530_p10, %p7529_p9 }
 0x5be   : > { %p7527_p8 = pneg %p7526_p7 }
 0x5bf   : > { %p7533_p13 = por %p7532_p12, %p7531_p11 }
 0x5c1   : > { %p7534_p0 = pnand %p7533_p13, %p7527_p8 }
 0x5c3   : > { %7537 = shalt.err (!%p7534_p0)
}
 0x5c4   : > { %s7580_s25 = smov 128   ;;  %s7581_s10 = smov 8  }
 0x5c5   : > { %6321 = dma.vmem_to_hbm [thread:$0]  (%p7665_p5), %s10416_s22, 4096, %s10414_s26, %s10427_s9, %s7580_s25, %s7580_s25, %s7581_s10  }
 0x5c6 PF: > { %p6327_p1 = scmp.ge.s32.totalorder %s7572_s30, 2  ;;  %s5821_s12 = sand.u32 1, %s7560_s27  }
 0x5c7   : > { %s5822_s13 = scalar_lea.sflag [#allocation4], %s5821_s12 }
 0x5c8   : > { %p6324_p2 = pnand %p6327_p1, %p7669_p6 }
 0x5ca   : > { %7555 = dma.done.wait (!%p6324_p2), %s5822_s13, 4096  }
 0x5cb   : > { %7557 = vsyncadd (!%p6324_p2), %s5822_s13, 4294963200  ;;  %p18_p3 = scmp.ge.s32.totalorder %s7652_s11, 4   ;;  %s10678_s27 = smov %s7564_s28 }
 0x5cc   : > { %s10679_s28 = smov %s7568_s29  ;;  %s10680_s29 = smov %s7663_s14 }
 0x5cd   : > { %s10681_s30 = smov %s7652_s11  ;;  %20 = sbr.rel (!%p18_p3) target bundleno = 3 (0x3), region = 90 }
 0x5d4   :  { %5827 = vsyncpa [#allocation4], 1 }
 0x5d5   :  { %5829 = vsyncpa [#allocation4 + $0x1], 1 }

</bundles_post_ra>
